<compile_context>
chip_gen: v7x
topology: tpu7x:2x2x1
jax: 0.10.0
libtpu: 0.0.40
codegen_flags: <defaults>
</compile_context>

<pallas_src>
import jax
import jax.numpy as jnp
from jax.experimental import pallas as pl
from jax.experimental.pallas import tpu as pltpu


# ----------------------------------------------------------------------------
# Helpers
# ----------------------------------------------------------------------------
def _row_tile(n, target):
    """Largest multiple of 8 that divides n and is <= target (fallback: n)."""
    t = min(target, n)
    t -= t % 8
    while t >= 8:
        if n % t == 0:
            return t
        t -= 8
    return n


def _compiler_params():
    # 48 MiB: generous vs. the default scoped VMEM on v5e/v6e, safe (<75%) on
    # v7x's 64 MiB physical VMEM.  "parallel" -> megacore sharding on v7x.
    return pltpu.CompilerParams(
        dimension_semantics=("parallel",),
        vmem_limit_bytes=48 << 20,
    )


# ----------------------------------------------------------------------------
# Kernels
# ----------------------------------------------------------------------------
def _linear_norm_kernel(x_ref, w_ref, b_ref, out_ref):
    """out = bf16( 1.8 * normalize(x @ W + b, dim=1) ), per row tile."""
    h = jnp.dot(x_ref[...].astype(jnp.bfloat16),
                w_ref[...].astype(jnp.bfloat16),
                preferred_element_type=jnp.float32) + b_ref[...]
    ss = jnp.sum(h * h, axis=1, keepdims=True)
    # max(||h||_2, 1e-12) == sqrt(max(ss, 1e-24))
    scale = 1.8 * jax.lax.rsqrt(jnp.maximum(ss, 1e-24))
    out_ref[...] = (h * scale).astype(out_ref.dtype)


def _adj_prop_kernel(adj_ref, hw_ref, out_ref):
    """Final layer: out = adj_tile @ hw (fp32 output)."""
    a = adj_ref[...].astype(jnp.bfloat16)        # cast the streamed tile
    out_ref[...] = jnp.dot(a, hw_ref[...], preferred_element_type=jnp.float32)


def _adj_prop_fused_kernel(adj_ref, hw_ref, w_ref, b_ref, out_ref):
    """g = adj_tile @ hw (layer i) immediately followed by layer i+1's
    Linear + normalize + 1.8 (row-local), emitted as bf16."""
    a = adj_ref[...].astype(jnp.bfloat16)
    g = jnp.dot(a, hw_ref[...], preferred_element_type=jnp.float32)
    h = jnp.dot(g.astype(jnp.bfloat16),
                w_ref[...].astype(jnp.bfloat16),
                preferred_element_type=jnp.float32) + b_ref[...]
    ss = jnp.sum(h * h, axis=1, keepdims=True)
    scale = 1.8 * jax.lax.rsqrt(jnp.maximum(ss, 1e-24))
    out_ref[...] = (h * scale).astype(out_ref.dtype)


# ----------------------------------------------------------------------------
# pallas_call wrappers
# ----------------------------------------------------------------------------
def _linear_norm(x, w, b, row_tile):
    n, fin = x.shape
    fout = w.shape[1]
    tm = _row_tile(n, row_tile)
    return pl.pallas_call(
        _linear_norm_kernel,
        out_shape=jax.ShapeDtypeStruct((n, fout), jnp.bfloat16),
        grid=(n // tm,),
        in_specs=[
            pl.BlockSpec((tm, fin), lambda i: (i, 0)),     # streamed row tiles
            pl.BlockSpec((fin, fout), lambda i: (0, 0)),   # resident
            pl.BlockSpec((1, fout), lambda i: (0, 0)),     # resident
        ],
        out_specs=pl.BlockSpec((tm, fout), lambda i: (i, 0)),
        compiler_params=_compiler_params(),
        cost_estimate=pl.CostEstimate(
            flops=2 * n * fin * fout,
            transcendentals=n,
            bytes_accessed=n * fin * 4 + fin * fout * 4 + fout * 4
                           + n * fout * 2),
    )(x, w, b)


def _adj_prop(adj, hw, row_tile):
    n = adj.shape[0]
    f = hw.shape[1]
    tm = _row_tile(n, row_tile)
    return pl.pallas_call(
        _adj_prop_kernel,
        out_shape=jax.ShapeDtypeStruct((n, f), jnp.float32),
        grid=(n // tm,),
        in_specs=[
            pl.BlockSpec((tm, n), lambda i: (i, 0)),       # adj row tiles (fp32)
            pl.BlockSpec((n, f), lambda i: (0, 0)),        # hw resident (bf16)
        ],
        out_specs=pl.BlockSpec((tm, f), lambda i: (i, 0)),
        compiler_params=_compiler_params(),
        cost_estimate=pl.CostEstimate(
            flops=2 * n * n * f,
            transcendentals=0,
            bytes_accessed=n * n * 4 + n * f * 2 + n * f * 4),
    )(adj, hw)


def _adj_prop_fused(adj, hw, w_next, b_next, row_tile):
    n = adj.shape[0]
    f_in = hw.shape[1]
    f_out = w_next.shape[1]
    tm = _row_tile(n, row_tile)
    return pl.pallas_call(
        _adj_prop_fused_kernel,
        out_shape=jax.ShapeDtypeStruct((n, f_out), jnp.bfloat16),
        grid=(n // tm,),
        in_specs=[
            pl.BlockSpec((tm, n), lambda i: (i, 0)),       # adj row tiles (fp32)
            pl.BlockSpec((n, f_in), lambda i: (0, 0)),     # hw resident (bf16)
            pl.BlockSpec((f_in, f_out), lambda i: (0, 0)), # W_{i+1} resident
            pl.BlockSpec((1, f_out), lambda i: (0, 0)),    # b_{i+1} resident
        ],
        out_specs=pl.BlockSpec((tm, f_out), lambda i: (i, 0)),
        compiler_params=_compiler_params(),
        cost_estimate=pl.CostEstimate(
            flops=2 * n * n * f_in + 2 * n * f_in * f_out,
            transcendentals=n,
            bytes_accessed=n * n * 4 + n * f_in * 2 + f_in * f_out * 4
                           + f_out * 4 + n * f_out * 2),
    )(adj, hw, w_next, b_next)


def ngcn_forward(adj, x, weights, biases, *, row_tile=256):
    """weights[i]: (F_in_i, F_out_i) fp32 (transpose of torch Linear.weight);
    biases[i]: (1, F_out_i) fp32."""
    num_layers = len(weights)
    # Layer 0 Linear + normalize (row-parallel, tiled over rows of x).
    hw = _linear_norm(x, weights[0], biases[0], row_tile)
    # Layers 0..L-2: adj propagation fused with the NEXT layer's Linear+norm.
    for i in range(num_layers - 1):
        hw = _adj_prop_fused(adj, hw, weights[i + 1], biases[i + 1], row_tile)
    # Last layer: plain adj propagation, fp32 output.
    return _adj_prop(adj, hw, row_tile)


# ----------------------------------------------------------------------------
# Pure-JAX fp32 reference (for validation of the bf16-MXU path).
# ----------------------------------------------------------------------------
def ngcn_reference(adj, x, weights, biases):
    h = x
    for w, b in zip(weights, biases):
        h = h @ w + b
        norm = jnp.sqrt(jnp.sum(h * h, axis=1, keepdims=True))
        h = h / jnp.maximum(norm, 1e-12) * 1.8
        h = adj @ h
    return h


# ----------------------------------------------------------------------------
# Parameter init (matches torch.nn.Linear default: U(-1/sqrt(fan_in), +...))
# ----------------------------------------------------------------------------
def init_params(key, in_feature, layers):
    dims = [in_feature] + list(layers)
    weights, biases = [], []
    for i in range(len(dims) - 1):
        fan_in, fan_out = dims[i], dims[i + 1]
        lim = 1.0 / (fan_in ** 0.5)
        key, kw, kb = jax.random.split(key, 3)
        # stored as (F_in, F_out) == transpose of torch's (F_out, F_in)
        weights.append(jax.random.uniform(kw, (fan_in, fan_out), jnp.float32,
                                          minval=-lim, maxval=lim))
        biases.append(jax.random.uniform(kb, (1, fan_out), jnp.float32,
                                         minval=-lim, maxval=lim))
    return weights, biases


if __name__ == "__main__":
    # Small, deterministic problem.  N=512 with row_tile=256 gives a 2-step
    # grid so the pipelined / parallel path is actually exercised; layer
    # widths are multiples of 128 so all stores are lane-dense.
    N = 512
    IN_FEATURE = 64
    LAYERS = [128, 128]

    key = jax.random.PRNGKey(0)
    k_adj, k_x, k_params = jax.random.split(key, 3)

    # Symmetric, row-normalized adjacency (deterministic), kept fp32 in HBM.
    a = jax.random.uniform(k_adj, (N, N), jnp.float32)
    a = (a + a.T) * 0.5 + jnp.eye(N, dtype=jnp.float32)
    adj = a / jnp.sum(a, axis=1, keepdims=True)

    x = jax.random.normal(k_x, (N, IN_FEATURE), jnp.float32)
    weights, biases = init_params(k_params, IN_FEATURE, LAYERS)

    fwd = jax.jit(ngcn_forward)
    out = fwd(adj, x, weights, biases)
    jax.block_until_ready(out)

    assert out.shape == (N, LAYERS[-1])
    assert bool(jnp.all(jnp.isfinite(out)))

    # Validate the bf16-MXU kernels against the fp32 reference.
    ref = ngcn_reference(adj, x, weights, biases)
    max_err = float(jnp.max(jnp.abs(out - ref)))
    assert max_err < 5e-2, f"max abs error vs fp32 reference: {max_err}"

    print("KERNEL_OK")
</pallas_src>

<mosaic_0001>
module attributes {stable_mosaic.version = 11 : i64} {
  func.func @_adj_prop_kernel(%arg0: i32, %arg1: memref<256x512xf32, #tpu.memory_space<vmem>>, %arg2: memref<512x128xbf16, #tpu.memory_space<vmem>>, %arg3: memref<256x128xf32, #tpu.memory_space<vmem>>) attributes {dimension_semantics = [#tpu.dimension_semantics<parallel>], iteration_bounds = array<i64: 2>, scalar_prefetch = 0 : i64, scratch_operands = 0 : i64, tpu.core_type = #tpu.core_type<tc>, window_params = [{transform_indices = @transform_0, window_bounds = array<i64: 256, 512>}, {pipeline_mode = #tpu.pipeline_mode<synchronous>, transform_indices = @transform_1, window_bounds = array<i64: 512, 128>}, {transform_indices = @transform_2, window_bounds = array<i64: 256, 128>}]} {
    %c0 = arith.constant 0 : index
    %c0_0 = arith.constant 0 : index
    %0 = vector.load %arg1[%c0, %c0_0] : memref<256x512xf32, #tpu.memory_space<vmem>>, vector<256x512xf32>
    %1 = arith.truncf %0 : vector<256x512xf32> to vector<256x512xbf16>
    %c0_1 = arith.constant 0 : index
    %c0_2 = arith.constant 0 : index
    %2 = vector.load %arg2[%c0_1, %c0_2] : memref<512x128xbf16, #tpu.memory_space<vmem>>, vector<512x128xbf16>
    %cst = arith.constant dense<0.000000e+00> : vector<256x128xf32>
    %3 = tpu.matmul %1, %2, %cst {dimension_numbers = #tpu.dot_dimension_numbers<[1], [0], [0], [1], [0, 0, 1, 1], [], []>} : vector<256x512xbf16>, vector<512x128xbf16>, vector<256x128xf32> -> vector<256x128xf32>
    %c0_3 = arith.constant 0 : index
    %c0_4 = arith.constant 0 : index
    %4 = vector.load %arg3[%c0_3, %c0_4] : memref<256x128xf32, #tpu.memory_space<vmem>>, vector<256x128xf32>
    tpu.vector_store %arg3[%c0_3, %c0_4], %3 {strides = array<i32>} : memref<256x128xf32, #tpu.memory_space<vmem>>, vector<256x128xf32>,
    return
  }
  func.func @transform_0(%arg0: i32) -> (i32, i32) {
    %c0_i32 = arith.constant 0 : i32
    %c0_i32_0 = arith.constant 0 : i32
    return %arg0, %c0_i32 : i32, i32
  }
  func.func @transform_1(%arg0: i32) -> (i32, i32) {
    %c0_i32 = arith.constant 0 : i32
    %c0_i32_0 = arith.constant 0 : i32
    %c0_i32_1 = arith.constant 0 : i32
    return %c0_i32, %c0_i32_0 : i32, i32
  }
  func.func @transform_2(%arg0: i32) -> (i32, i32) {
    %c0_i32 = arith.constant 0 : i32
    %c0_i32_0 = arith.constant 0 : i32
    return %arg0, %c0_i32 : i32, i32
  }
}

module attributes {stable_mosaic.version = 11 : i64} {
  func.func @_linear_norm_kernel(%arg0: i32, %arg1: memref<256x64xf32, #tpu.memory_space<vmem>>, %arg2: memref<64x128xf32, #tpu.memory_space<vmem>>, %arg3: memref<1x128xf32, #tpu.memory_space<vmem>>, %arg4: memref<256x128xbf16, #tpu.memory_space<vmem>>) attributes {dimension_semantics = [#tpu.dimension_semantics<parallel>], iteration_bounds = array<i64: 2>, scalar_prefetch = 0 : i64, scratch_operands = 0 : i64, tpu.core_type = #tpu.core_type<tc>, window_params = [{transform_indices = @transform_0, window_bounds = array<i64: 256, 64>}, {pipeline_mode = #tpu.pipeline_mode<synchronous>, transform_indices = @transform_1, window_bounds = array<i64: 64, 128>}, {pipeline_mode = #tpu.pipeline_mode<synchronous>, transform_indices = @transform_2, window_bounds = array<i64: 1, 128>}, {transform_indices = @transform_3, window_bounds = array<i64: 256, 128>}]} {
    %c0 = arith.constant 0 : index
    %c0_0 = arith.constant 0 : index
    %0 = vector.load %arg1[%c0, %c0_0] : memref<256x64xf32, #tpu.memory_space<vmem>>, vector<256x64xf32>
    %1 = arith.truncf %0 : vector<256x64xf32> to vector<256x64xbf16>
    %c0_1 = arith.constant 0 : index
    %c0_2 = arith.constant 0 : index
    %2 = vector.load %arg2[%c0_1, %c0_2] : memref<64x128xf32, #tpu.memory_space<vmem>>, vector<64x128xf32>
    %3 = arith.truncf %2 : vector<64x128xf32> to vector<64x128xbf16>
    %cst = arith.constant dense<0.000000e+00> : vector<256x128xf32>
    %4 = tpu.matmul %1, %3, %cst {dimension_numbers = #tpu.dot_dimension_numbers<[1], [0], [0], [1], [0, 0, 1, 1], [], []>} : vector<256x64xbf16>, vector<64x128xbf16>, vector<256x128xf32> -> vector<256x128xf32>
    %c0_3 = arith.constant 0 : index
    %c0_4 = arith.constant 0 : index
    %5 = vector.load %arg3[%c0_3, %c0_4] : memref<1x128xf32, #tpu.memory_space<vmem>>, vector<1x128xf32>
    %6 = vector.broadcast %5 : vector<1x128xf32> to vector<256x128xf32>
    %7 = arith.addf %4, %6 : vector<256x128xf32>
    %8 = arith.mulf %7, %7 : vector<256x128xf32>
    %cst_5 = arith.constant dense<0.000000e+00> : vector<256xf32>
    %9 = vector.multi_reduction <add>, %8, %cst_5 [1] : vector<256x128xf32> to vector<256xf32>
    %10 = vector.shape_cast %9 : vector<256xf32> to vector<256x1xf32>
    %cst_6 = arith.constant 1.000000e-24 : f32
    %11 = vector.broadcast %cst_6 : f32 to vector<256x1xf32>
    %12 = arith.maximumf %10, %11 : vector<256x1xf32>
    %13 = math.rsqrt %12 : vector<256x1xf32>
    %cst_7 = arith.constant 1.800000e+00 : f32
    %14 = vector.broadcast %cst_7 : f32 to vector<256x1xf32>
    %15 = arith.mulf %14, %13 : vector<256x1xf32>
    %16 = vector.broadcast %15 : vector<256x1xf32> to vector<256x128xf32>
    %17 = arith.mulf %7, %16 : vector<256x128xf32>
    %18 = arith.truncf %17 : vector<256x128xf32> to vector<256x128xbf16>
    %c0_8 = arith.constant 0 : index
    %c0_9 = arith.constant 0 : index
    %19 = vector.load %arg4[%c0_8, %c0_9] : memref<256x128xbf16, #tpu.memory_space<vmem>>, vector<256x128xbf16>
    tpu.vector_store %arg4[%c0_8, %c0_9], %18 {strides = array<i32>} : memref<256x128xbf16, #tpu.memory_space<vmem>>, vector<256x128xbf16>,
    return
  }
  func.func @transform_0(%arg0: i32) -> (i32, i32) {
    %c0_i32 = arith.constant 0 : i32
    %c0_i32_0 = arith.constant 0 : i32
    return %arg0, %c0_i32 : i32, i32
  }
  func.func @transform_1(%arg0: i32) -> (i32, i32) {
    %c0_i32 = arith.constant 0 : i32
    %c0_i32_0 = arith.constant 0 : i32
    %c0_i32_1 = arith.constant 0 : i32
    return %c0_i32, %c0_i32_0 : i32, i32
  }
  func.func @transform_2(%arg0: i32) -> (i32, i32) {
    %c0_i32 = arith.constant 0 : i32
    %c0_i32_0 = arith.constant 0 : i32
    %c0_i32_1 = arith.constant 0 : i32
    return %c0_i32, %c0_i32_0 : i32, i32
  }
  func.func @transform_3(%arg0: i32) -> (i32, i32) {
    %c0_i32 = arith.constant 0 : i32
    %c0_i32_0 = arith.constant 0 : i32
    return %arg0, %c0_i32 : i32, i32
  }
}

module attributes {stable_mosaic.version = 11 : i64} {
  func.func @_adj_prop_fused_kernel(%arg0: i32, %arg1: memref<256x512xf32, #tpu.memory_space<vmem>>, %arg2: memref<512x128xbf16, #tpu.memory_space<vmem>>, %arg3: memref<128x128xf32, #tpu.memory_space<vmem>>, %arg4: memref<1x128xf32, #tpu.memory_space<vmem>>, %arg5: memref<256x128xbf16, #tpu.memory_space<vmem>>) attributes {dimension_semantics = [#tpu.dimension_semantics<parallel>], iteration_bounds = array<i64: 2>, scalar_prefetch = 0 : i64, scratch_operands = 0 : i64, tpu.core_type = #tpu.core_type<tc>, window_params = [{transform_indices = @transform_0, window_bounds = array<i64: 256, 512>}, {pipeline_mode = #tpu.pipeline_mode<synchronous>, transform_indices = @transform_1, window_bounds = array<i64: 512, 128>}, {pipeline_mode = #tpu.pipeline_mode<synchronous>, transform_indices = @transform_2, window_bounds = array<i64: 128, 128>}, {pipeline_mode = #tpu.pipeline_mode<synchronous>, transform_indices = @transform_3, window_bounds = array<i64: 1, 128>}, {transform_indices = @transform_4, window_bounds = array<i64: 256, 128>}]} {
    %c0 = arith.constant 0 : index
    %c0_0 = arith.constant 0 : index
    %0 = vector.load %arg1[%c0, %c0_0] : memref<256x512xf32, #tpu.memory_space<vmem>>, vector<256x512xf32>
    %1 = arith.truncf %0 : vector<256x512xf32> to vector<256x512xbf16>
    %c0_1 = arith.constant 0 : index
    %c0_2 = arith.constant 0 : index
    %2 = vector.load %arg2[%c0_1, %c0_2] : memref<512x128xbf16, #tpu.memory_space<vmem>>, vector<512x128xbf16>
    %cst = arith.constant dense<0.000000e+00> : vector<256x128xf32>
    %3 = tpu.matmul %1, %2, %cst {dimension_numbers = #tpu.dot_dimension_numbers<[1], [0], [0], [1], [0, 0, 1, 1], [], []>} : vector<256x512xbf16>, vector<512x128xbf16>, vector<256x128xf32> -> vector<256x128xf32>
    %4 = arith.truncf %3 : vector<256x128xf32> to vector<256x128xbf16>
    %c0_3 = arith.constant 0 : index
    %c0_4 = arith.constant 0 : index
    %5 = vector.load %arg3[%c0_3, %c0_4] : memref<128x128xf32, #tpu.memory_space<vmem>>, vector<128x128xf32>
    %6 = arith.truncf %5 : vector<128x128xf32> to vector<128x128xbf16>
    %cst_5 = arith.constant dense<0.000000e+00> : vector<256x128xf32>
    %7 = tpu.matmul %4, %6, %cst_5 {dimension_numbers = #tpu.dot_dimension_numbers<[1], [0], [0], [1], [0, 0, 1, 1], [], []>} : vector<256x128xbf16>, vector<128x128xbf16>, vector<256x128xf32> -> vector<256x128xf32>
    %c0_6 = arith.constant 0 : index
    %c0_7 = arith.constant 0 : index
    %8 = vector.load %arg4[%c0_6, %c0_7] : memref<1x128xf32, #tpu.memory_space<vmem>>, vector<1x128xf32>
    %9 = vector.broadcast %8 : vector<1x128xf32> to vector<256x128xf32>
    %10 = arith.addf %7, %9 : vector<256x128xf32>
    %11 = arith.mulf %10, %10 : vector<256x128xf32>
    %cst_8 = arith.constant dense<0.000000e+00> : vector<256xf32>
    %12 = vector.multi_reduction <add>, %11, %cst_8 [1] : vector<256x128xf32> to vector<256xf32>
    %13 = vector.shape_cast %12 : vector<256xf32> to vector<256x1xf32>
    %cst_9 = arith.constant 1.000000e-24 : f32
    %14 = vector.broadcast %cst_9 : f32 to vector<256x1xf32>
    %15 = arith.maximumf %13, %14 : vector<256x1xf32>
    %16 = math.rsqrt %15 : vector<256x1xf32>
    %cst_10 = arith.constant 1.800000e+00 : f32
    %17 = vector.broadcast %cst_10 : f32 to vector<256x1xf32>
    %18 = arith.mulf %17, %16 : vector<256x1xf32>
    %19 = vector.broadcast %18 : vector<256x1xf32> to vector<256x128xf32>
    %20 = arith.mulf %10, %19 : vector<256x128xf32>
    %21 = arith.truncf %20 : vector<256x128xf32> to vector<256x128xbf16>
    %c0_11 = arith.constant 0 : index
    %c0_12 = arith.constant 0 : index
    %22 = vector.load %arg5[%c0_11, %c0_12] : memref<256x128xbf16, #tpu.memory_space<vmem>>, vector<256x128xbf16>
    tpu.vector_store %arg5[%c0_11, %c0_12], %21 {strides = array<i32>} : memref<256x128xbf16, #tpu.memory_space<vmem>>, vector<256x128xbf16>,
    return
  }
  func.func @transform_0(%arg0: i32) -> (i32, i32) {
    %c0_i32 = arith.constant 0 : i32
    %c0_i32_0 = arith.constant 0 : i32
    return %arg0, %c0_i32 : i32, i32
  }
  func.func @transform_1(%arg0: i32) -> (i32, i32) {
    %c0_i32 = arith.constant 0 : i32
    %c0_i32_0 = arith.constant 0 : i32
    %c0_i32_1 = arith.constant 0 : i32
    return %c0_i32, %c0_i32_0 : i32, i32
  }
  func.func @transform_2(%arg0: i32) -> (i32, i32) {
    %c0_i32 = arith.constant 0 : i32
    %c0_i32_0 = arith.constant 0 : i32
    %c0_i32_1 = arith.constant 0 : i32
    return %c0_i32, %c0_i32_0 : i32, i32
  }
  func.func @transform_3(%arg0: i32) -> (i32, i32) {
    %c0_i32 = arith.constant 0 : i32
    %c0_i32_0 = arith.constant 0 : i32
    %c0_i32_1 = arith.constant 0 : i32
    return %c0_i32, %c0_i32_0 : i32, i32
  }
  func.func @transform_4(%arg0: i32) -> (i32, i32) {
    %c0_i32 = arith.constant 0 : i32
    %c0_i32_0 = arith.constant 0 : i32
    return %arg0, %c0_i32 : i32, i32
  }
}

</mosaic_0001>

<bundles_post_ra>
// kernel: ngcn_forward.3
= control target key start
LH: loop header
LB: loop body
LE: loop exit
PB: predicated region body
PF: predicated region fallthrough
CT: control target
= control target key end

     0   :  { %8 = vsyncpa [#allocation3], 0  ;;  %s1324_s12 = smov 0   ;;  %s1652_s0 = inlined_call_operand.vmem [shape: f32[512,64], index: 0, kind: input, shape index: {}]   ;;  %s1653_s1 = inlined_call_operand.hbm [shape: f32[64,128], index: 1, kind: input, shape index: {}]   ;;  %s1654_s2 = inlined_call_operand.vmem [shape: f32[1,128], index: 2, kind: input, shape index: {}]   ;;  %s1655_s3 = inlined_call_operand.vmem [shape: bf16[512,128], index: 3, kind: output, shape index: {}]  }
   0x1 LB: > { %s919_s13 = sadd.s32 4294967295, %s1299_s12   ;;  %p921_p0 = scmp.ge.s32.totalorder %s1299_s12, 1  ;;  %s1299_s12 = sphi %s1324_s12, %s14_s12  }
   0x2   : > { %p113_p1 = scmp.lt.s32.totalorder %s1299_s12, 3  ;;  %s1301_s14 = smov [#allocation2]  }
   0x3   : > { %s125_s15 = sshll.u32 %s1301_s14, 4  ;;  %p1338_p3 = scmp.eq.s32.totalorder %s919_s13, 0  ;;  %s126_s15 = int_to_ptr.vmem [resolvable:$true] %s125_s15 }
   0x4   : > { %p1332_p2 = pnand %p921_p0, %p113_p1  ;;  %s1261_s21 = scalar_lea.hbm %s1653_s1, 1024 }
   0x5   : > { %s1660_s17 = scalar_select %p1338_p3, 1, 0 }
   0x6   : > { %s1659_s16 = scalar_select %p1332_p2, 1, 0 }
   0x7   : > { %p1180_p4 = pneg %p1332_p2  ;;  %p1262_p6 = scmp.ne.s32.totalorder %s1653_s1, %s1261_s21 }
   0x8   : > { %p1268_p10 = scmp.lt.u32.totalorder %s1261_s21, %s1653_s1 }
   0x9   : > { %p1346_p5 = pnand %p1338_p3, %p1180_p4 }
   0xb   : > { %p1263_p7 = pneg %p1346_p5 }
   0xd   : > { %p1264_p8 = pnand %p1263_p7, %p1262_p6 }
   0xf   : > { %p1265_p9 = pneg %p1264_p8 }
  0x11   : > { %p1270_p11 = pnand %p1268_p10, %p1265_p9 }
  0x13   : > { %1273 = shalt.err (!%p1270_p11)
}
  0x14   : > { %s1274_s26 = scalar_lea.vmem %s126_s15, 1024  ;;  %p1282_p1 = scmp.lt.s32.totalorder %s126_s15, %s126_s15 }
  0x15   : > { %p1275_p12 = scmp.ne.s32.totalorder %s126_s15, %s1274_s26  ;;  %p1283_p4 = scmp.lt.s32.totalorder %s1274_s26, %s1274_s26 }
  0x17   : > { %p1277_p13 = pnand %p1275_p12, %p1263_p7  ;;  %p1284_p3 = por %p1283_p4, %p1282_p1 }
  0x19   : > { %p1278_p0 = pneg %p1277_p13 }
  0x1b   : > { %p1285_p2 = pnand %p1284_p3, %p1278_p0 }
  0x1d   : > { %1288 = shalt.err (!%p1285_p2)
}
  0x1e   : > { %s1302_s27 = smov 128   ;;  %s1303_s28 = smov 8  }
  0x1f   : > { %1183 = dma.hbm_to_vmem [thread:$0]  (!%p1346_p5), %s1653_s1, 1024, %s126_s15, [#allocation3], %s1302_s27, %s1302_s27, %s1303_s28  }
  0x20   : > { %p1662_p6 = scmp.ne.s32.totalorder %s1659_s16, 0 }
  0x21   : > { %p1663_p8 = scmp.ne.s32.totalorder (!%p1662_p6), %s1660_s17, 0 }
  0x22   : > { %153 = sbr.rel (%p1662_p6) target bundleno = 500 (0x1f4), region = 32 }
  0x29   : > { %1294 = dma.done.wait (%p1663_p8), [#allocation3], 1024  }
  0x2a   : > { %1296 = vsyncadd (%p1663_p8), [#allocation3], 4294966272  ;;  %s926_s4 = sshll.u32 %s919_s13, 5  ;;  %v238_v0 = vld [vmem:[#allocation2] sm:$0xff]  ;;  %v239_v1 = vld [vmem:[#allocation2 + $0x8] sm:$0xff]  ;;  %vm257_vm0 = vcmask 523264  }
  0x2b   : > { %p178_p2 = scmp.lt.s32.totalorder %s926_s4, 63  ;;  %v240_v2 = vld [vmem:[#allocation2 + $0x10] sm:$0xff]  ;;  %v246_v3 = vpack.c.bf16 %v239_v1, %v238_v0  ;;  %v241_v4 = vld [vmem:[#allocation2 + $0x18] sm:$0xff]  ;;  %v242_v6 = vld [vmem:[#allocation2 + $0x20] sm:$0xff] }
  0x2c   : > { %v247_v5 = vpack.c.bf16 %v241_v4, %v240_v2  ;;  %v243_v7 = vld [vmem:[#allocation2 + $0x28] sm:$0xff]  ;;  %v244_v15 = vld [vmem:[#allocation2 + $0x30] sm:$0xff]  ;;  %v245_v16 = vld [vmem:[#allocation2 + $0x38] sm:$0xff] }
  0x2d   : > { %s1665_s4 = smov (!%p178_p2, %s926_s4), 63  ;;  %1128 = vmatprep.subr.bf16.mxu0 %v246_v3  ;;  %1168 = vmatprep.subr.bf16.mxu1 %v246_v3  ;;  %v248_v14 = vpack.c.bf16 %v243_v7, %v242_v6  ;;  %v249_v17 = vpack.c.bf16 %v245_v16, %v244_v15  ;;  %v1433_v60 = vld [vmem:[%s1654_s2] ss:$0 sm:$0xff] }
  0x2e   : > { %s927_s5 = sshll.u32 %s1665_s4, 3  ;;  %1129 = vmatpush3.bf16.msra.mxu0 %v246_v3  ;;  %1172 = vmatpush3.bf16.msra.mxu1 %v246_v3  ;;  %s929_s11 = sshll.u32 %s1665_s4, 2 }
  0x2f   : > { %s1380_s8 = scalar_lea.vmem %s1652_s0, %s927_s5  ;;  %1130 = vmatprep.subr.bf16.mxu0 %v247_v5  ;;  %1169 = vmatprep.subr.bf16.mxu1 %v247_v5  ;;  %s1601_s15 = scalar_lea.vmem %s1655_s3, %s929_s11 }
  0x30   : > { %v190_v8 = vld [vmem:[%s1380_s8] sm:$0xff]  ;;  %v191_v9 = vld [vmem:[%s1380_s8 + $0x8] sm:$0xff]  ;;  %v192_v18 = vld [vmem:[%s1380_s8 + $0x10] sm:$0xff] }
  0x31   : > { %v206_v10 = vld [vmem:[%s1380_s8 + $0x80] sm:$0xff]  ;;  %v207_v11 = vld [vmem:[%s1380_s8 + $0x88] sm:$0xff]  ;;  %v222_v12 = vpack.c.bf16 %v191_v9, %v190_v8  ;;  %v193_v19 = vld [vmem:[%s1380_s8 + $0x18] sm:$0xff] }
  0x32   : > { %v230_v13 = vpack.c.bf16 %v207_v11, %v206_v10  ;;  %1131 = vmatpush3.bf16.msra.mxu0 %v247_v5  ;;  %1173 = vmatpush3.bf16.msra.mxu1 %v247_v5  ;;  %v208_v20 = vld [vmem:[%s1380_s8 + $0x90] sm:$0xff]  ;;  %v209_v21 = vld [vmem:[%s1380_s8 + $0x98] sm:$0xff]  ;;  %v194_v22 = vld [vmem:[%s1380_s8 + $0x20] sm:$0xff]  ;;  %v223_v26 = vpack.c.bf16 %v193_v19, %v192_v18 }
  0x33   : > { %1136 = vmatprep.mubr.msk.bf16.mxu0 %vm257_vm0, %v222_v12  ;;  %1132 = vmatprep.subr.bf16.mxu0 %v248_v14  ;;  %v195_v23 = vld [vmem:[%s1380_s8 + $0x28] sm:$0xff]  ;;  %v210_v24 = vld [vmem:[%s1380_s8 + $0xa0] sm:$0xff]  ;;  %v231_v27 = vpack.c.bf16 %v209_v21, %v208_v20  ;;  %v196_v30 = vld [vmem:[%s1380_s8 + $0x30] sm:$0xff] }
  0x34   : > { %1152 = vmatprep.mubr.msk.bf16.mxu1 %vm257_vm0, %v230_v13  ;;  %1170 = vmatprep.subr.bf16.mxu1 %v248_v14  ;;  %v211_v25 = vld [vmem:[%s1380_s8 + $0xa8] sm:$0xff]  ;;  %v224_v28 = vpack.c.bf16 %v195_v23, %v194_v22  ;;  %v197_v31 = vld [vmem:[%s1380_s8 + $0x38] sm:$0xff]  ;;  %v212_v32 = vld [vmem:[%s1380_s8 + $0xb0] sm:$0xff] }
  0x35   : > { %v232_v29 = vpack.c.bf16 %v211_v25, %v210_v24  ;;  %v213_v33 = vld [vmem:[%s1380_s8 + $0xb8] sm:$0xff]  ;;  %v198_v34 = vld [vmem:[%s1380_s8 + $0x40] sm:$0xff]  ;;  %v199_v35 = vld [vmem:[%s1380_s8 + $0x48] sm:$0xff]  ;;  %v225_v38 = vpack.c.bf16 %v197_v31, %v196_v30 }
  0x36   : > { %1133 = vmatpush3.bf16.msra.mxu0 %v248_v14  ;;  %1174 = vmatpush3.bf16.msra.mxu1 %v248_v14  ;;  %v214_v36 = vld [vmem:[%s1380_s8 + $0xc0] sm:$0xff]  ;;  %v215_v37 = vld [vmem:[%s1380_s8 + $0xc8] sm:$0xff]  ;;  %v233_v39 = vpack.c.bf16 %v213_v33, %v212_v32  ;;  %v226_v40 = vpack.c.bf16 %v199_v35, %v198_v34  ;;  %v200_v42 = vld [vmem:[%s1380_s8 + $0x50] sm:$0xff] }
  0x37   : > { %1134 = vmatprep.subr.bf16.mxu0 %v249_v17  ;;  %1171 = vmatprep.subr.bf16.mxu1 %v249_v17  ;;  %v234_v41 = vpack.c.bf16 %v215_v37, %v214_v36  ;;  %v201_v43 = vld [vmem:[%s1380_s8 + $0x58] sm:$0xff]  ;;  %v216_v44 = vld [vmem:[%s1380_s8 + $0xd0] sm:$0xff]  ;;  %v202_v46 = vld [vmem:[%s1380_s8 + $0x60] sm:$0xff] }
  0x38   : > { %v217_v45 = vld [vmem:[%s1380_s8 + $0xd8] sm:$0xff]  ;;  %v203_v47 = vld [vmem:[%s1380_s8 + $0x68] sm:$0xff]  ;;  %v218_v48 = vld [vmem:[%s1380_s8 + $0xe0] sm:$0xff]  ;;  %v227_v50 = vpack.c.bf16 %v201_v43, %v200_v42 }
  0x39   : > { %v219_v49 = vld [vmem:[%s1380_s8 + $0xe8] sm:$0xff]  ;;  %v235_v51 = vpack.c.bf16 %v217_v45, %v216_v44  ;;  %v228_v52 = vpack.c.bf16 %v203_v47, %v202_v46  ;;  %v204_v54 = vld [vmem:[%s1380_s8 + $0x70] sm:$0xff]  ;;  %v205_v55 = vld [vmem:[%s1380_s8 + $0x78] sm:$0xff] }
  0x3a   : > { %1135 = vmatpush3.bf16.msra.mxu0 %v249_v17  ;;  %1175 = vmatpush3.bf16.msra.mxu1 %v249_v17  ;;  %v236_v53 = vpack.c.bf16 %v219_v49, %v218_v48  ;;  %v220_v56 = vld [vmem:[%s1380_s8 + $0xf0] sm:$0xff]  ;;  %v221_v57 = vld [vmem:[%s1380_s8 + $0xf8] sm:$0xff]  ;;  %v229_v58 = vpack.c.bf16 %v205_v55, %v204_v54 }
  0x3b   : > { %v237_v59 = vpack.c.bf16 %v221_v57, %v220_v56 }
  0x3d   : > { %1137 = vmatmul.mubr.msk.bf16.vlgmr.msra.gmra.mrb[0].mxu0 %vm257_vm0, %v223_v26  ;;  %1153 = vmatmul.mubr.msk.bf16.vlgmr.msra.gmra.mrb[0].mxu1 %vm257_vm0, %v231_v27 }
  0x3e   : > { %1140 = vmatprep.mubr.msk.bf16.mxu0 %vm257_vm0, %v224_v28  ;;  %1156 = vmatprep.mubr.msk.bf16.mxu1 %vm257_vm0, %v232_v29 }
  0x45   : > { %1141 = vmatmul.mubr.msk.bf16.gmra.mrb[4].mxu0 %vm257_vm0, %v225_v38  ;;  %1157 = vmatmul.mubr.msk.bf16.gmra.mrb[4].mxu1 %vm257_vm0, %v233_v39 }
  0x46   : > { %1144 = vmatprep.mubr.msk.bf16.mxu0 %vm257_vm0, %v226_v40  ;;  %1160 = vmatprep.mubr.msk.bf16.mxu1 %vm257_vm0, %v234_v41 }
  0x4d   : > { %1145 = vmatmul.mubr.msk.bf16.gmra.mrb[8].mxu0 %vm257_vm0, %v227_v50  ;;  %1161 = vmatmul.mubr.msk.bf16.gmra.mrb[8].mxu1 %vm257_vm0, %v235_v51 }
  0x4e   : > { %1148 = vmatprep.mubr.msk.bf16.mxu0 %vm257_vm0, %v228_v52  ;;  %1164 = vmatprep.mubr.msk.bf16.mxu1 %vm257_vm0, %v236_v53 }
  0x55   : > { %1149 = vmatmul.mubr.msk.bf16.gmra.mrb[12].mxu0 %vm257_vm0, %v229_v58  ;;  %1165 = vmatmul.mubr.msk.bf16.gmra.mrb[12].mxu1 %vm257_vm0, %v237_v59 }
 0x110   : > { %v1138_v61 = vpop.f32.mrb[0].mxu0  ;;  %v1154_v62 = vpop.f32.mrb[0].mxu1 }
 0x111   : > { %v1436_v63 = vadd.f32 %v1138_v61, %v1433_v60  ;;  %v1439_v0 = vadd.f32 %v1154_v62, %v1433_v60  ;;  %v340_v1 = vpop.f32.mrb[1].mxu0  ;;  %v404_v2 = vpop.f32.mrb[1].mxu1 }
 0x112   : > { %v1139_v3 = vpop.f32.mrb[2].mxu0  ;;  %v1155_v4 = vpop.f32.mrb[2].mxu1  ;;  %v1442_v5 = vadd.f32 %v1433_v60, %v340_v1  ;;  %v1452_v11 = vadd.f32 %v1433_v60, %v404_v2 }
 0x113   : > { %v1445_v6 = vadd.f32 %v1139_v3, %v1433_v60  ;;  %v343_v7 = vpop.f32.mrb[3].mxu0  ;;  %v407_v8 = vpop.f32.mrb[3].mxu1  ;;  %v485_v9 = vmul.f32 %v1439_v0, %v1439_v0  ;;  %v469_v10 = vmul.f32 %v1436_v63, %v1436_v63  ;;  %v1455_v12 = vadd.f32 %v1155_v4, %v1433_v60 }
 0x114   : > { %v467_v14 = vmul.f32 %v1442_v5, %v1442_v5  ;;  %v1462_v21 = vadd.f32 %v1433_v60, %v343_v7  ;;  %v1465_v22 = vadd.f32 %v1433_v60, %v407_v8  ;;  %v483_v24 = vmul.f32 %v1452_v11, %v1452_v11 }
 0x115   : > { %535 = vadd.xlane.f32.xlu0 %v485_v9  ;;  %503 = vadd.xlane.f32.xlu1 %v469_v10  ;;  %v470_v13 = vmul.f32 %v1445_v6, %v1445_v6  ;;  %v486_v23 = vmul.f32 %v1455_v12, %v1455_v12 }
 0x116   : > { %v484_v29 = vmul.f32 %v1465_v22, %v1465_v22  ;;  %v468_v30 = vmul.f32 %v1462_v21, %v1462_v21 }
 0x118   : > { %v1142_v15 = vpop.f32.mrb[4].mxu0  ;;  %v1158_v16 = vpop.f32.mrb[4].mxu1 }
 0x119   : > { %505 = vadd.xlane.f32.xlu1 %v470_v13  ;;  %499 = vadd.xlane.f32.xlu0 %v467_v14  ;;  %v356_v17 = vpop.f32.mrb[5].mxu0  ;;  %v420_v18 = vpop.f32.mrb[5].mxu1  ;;  %v1472_v27 = vadd.f32 %v1142_v15, %v1433_v60  ;;  %v1482_v37 = vadd.f32 %v1158_v16, %v1433_v60 }
 0x11a   : > { %v1143_v19 = vpop.f32.mrb[6].mxu0  ;;  %v1159_v20 = vpop.f32.mrb[6].mxu1  ;;  %v1492_v43 = vadd.f32 %v1433_v60, %v356_v17  ;;  %v1502_v53 = vadd.f32 %v1433_v60, %v420_v18 }
 0x11b   : > { %v359_v25 = vpop.f32.mrb[7].mxu0  ;;  %v423_v26 = vpop.f32.mrb[7].mxu1  ;;  %v1475_v28 = vadd.f32 %v1143_v19, %v1433_v60  ;;  %v1485_v38 = vadd.f32 %v1159_v20, %v1433_v60  ;;  %v473_v40 = vmul.f32 %v1472_v27, %v1472_v27  ;;  %v489_v46 = vmul.f32 %v1482_v37, %v1482_v37 }
 0x11c   : > { %v1495_v44 = vadd.f32 %v1433_v60, %v359_v25  ;;  %v1505_v54 = vadd.f32 %v1433_v60, %v423_v26  ;;  %v471_v56 = vmul.f32 %v1492_v43, %v1492_v43  ;;  %v487_v1 = vmul.f32 %v1502_v53, %v1502_v53 }
 0x11d   : > { %537 = vadd.xlane.f32.xlu1 %v486_v23  ;;  %531 = vadd.xlane.f32.xlu0 %v483_v24  ;;  %v474_v39 = vmul.f32 %v1475_v28, %v1475_v28  ;;  %v490_v45 = vmul.f32 %v1485_v38, %v1485_v38 }
 0x11e   : > { %v472_v55 = vmul.f32 %v1495_v44, %v1495_v44  ;;  %v488_v62 = vmul.f32 %v1505_v54, %v1505_v54 }
 0x120   : > { %v1146_v31 = vpop.f32.mrb[8].mxu0  ;;  %v1162_v32 = vpop.f32.mrb[8].mxu1 }
 0x121   : > { %533 = vadd.xlane.f32.xlu1 %v484_v29  ;;  %501 = vadd.xlane.f32.xlu0 %v468_v30  ;;  %v372_v33 = vpop.f32.mrb[9].mxu0  ;;  %v436_v34 = vpop.f32.mrb[9].mxu1  ;;  %v1512_v59 = vadd.f32 %v1146_v31, %v1433_v60  ;;  %v1522_v2 = vadd.f32 %v1162_v32, %v1433_v60 }
 0x122   : > { %v1147_v35 = vpop.f32.mrb[10].mxu0  ;;  %v1163_v36 = vpop.f32.mrb[10].mxu1  ;;  %v1532_v8 = vadd.f32 %v1433_v60, %v372_v33  ;;  %v1542_v14 = vadd.f32 %v1433_v60, %v436_v34 }
 0x123   : > { %v375_v41 = vpop.f32.mrb[11].mxu0  ;;  %v439_v42 = vpop.f32.mrb[11].mxu1  ;;  %v1515_v61 = vadd.f32 %v1147_v35, %v1433_v60  ;;  %v1525_v3 = vadd.f32 %v1163_v36, %v1433_v60  ;;  %v477_v7 = vmul.f32 %v1512_v59, %v1512_v59  ;;  %v493_v13 = vmul.f32 %v1522_v2, %v1522_v2 }
 0x124   : > { %v1535_v9 = vadd.f32 %v1433_v60, %v375_v41  ;;  %v1545_v15 = vadd.f32 %v1433_v60, %v439_v42  ;;  %v475_v17 = vmul.f32 %v1532_v8, %v1532_v8  ;;  %v491_v23 = vmul.f32 %v1542_v14, %v1542_v14 }
 0x125   : > { %513 = vadd.xlane.f32.xlu1 %v474_v39  ;;  %511 = vadd.xlane.f32.xlu0 %v473_v40  ;;  %v478_v4 = vmul.f32 %v1515_v61, %v1515_v61  ;;  %v494_v10 = vmul.f32 %v1525_v3, %v1525_v3 }
 0x126   : > { %v476_v16 = vmul.f32 %v1535_v9, %v1535_v9  ;;  %v492_v20 = vmul.f32 %v1545_v15, %v1545_v15 }
 0x128   : > { %v1150_v47 = vpop.f32.mrb[12].mxu0  ;;  %v1166_v48 = vpop.f32.mrb[12].mxu1 }
 0x129   : > { %545 = vadd.xlane.f32.xlu1 %v490_v45  ;;  %543 = vadd.xlane.f32.xlu0 %v489_v46  ;;  %v388_v49 = vpop.f32.mrb[13].mxu0  ;;  %v452_v50 = vpop.f32.mrb[13].mxu1  ;;  %v1552_v18 = vadd.f32 %v1150_v47, %v1433_v60  ;;  %v1582_v34 = vadd.f32 %v1166_v48, %v1433_v60 }
 0x12a   : > { %v1151_v51 = vpop.f32.mrb[14].mxu0  ;;  %v1167_v52 = vpop.f32.mrb[14].mxu1  ;;  %v1562_v24 = vadd.f32 %v1433_v60, %v388_v49  ;;  %v1572_v30 = vadd.f32 %v1433_v60, %v452_v50 }
 0x12b   : > { %v391_v57 = vpop.f32.mrb[15].mxu0  ;;  %v455_v58 = vpop.f32.mrb[15].mxu1  ;;  %v1555_v19 = vadd.f32 %v1151_v51, %v1433_v60  ;;  %v481_v29 = vmul.f32 %v1552_v18, %v1552_v18  ;;  %v1585_v35 = vadd.f32 %v1167_v52, %v1433_v60  ;;  %v497_v41 = vmul.f32 %v1582_v34, %v1582_v34 }
 0x12c   : > { %v1565_v25 = vadd.f32 %v1433_v60, %v391_v57  ;;  %v1575_v31 = vadd.f32 %v1433_v60, %v455_v58  ;;  %v479_v33 = vmul.f32 %v1562_v24, %v1562_v24  ;;  %v495_v39 = vmul.f32 %v1572_v30, %v1572_v30 }
 0x12d   : > { %509 = vadd.xlane.f32.xlu1 %v472_v55  ;;  %507 = vadd.xlane.f32.xlu0 %v471_v56  ;;  %v482_v26 = vmul.f32 %v1555_v19, %v1555_v19  ;;  %v498_v40 = vmul.f32 %v1585_v35, %v1585_v35 }
 0x12e   : > { %v480_v32 = vmul.f32 %v1565_v25, %v1565_v25  ;;  %v496_v36 = vmul.f32 %v1575_v31, %v1575_v31 }
 0x131   : > { %541 = vadd.xlane.f32.xlu1 %v488_v62  ;;  %539 = vadd.xlane.f32.xlu0 %v487_v1 }
 0x135   : > { %521 = vadd.xlane.f32.xlu1 %v478_v4  ;;  %519 = vadd.xlane.f32.xlu0 %v477_v7 }
 0x139   : > { %553 = vadd.xlane.f32.xlu1 %v494_v10  ;;  %551 = vadd.xlane.f32.xlu0 %v493_v13 }
 0x13d   : > { %517 = vadd.xlane.f32.xlu1 %v476_v16  ;;  %515 = vadd.xlane.f32.xlu0 %v475_v17 }
 0x141   : > { %549 = vadd.xlane.f32.xlu1 %v492_v20  ;;  %547 = vadd.xlane.f32.xlu0 %v491_v23 }
 0x145   : > { %529 = vadd.xlane.f32.xlu1 %v482_v26  ;;  %527 = vadd.xlane.f32.xlu0 %v481_v29 }
 0x149   : > { %525 = vadd.xlane.f32.xlu1 %v480_v32  ;;  %523 = vadd.xlane.f32.xlu0 %v479_v33 }
 0x14d   : > { %557 = vadd.xlane.f32.xlu1 %v496_v36  ;;  %555 = vadd.xlane.f32.xlu0 %v495_v39 }
 0x151   : > { %561 = vadd.xlane.f32.xlu1 %v498_v40  ;;  %559 = vadd.xlane.f32.xlu0 %v497_v41 }
 0x1a2   : > { %v536_v42 = vpop.xlane.xlu0 %535  ;;  %v504_v45 = vpop.xlane.xlu1 %503 }
 0x1a3   : > { %v565_v60 = vmax.f32 %v504_v45, 1e-24  ;;  %v581_v46 = vmax.f32 %v536_v42, 1e-24 }
 0x1a5   : > { %1197 = vrsqrt.f32 %v565_v60 }
 0x1a6   : > { %v506_v47 = vpop.xlane.xlu1 %505  ;;  %v500_v48 = vpop.xlane.xlu0 %499  ;;  %1199 = vrsqrt.f32 %v581_v46 }
 0x1a7   : > { %v566_v49 = vmax.f32 %v506_v47, 1e-24  ;;  %v563_v50 = vmax.f32 %v500_v48, 1e-24 }
 0x1a9   : > { %1201 = vrsqrt.f32 %v566_v49 }
 0x1aa   : > { %v538_v51 = vpop.xlane.xlu1 %537  ;;  %v532_v52 = vpop.xlane.xlu0 %531  ;;  %1203 = vrsqrt.f32 %v563_v50 }
 0x1ab   : > { %v582_v55 = vmax.f32 %v538_v51, 1e-24  ;;  %v579_v56 = vmax.f32 %v532_v52, 1e-24 }
 0x1ad   : > { %1205 = vrsqrt.f32 %v582_v55 }
 0x1ae   : > { %1207 = vrsqrt.f32 %v579_v56  ;;  %v534_v57 = vpop.xlane.xlu1 %533  ;;  %v502_v58 = vpop.xlane.xlu0 %501 }
 0x1af   : > { %v580_v62 = vmax.f32 %v534_v57, 1e-24  ;;  %v564_v1 = vmax.f32 %v502_v58, 1e-24  ;;  %v1198_v4 = vpop.eup %1197 }
 0x1b0   : > { %v1200_v7 = vpop.eup %1199  ;;  %v629_v10 = vmul.f32 1.8, %v1198_v4 }
 0x1b1   : > { %1209 = vrsqrt.f32 %v580_v62  ;;  %v645_v32 = vmul.f32 1.8, %v1200_v7 }
 0x1b2   : > { %1211 = vrsqrt.f32 %v564_v1  ;;  %v514_v13 = vpop.xlane.xlu1 %513  ;;  %v512_v16 = vpop.xlane.xlu0 %511  ;;  %v661_v33 = vmul.f32 %v629_v10, %v1436_v63 }
 0x1b3   : > { %v1202_v17 = vpop.eup %1201  ;;  %v570_v20 = vmax.f32 %v514_v13, 1e-24  ;;  %v569_v23 = vmax.f32 %v512_v16, 1e-24  ;;  %v677_v63 = vmul.f32 %v645_v32, %v1439_v0 }
 0x1b4   : > { %v630_v26 = vmul.f32 1.8, %v1202_v17  ;;  %v1204_v29 = vpop.eup %1203 }
 0x1b5   : > { %1213 = vrsqrt.f32 %v570_v20  ;;  %v627_v52 = vmul.f32 1.8, %v1204_v29 }
 0x1b6   : > { %v662_v36 = vmul.f32 %v630_v26, %v1445_v6  ;;  %1215 = vrsqrt.f32 %v569_v23  ;;  %v546_v39 = vpop.xlane.xlu1 %545  ;;  %v544_v40 = vpop.xlane.xlu0 %543 }
 0x1b7   : > { %v1206_v41 = vpop.eup %1205  ;;  %v586_v42 = vmax.f32 %v546_v39, 1e-24  ;;  %v585_v45 = vmax.f32 %v544_v40, 1e-24  ;;  %v659_v13 = vmul.f32 %v627_v52, %v1442_v5 }
 0x1b8   : > { %v1208_v60 = vpop.eup %1207  ;;  %v1021_v46 = vpack.c.bf16 %v662_v36, %v661_v33  ;;  %v646_v47 = vmul.f32 1.8, %v1206_v41 }
 0x1b9   : > { %1217 = vrsqrt.f32 %v586_v42  ;;  %v643_v48 = vmul.f32 1.8, %v1208_v60 }
 0x1ba   : > { %1093 = vst [vmem:[%s1601_s15 + $0x8] sm:$0xff] %v1021_v46   ;;  %v678_v6 = vmul.f32 %v646_v47, %v1455_v12  ;;  %1219 = vrsqrt.f32 %v585_v45  ;;  %v510_v49 = vpop.xlane.xlu1 %509  ;;  %v508_v50 = vpop.xlane.xlu0 %507 }
 0x1bb   : > { %v1210_v51 = vpop.eup %1209  ;;  %v568_v55 = vmax.f32 %v510_v49, 1e-24  ;;  %v567_v56 = vmax.f32 %v508_v50, 1e-24  ;;  %v675_v0 = vmul.f32 %v643_v48, %v1452_v11 }
 0x1bc   : > { %v1212_v57 = vpop.eup %1211  ;;  %v1061_v58 = vpack.c.bf16 %v678_v6, %v677_v63  ;;  %v644_v62 = vmul.f32 1.8, %v1210_v51 }
 0x1bd   : > { %v628_v1 = vmul.f32 1.8, %v1212_v57  ;;  %1221 = vrsqrt.f32 %v568_v55 }
 0x1be   : > { %1101 = vst [vmem:[%s1601_s15 + $0x48] sm:$0xff] %v1061_v58   ;;  %v676_v4 = vmul.f32 %v644_v62, %v1465_v22  ;;  %1223 = vrsqrt.f32 %v567_v56  ;;  %v542_v12 = vpop.xlane.xlu1 %541  ;;  %v540_v7 = vpop.xlane.xlu0 %539 }
 0x1bf   : > { %v1214_v10 = vpop.eup %1213  ;;  %v660_v16 = vmul.f32 %v628_v1, %v1462_v21  ;;  %v584_v17 = vmax.f32 %v542_v12, 1e-24  ;;  %v583_v20 = vmax.f32 %v540_v7, 1e-24 }
 0x1c0   : > { %v1216_v23 = vpop.eup %1215  ;;  %v1056_v26 = vpack.c.bf16 %v676_v4, %v675_v0  ;;  %v634_v29 = vmul.f32 1.8, %v1214_v10 }
 0x1c1   : > { %v1016_v32 = vpack.c.bf16 %v660_v16, %v659_v13  ;;  %v633_v33 = vmul.f32 1.8, %v1216_v23  ;;  %1225 = vrsqrt.f32 %v584_v17 }
 0x1c2   : > { %1100 = vst [vmem:[%s1601_s15 + $0x40] sm:$0xff] %v1056_v26   ;;  %v666_v11 = vmul.f32 %v634_v29, %v1475_v28  ;;  %1227 = vrsqrt.f32 %v583_v20  ;;  %v522_v22 = vpop.xlane.xlu1 %521  ;;  %v520_v36 = vpop.xlane.xlu0 %519 }
 0x1c3   : > { %v1218_v39 = vpop.eup %1217  ;;  %1017 = vst [vmem:[%s1601_s15] sm:$0xff] %v1016_v32   ;;  %v665_v5 = vmul.f32 %v633_v33, %v1472_v27  ;;  %v574_v21 = vmax.f32 %v522_v22, 1e-24  ;;  %v573_v40 = vmax.f32 %v520_v36, 1e-24 }
 0x1c4   : > { %v1220_v41 = vpop.eup %1219  ;;  %v650_v42 = vmul.f32 1.8, %v1218_v39 }
 0x1c5   : > { %v1031_v45 = vpack.c.bf16 %v666_v11, %v665_v5  ;;  %v649_v60 = vmul.f32 1.8, %v1220_v41  ;;  %1229 = vrsqrt.f32 %v574_v21 }
 0x1c6   : > { %v682_v46 = vmul.f32 %v650_v42, %v1485_v38  ;;  %1231 = vrsqrt.f32 %v573_v40  ;;  %v554_v47 = vpop.xlane.xlu1 %553  ;;  %v552_v28 = vpop.xlane.xlu0 %551 }
 0x1c7   : > { %v1222_v63 = vpop.eup %1221  ;;  %1095 = vst [vmem:[%s1601_s15 + $0x18] sm:$0xff] %v1031_v45   ;;  %v681_v6 = vmul.f32 %v649_v60, %v1482_v37  ;;  %v590_v48 = vmax.f32 %v554_v47, 1e-24  ;;  %v589_v49 = vmax.f32 %v552_v28, 1e-24 }
 0x1c8   : > { %v1224_v27 = vpop.eup %1223  ;;  %v632_v50 = vmul.f32 1.8, %v1222_v63 }
 0x1c9   : > { %v1071_v51 = vpack.c.bf16 %v682_v46, %v681_v6  ;;  %v631_v52 = vmul.f32 1.8, %v1224_v27  ;;  %1233 = vrsqrt.f32 %v590_v48 }
 0x1ca   : > { %v664_v55 = vmul.f32 %v632_v50, %v1495_v44  ;;  %1235 = vrsqrt.f32 %v589_v49  ;;  %v518_v56 = vpop.xlane.xlu1 %517  ;;  %v516_v38 = vpop.xlane.xlu0 %515 }
 0x1cb   : > { %v1226_v57 = vpop.eup %1225  ;;  %1103 = vst [vmem:[%s1601_s15 + $0x58] sm:$0xff] %v1071_v51   ;;  %v663_v58 = vmul.f32 %v631_v52, %v1492_v43  ;;  %v572_v62 = vmax.f32 %v518_v56, 1e-24  ;;  %v571_v1 = vmax.f32 %v516_v38, 1e-24 }
 0x1cc   : > { %v1228_v37 = vpop.eup %1227  ;;  %v648_v0 = vmul.f32 1.8, %v1226_v57 }
 0x1cd   : > { %v1026_v4 = vpack.c.bf16 %v664_v55, %v663_v58  ;;  %v647_v12 = vmul.f32 1.8, %v1228_v37  ;;  %1237 = vrsqrt.f32 %v572_v62 }
 0x1ce   : > { %v680_v7 = vmul.f32 %v648_v0, %v1505_v54  ;;  %1239 = vrsqrt.f32 %v571_v1  ;;  %v550_v10 = vpop.xlane.xlu1 %549  ;;  %v548_v44 = vpop.xlane.xlu0 %547 }
 0x1cf   : > { %v1230_v13 = vpop.eup %1229  ;;  %1094 = vst [vmem:[%s1601_s15 + $0x10] sm:$0xff] %v1026_v4   ;;  %v679_v16 = vmul.f32 %v647_v12, %v1502_v53  ;;  %v588_v17 = vmax.f32 %v550_v10, 1e-24  ;;  %v587_v20 = vmax.f32 %v548_v44, 1e-24 }
 0x1d0   : > { %v1232_v43 = vpop.eup %1231  ;;  %v638_v23 = vmul.f32 1.8, %v1230_v13 }
 0x1d1   : > { %v1066_v26 = vpack.c.bf16 %v680_v7, %v679_v16  ;;  %v637_v29 = vmul.f32 1.8, %v1232_v43  ;;  %1241 = vrsqrt.f32 %v588_v17 }
 0x1d2   : > { %v670_v32 = vmul.f32 %v638_v23, %v1515_v61  ;;  %1243 = vrsqrt.f32 %v587_v20  ;;  %v530_v33 = vpop.xlane.xlu1 %529  ;;  %v528_v54 = vpop.xlane.xlu0 %527 }
 0x1d3   : > { %v1234_v11 = vpop.eup %1233  ;;  %1102 = vst [vmem:[%s1601_s15 + $0x50] sm:$0xff] %v1066_v26   ;;  %v669_v22 = vmul.f32 %v637_v29, %v1512_v59  ;;  %v578_v36 = vmax.f32 %v530_v33, 1e-24  ;;  %v577_v39 = vmax.f32 %v528_v54, 1e-24 }
 0x1d4   : > { %v1236_v53 = vpop.eup %1235  ;;  %v654_v5 = vmul.f32 1.8, %v1234_v11 }
 0x1d5   : > { %v1041_v21 = vpack.c.bf16 %v670_v32, %v669_v22  ;;  %v653_v40 = vmul.f32 1.8, %v1236_v53  ;;  %1245 = vrsqrt.f32 %v578_v36 }
 0x1d6   : > { %v686_v41 = vmul.f32 %v654_v5, %v1525_v3  ;;  %1247 = vrsqrt.f32 %v577_v39  ;;  %v526_v42 = vpop.xlane.xlu1 %525  ;;  %v524_v61 = vpop.xlane.xlu0 %523 }
 0x1d7   : > { %v1238_v45 = vpop.eup %1237  ;;  %1097 = vst [vmem:[%s1601_s15 + $0x28] sm:$0xff] %v1041_v21   ;;  %v685_v60 = vmul.f32 %v653_v40, %v1522_v2  ;;  %v576_v46 = vmax.f32 %v526_v42, 1e-24  ;;  %v575_v47 = vmax.f32 %v524_v61, 1e-24 }
 0x1d8   : > { %v1240_v59 = vpop.eup %1239  ;;  %v636_v28 = vmul.f32 1.8, %v1238_v45 }
 0x1d9   : > { %v1081_v63 = vpack.c.bf16 %v686_v41, %v685_v60  ;;  %v635_v6 = vmul.f32 1.8, %v1240_v59  ;;  %1249 = vrsqrt.f32 %v576_v46 }
 0x1da   : > { %v668_v48 = vmul.f32 %v636_v28, %v1535_v9  ;;  %1251 = vrsqrt.f32 %v575_v47  ;;  %v558_v49 = vpop.xlane.xlu1 %557  ;;  %v556_v3 = vpop.xlane.xlu0 %555 }
 0x1db   : > { %v1242_v27 = vpop.eup %1241  ;;  %1105 = vst [vmem:[%s1601_s15 + $0x68] sm:$0xff] %v1081_v63   ;;  %v667_v50 = vmul.f32 %v635_v6, %v1532_v8  ;;  %v592_v51 = vmax.f32 %v558_v49, 1e-24  ;;  %v591_v52 = vmax.f32 %v556_v3, 1e-24 }
 0x1dc   : > { %v1244_v2 = vpop.eup %1243  ;;  %v652_v55 = vmul.f32 1.8, %v1242_v27 }
 0x1dd   : > { %v1036_v56 = vpack.c.bf16 %v668_v48, %v667_v50  ;;  %v651_v38 = vmul.f32 1.8, %v1244_v2  ;;  %1253 = vrsqrt.f32 %v592_v51 }
 0x1de   : > { %v684_v57 = vmul.f32 %v652_v55, %v1545_v15  ;;  %1255 = vrsqrt.f32 %v591_v52  ;;  %v562_v9 = vpop.xlane.xlu1 %561  ;;  %v560_v58 = vpop.xlane.xlu0 %559 }
 0x1df   : > { %v1246_v62 = vpop.eup %1245  ;;  %1096 = vst [vmem:[%s1601_s15 + $0x20] sm:$0xff] %v1036_v56   ;;  %v683_v1 = vmul.f32 %v651_v38, %v1542_v14  ;;  %v594_v37 = vmax.f32 %v562_v9, 1e-24  ;;  %v593_v0 = vmax.f32 %v560_v58, 1e-24 }
 0x1e0   : > { %v1248_v8 = vpop.eup %1247  ;;  %v642_v4 = vmul.f32 1.8, %v1246_v62 }
 0x1e1   : > { %v1076_v12 = vpack.c.bf16 %v684_v57, %v683_v1  ;;  %v641_v7 = vmul.f32 1.8, %v1248_v8  ;;  %1257 = vrsqrt.f32 %v594_v37 }
 0x1e2   : > { %v674_v10 = vmul.f32 %v642_v4, %v1555_v19  ;;  %1259 = vrsqrt.f32 %v593_v0 }
 0x1e3   : > { %v1250_v15 = vpop.eup %1249  ;;  %1104 = vst [vmem:[%s1601_s15 + $0x60] sm:$0xff] %v1076_v12   ;;  %v673_v44 = vmul.f32 %v641_v7, %v1552_v18 }
 0x1e4   : > { %v1252_v13 = vpop.eup %1251  ;;  %v640_v16 = vmul.f32 1.8, %v1250_v15 }
 0x1e5   : > { %v1051_v17 = vpack.c.bf16 %v674_v10, %v673_v44  ;;  %v639_v14 = vmul.f32 1.8, %v1252_v13 }
 0x1e6   : > { %v672_v20 = vmul.f32 %v640_v16, %v1565_v25 }
 0x1e7   : > { %v1254_v43 = vpop.eup %1253  ;;  %1099 = vst [vmem:[%s1601_s15 + $0x38] sm:$0xff] %v1051_v17   ;;  %v671_v23 = vmul.f32 %v639_v14, %v1562_v24 }
 0x1e8   : > { %v1256_v26 = vpop.eup %1255  ;;  %v656_v19 = vmul.f32 1.8, %v1254_v43 }
 0x1e9   : > { %v1046_v29 = vpack.c.bf16 %v672_v20, %v671_v23  ;;  %v655_v32 = vmul.f32 1.8, %v1256_v26 }
 0x1ea   : > { %v688_v33 = vmul.f32 %v656_v19, %v1575_v31 }
 0x1eb   : > { %v1258_v54 = vpop.eup %1257  ;;  %1098 = vst [vmem:[%s1601_s15 + $0x30] sm:$0xff] %v1046_v29   ;;  %v687_v18 = vmul.f32 %v655_v32, %v1572_v30 }
 0x1ec   : > { %v1260_v11 = vpop.eup %1259  ;;  %v658_v22 = vmul.f32 1.8, %v1258_v54 }
 0x1ed   : > { %v1086_v36 = vpack.c.bf16 %v688_v33, %v687_v18  ;;  %v657_v25 = vmul.f32 1.8, %v1260_v11 }
 0x1ee   : > { %v690_v39 = vmul.f32 %v658_v22, %v1585_v35 }
 0x1ef   : > { %1106 = vst [vmem:[%s1601_s15 + $0x70] sm:$0xff] %v1086_v36   ;;  %v689_v24 = vmul.f32 %v657_v25, %v1582_v34 }
 0x1f1   : > { %v1091_v53 = vpack.c.bf16 %v690_v39, %v689_v24 }
 0x1f3   : > { %1107 = vst [vmem:[%s1601_s15 + $0x78] sm:$0xff] %v1091_v53  }
 0x1f4 PF: > { %s14_s12 = sadd.s32 1, %s1299_s12  }
 0x1f5   : > { %p11_p3 = scmp.ge.s32.totalorder %s14_s12, 4  }
 0x1f7   :  { %13 = sbr.rel (!%p11_p3) target bundleno = 1 (0x1), region = 67 }
 0x1fe   :  { %873 = vsyncpa [#allocation3], 1 }
 0x1ff   :  { %875 = vsyncpa [#allocation3 + $0x1], 1 }

// kernel: ngcn_forward.5
= control target key start
LH: loop header
LB: loop body
LE: loop exit
PB: predicated region body
PF: predicated region fallthrough
CT: control target
= control target key end

     0   :  { %7 = vsyncpa [#allocation3], 0  ;;  %s1820_s0 = inlined_call_operand.vmem [shape: f32[512,512], index: 0, kind: input, shape index: {}]   ;;  %s1821_s1 = inlined_call_operand.vmem [shape: bf16[512,128], index: 1, kind: input, shape index: {}]   ;;  %s1822_s2 = inlined_call_operand.hbm [shape: f32[512,128], index: 2, kind: output, shape index: {}]  }
   0x1   :  { %9 = vsyncpa [#allocation3 + $0x1], 0  ;;  %s1453_s9 = smov 0   ;;  %s1455_s10 = smov 0  }
   0x2   :  { %s1457_s11 = smov 0   ;;  %s1459_s12 = smov 0  }
   0x3 LB: > { %s1474_s13 = sadd.s32 4294967295, %s1433_s12   ;;  %s1027_s14 = sadd.s32 4294967294, %s1433_s12   ;;  %s1433_s12 = sphi %s1459_s12, %s1828_s12   ;;  %s1429_s11 = sphi %s1457_s11, %s1827_s11   ;;  %s1425_s10 = sphi %s1455_s10, %s1826_s10   ;;  %s1421_s9 = sphi %s1453_s9, %s1825_s9  }
   0x4   : > { %s1478_s15 = sadd.s32 1, %s1433_s12   ;;  %s69_s16 = sadd.s32 1, %s1429_s11 }
   0x5   : > { %s66_s17 = ssub.s32 %s1433_s12, %s1478_s15  ;;  %p79_p0 = scmp.ne.s32.totalorder %s1429_s11, %s1425_s10 }
   0x6   : > { %p67_p1 = scmp.eq.s32.totalorder %s66_s17, 0  ;;  %p80_p2 = scmp.eq.s32.totalorder %s1474_s13, 1 }
   0x7   : > { %p85_p3 = scmp.ne.s32.totalorder %s1425_s10, %s1421_s9  ;;  %p86_p4 = scmp.eq.s32.totalorder %s1027_s14, 1 }
   0x8   : > { %s1489_s18 = scalar_select %p67_p1, %s1429_s11, %s69_s16  }
   0x9   : > { %p1491_p5 = por %p80_p2, %p79_p0  ;;  %p1495_p6 = por %p86_p4, %p85_p3 }
   0xa   : > { %p1030_p7 = scmp.ge.s32.totalorder %s1433_s12, 1  ;;  %p117_p8 = scmp.lt.s32.totalorder %s1433_s12, 3 }
   0xc   : > { %p118_p9 = pnand %p1030_p7, %p117_p8 }
   0xd   : > { %v1339_v0 = vld [vmem:[%s1821_s1 + $0x40] sm:$0xff] (!%p118_p9)   ;;  %v1343_v4 = vld [vmem:[%s1821_s1 + $0x48] sm:$0xff] (!%p118_p9)   ;;  %v1347_v8 = vld [vmem:[%s1821_s1 + $0x50] sm:$0xff] (!%p118_p9)   ;;  %s1032_s6 = sshll.u32 (!%p118_p9), %s1474_s13, 5  ;;  %s137_s5 = sand.u32 (!%p118_p9), 1, %s1425_s10  }
   0xe   : > { %121 = sbr.rel (%p118_p9) target bundleno = 402 (0x192), region = 28  ;;  %v1340_v1 = vld [vmem:[%s1821_s1 + $0xc0] sm:$0xff] (!%p118_p9)   ;;  %1074 = vmatprep.subr.bf16.mxu0 (!%p118_p9), %v1339_v0  ;;  %v1344_v5 = vld [vmem:[%s1821_s1 + $0xc8] sm:$0xff] (!%p118_p9)   ;;  %v1348_v9 = vld [vmem:[%s1821_s1 + $0xd0] sm:$0xff] (!%p118_p9)   ;;  %p141_p10 = scmp.lt.s32.totalorder (!%p118_p9), %s1032_s6, 63 }
   0xf   : > { %v1341_v2 = vld [vmem:[%s1821_s1] sm:$0xff] (!%p118_p9)   ;;  %1186 = vmatprep.subr.bf16.mxu1 (!%p118_p9), %v1340_v1  ;;  %v1345_v6 = vld [vmem:[%s1821_s1 + $0x8] sm:$0xff] (!%p118_p9)   ;;  %v1349_v10 = vld [vmem:[%s1821_s1 + $0x10] sm:$0xff] (!%p118_p9)   ;;  %s1031_s7 = sshll.u32 (!%p118_p9), %s137_s5, 8  ;;  %s1073_s14 = sshll.u32 (!%p118_p9), %s1474_s13, 12 }
  0x10   : > { %v1342_v3 = vld [vmem:[%s1821_s1 + $0x80] sm:$0xff] (!%p118_p9)   ;;  %1075 = vmatpush3.bf16.msra.mxu0 (!%p118_p9), %v1341_v2  ;;  %v1346_v7 = vld [vmem:[%s1821_s1 + $0x88] sm:$0xff] (!%p118_p9)   ;;  %v1350_v11 = vld [vmem:[%s1821_s1 + $0x90] sm:$0xff] (!%p118_p9)   ;;  %s1734_s8 = scalar_lea.vmem (!%p118_p9), [#allocation2], %s1031_s7  ;;  %s1771_s22 = scalar_lea.hbm (!%p118_p9), %s1822_s2, %s1073_s14 }
  0x11   : > { %1187 = vmatpush3.bf16.msra.mxu1 (!%p118_p9), %v1342_v3  ;;  %1076 = vmatprep.subr.bf16.mxu0 (!%p118_p9), %v1343_v4  ;;  %v1351_v12 = vld [vmem:[%s1821_s1 + $0x58] sm:$0xff] (!%p118_p9)   ;;  %v1355_v16 = vld [vmem:[%s1821_s1 + $0x60] sm:$0xff] (!%p118_p9)   ;;  %v1359_v20 = vld [vmem:[%s1821_s1 + $0x68] sm:$0xff] (!%p118_p9)   ;;  %s965_s16 = sshll.u32 (!%p118_p9), %s1734_s8, 4  ;;  %s1779_s13 = scalar_lea.sflag (!%p118_p9), [#allocation3], %s137_s5  ;;  %s1773_s16 = int_to_ptr.vmem [resolvable:$true] %s965_s16 }
  0x12   : > { %1188 = vmatprep.subr.bf16.mxu1 (!%p118_p9), %v1344_v5  ;;  %v1352_v13 = vld [vmem:[%s1821_s1 + $0xd8] sm:$0xff] (!%p118_p9)   ;;  %v1356_v17 = vld [vmem:[%s1821_s1 + $0xe0] sm:$0xff] (!%p118_p9)   ;;  %v1360_v21 = vld [vmem:[%s1821_s1 + $0xe8] sm:$0xff] (!%p118_p9)   ;;  %s1371_s23 = scalar_lea.vmem (!%p118_p9), %s1773_s16, 4096  ;;  %s1435_s24 = smov (!%p118_p9), [#allocation2]  }
  0x13   : > { %v1353_v14 = vld [vmem:[%s1821_s1 + $0x18] sm:$0xff] (!%p118_p9)   ;;  %v1357_v18 = vld [vmem:[%s1821_s1 + $0x20] sm:$0xff] (!%p118_p9)   ;;  %v1361_v22 = vld [vmem:[%s1821_s1 + $0x28] sm:$0xff] (!%p118_p9)   ;;  %p1372_p11 = scmp.ne.s32.totalorder (!%p118_p9), %s1773_s16, %s1371_s23  ;;  %s1375_s25 = sshll.u32 (!%p118_p9), %s1435_s24, 4  ;;  %s1376_s25 = int_to_ptr.vmem [resolvable:$false] %s1375_s25 }
  0x14   : > { %1077 = vmatpush3.bf16.msra.mxu0 (!%p118_p9), %v1345_v6  ;;  %v1354_v15 = vld [vmem:[%s1821_s1 + $0x98] sm:$0xff] (!%p118_p9)   ;;  %v1358_v19 = vld [vmem:[%s1821_s1 + $0xa0] sm:$0xff] (!%p118_p9)   ;;  %v1362_v23 = vld [vmem:[%s1821_s1 + $0xa8] sm:$0xff] (!%p118_p9)   ;;  %s1377_s26 = scalar_lea.vmem (!%p118_p9), %s1376_s25, 8192  ;;  %p1378_p0 = scmp.lt.s32.totalorder (!%p118_p9), %s1773_s16, %s1376_s25 }
  0x15   : > { %1189 = vmatpush3.bf16.msra.mxu1 %v1346_v7  ;;  %1078 = vmatprep.subr.bf16.mxu0 %v1347_v8  ;;  %s1830_s6 = smov (!%p141_p10, %s1032_s6), 63  ;;  %v1363_v24 = vld [vmem:[%s1821_s1 + $0x70] sm:$0xff]   ;;  %v1367_v28 = vld [vmem:[%s1821_s1 + $0x78] sm:$0xff]   ;;  %p1373_p12 = pnand %p1372_p11, %p1491_p5 }
  0x16   : > { %1190 = vmatprep.subr.bf16.mxu1 %v1348_v9  ;;  %v1364_v25 = vld [vmem:[%s1821_s1 + $0xf0] sm:$0xff]   ;;  %s1072_s17 = sshll.u32 %s1830_s6, 5  ;;  %v1368_v29 = vld [vmem:[%s1821_s1 + $0xf8] sm:$0xff]   ;;  %p1379_p1 = scmp.lt.s32.totalorder %s1377_s26, %s1371_s23 }
  0x17   : > { %v1365_v26 = vld [vmem:[%s1821_s1 + $0x30] sm:$0xff]   ;;  %s1595_s29 = scalar_lea.vmem %s1820_s0, %s1072_s17  ;;  %v1369_v30 = vld [vmem:[%s1821_s1 + $0x38] sm:$0xff]   ;;  %p1374_p13 = pneg %p1373_p12 }
  0x18   : > { %1079 = vmatpush3.bf16.msra.mxu0 %v1349_v10  ;;  %v1366_v27 = vld [vmem:[%s1821_s1 + $0xb0] sm:$0xff]   ;;  %v1370_v31 = vld [vmem:[%s1821_s1 + $0xb8] sm:$0xff]   ;;  %v150_v32 = vld [vmem:[%s1595_s29 + $0x8] sm:$0xff]  ;;  %p1380_p2 = por %p1379_p1, %p1378_p0 }
  0x19   : > { %1191 = vmatpush3.bf16.msra.mxu1 %v1350_v11  ;;  %1080 = vmatprep.subr.bf16.mxu0 %v1351_v12  ;;  %v154_v33 = vld [vmem:[%s1595_s29 + $0x28] sm:$0xff]  ;;  %v152_v34 = vld [vmem:[%s1595_s29 + $0x18] sm:$0xff]  ;;  %v149_v37 = vld [vmem:[%s1595_s29] sm:$0xff] }
  0x1a   : > { %1192 = vmatprep.subr.bf16.mxu1 %v1352_v13  ;;  %v278_v35 = vpack.c.bf16 %v154_v33, %v150_v32  ;;  %v156_v36 = vld [vmem:[%s1595_s29 + $0x38] sm:$0xff]  ;;  %v153_v38 = vld [vmem:[%s1595_s29 + $0x20] sm:$0xff]  ;;  %v151_v41 = vld [vmem:[%s1595_s29 + $0x10] sm:$0xff]  ;;  %p1381_p3 = pnand %p1380_p2, %p1374_p13 }
  0x1b   : > { %v280_v39 = vpack.c.bf16 %v156_v36, %v152_v34  ;;  %v277_v40 = vpack.c.bf16 %v153_v38, %v149_v37  ;;  %v155_v42 = vld [vmem:[%s1595_s29 + $0x30] sm:$0xff]  ;;  %v158_v43 = vld [vmem:[%s1595_s29 + $0x48] sm:$0xff]  ;;  %v160_v46 = vld [vmem:[%s1595_s29 + $0x58] sm:$0xff] }
  0x1c   : > { %1081 = vmatpush3.bf16.msra.mxu0 %v1353_v14  ;;  %629 = vmatprep.mubr.bf16.mxu0 %v278_v35  ;;  %v279_v44 = vpack.c.bf16 %v155_v42, %v151_v41  ;;  %v162_v45 = vld [vmem:[%s1595_s29 + $0x68] sm:$0xff]  ;;  %v164_v47 = vld [vmem:[%s1595_s29 + $0x78] sm:$0xff]  ;;  %v157_v50 = vld [vmem:[%s1595_s29 + $0x40] sm:$0xff] }
  0x1d   : > { %1193 = vmatpush3.bf16.msra.mxu1 %v1354_v15  ;;  %1082 = vmatprep.subr.bf16.mxu0 %v1355_v16  ;;  %v282_v48 = vpack.c.bf16 %v162_v45, %v158_v43  ;;  %v284_v49 = vpack.c.bf16 %v164_v47, %v160_v46  ;;  %v161_v51 = vld [vmem:[%s1595_s29 + $0x60] sm:$0xff]  ;;  %v159_v52 = vld [vmem:[%s1595_s29 + $0x50] sm:$0xff]  ;;  %v166_v54 = vld [vmem:[%s1595_s29 + $0x88] sm:$0xff] }
  0x1e   : > { %1194 = vmatprep.subr.bf16.mxu1 %v1356_v17  ;;  %790 = vmatprep.mubr.bf16.mxu1 %v280_v39  ;;  %v163_v53 = vld [vmem:[%s1595_s29 + $0x70] sm:$0xff]  ;;  %v170_v55 = vld [vmem:[%s1595_s29 + $0xa8] sm:$0xff]  ;;  %v168_v56 = vld [vmem:[%s1595_s29 + $0x98] sm:$0xff]  ;;  %v281_v58 = vpack.c.bf16 %v161_v51, %v157_v50 }
  0x1f   : > { %v172_v57 = vld [vmem:[%s1595_s29 + $0xb8] sm:$0xff]  ;;  %v283_v59 = vpack.c.bf16 %v163_v53, %v159_v52  ;;  %v286_v60 = vpack.c.bf16 %v170_v55, %v166_v54  ;;  %v165_v62 = vld [vmem:[%s1595_s29 + $0x80] sm:$0xff]  ;;  %v167_v0 = vld [vmem:[%s1595_s29 + $0x90] sm:$0xff] }
  0x20   : > { %1083 = vmatpush3.bf16.msra.mxu0 %v1357_v18  ;;  %v288_v61 = vpack.c.bf16 %v172_v57, %v168_v56  ;;  %v169_v63 = vld [vmem:[%s1595_s29 + $0xa0] sm:$0xff]  ;;  %v171_v1 = vld [vmem:[%s1595_s29 + $0xb0] sm:$0xff]  ;;  %v174_v2 = vld [vmem:[%s1595_s29 + $0xc8] sm:$0xff] }
  0x21   : > { %1195 = vmatpush3.bf16.msra.mxu1 %v1358_v19  ;;  %1084 = vmatprep.subr.bf16.mxu0 %v1359_v20  ;;  %v178_v3 = vld [vmem:[%s1595_s29 + $0xe8] sm:$0xff]  ;;  %v176_v4 = vld [vmem:[%s1595_s29 + $0xd8] sm:$0xff]  ;;  %v285_v6 = vpack.c.bf16 %v169_v63, %v165_v62  ;;  %v287_v7 = vpack.c.bf16 %v171_v1, %v167_v0  ;;  %v173_v10 = vld [vmem:[%s1595_s29 + $0xc0] sm:$0xff] }
  0x22   : > { %1196 = vmatprep.subr.bf16.mxu1 %v1360_v21  ;;  %v180_v5 = vld [vmem:[%s1595_s29 + $0xf8] sm:$0xff]  ;;  %v290_v8 = vpack.c.bf16 %v178_v3, %v174_v2  ;;  %v177_v11 = vld [vmem:[%s1595_s29 + $0xe0] sm:$0xff]  ;;  %v175_v12 = vld [vmem:[%s1595_s29 + $0xd0] sm:$0xff] }
  0x23   : > { %v292_v9 = vpack.c.bf16 %v180_v5, %v176_v4  ;;  %v179_v13 = vld [vmem:[%s1595_s29 + $0xf0] sm:$0xff]  ;;  %v182_v14 = vld [vmem:[%s1595_s29 + $0x108] sm:$0xff]  ;;  %v184_v16 = vld [vmem:[%s1595_s29 + $0x118] sm:$0xff]  ;;  %v289_v18 = vpack.c.bf16 %v177_v11, %v173_v10 }
  0x24   : > { %1085 = vmatpush3.bf16.msra.mxu0 %v1361_v22  ;;  %v186_v15 = vld [vmem:[%s1595_s29 + $0x128] sm:$0xff]  ;;  %v188_v17 = vld [vmem:[%s1595_s29 + $0x138] sm:$0xff]  ;;  %v291_v19 = vpack.c.bf16 %v179_v13, %v175_v12  ;;  %v181_v22 = vld [vmem:[%s1595_s29 + $0x100] sm:$0xff] }
  0x25   : > { %1197 = vmatpush3.bf16.msra.mxu1 %v1362_v23  ;;  %1086 = vmatprep.subr.bf16.mxu0 %v1363_v24  ;;  %v294_v20 = vpack.c.bf16 %v186_v15, %v182_v14  ;;  %v296_v21 = vpack.c.bf16 %v188_v17, %v184_v16  ;;  %v185_v23 = vld [vmem:[%s1595_s29 + $0x120] sm:$0xff]  ;;  %v183_v24 = vld [vmem:[%s1595_s29 + $0x110] sm:$0xff]  ;;  %v198_v38 = vld [vmem:[%s1595_s29 + $0x188] sm:$0xff] }
  0x26   : > { %1198 = vmatprep.subr.bf16.mxu1 %v1364_v25  ;;  %v187_v25 = vld [vmem:[%s1595_s29 + $0x130] sm:$0xff]  ;;  %v189_v34 = vld [vmem:[%s1595_s29 + $0x140] sm:$0xff]  ;;  %v202_v39 = vld [vmem:[%s1595_s29 + $0x1a8] sm:$0xff] }
  0x27   : > { %v193_v35 = vld [vmem:[%s1595_s29 + $0x160] sm:$0xff]  ;;  %v191_v36 = vld [vmem:[%s1595_s29 + $0x150] sm:$0xff]  ;;  %v204_v41 = vld [vmem:[%s1595_s29 + $0x1b8] sm:$0xff] }
  0x28   : > { %1087 = vmatpush3.bf16.msra.mxu0 %v1365_v26  ;;  %v190_v26 = vld [vmem:[%s1595_s29 + $0x148] sm:$0xff]  ;;  %v195_v37 = vld [vmem:[%s1595_s29 + $0x170] sm:$0xff]  ;;  %v297_v42 = vpack.c.bf16 %v193_v35, %v189_v34  ;;  %v197_v46 = vld [vmem:[%s1595_s29 + $0x180] sm:$0xff] }
  0x29   : > { %1199 = vmatpush3.bf16.msra.mxu1 %v1366_v27  ;;  %1088 = vmatprep.subr.bf16.mxu0 %v1367_v28  ;;  %v194_v27 = vld [vmem:[%s1595_s29 + $0x168] sm:$0xff]  ;;  %v192_v28 = vld [vmem:[%s1595_s29 + $0x158] sm:$0xff]  ;;  %v299_v43 = vpack.c.bf16 %v195_v37, %v191_v36  ;;  %v201_v47 = vld [vmem:[%s1595_s29 + $0x1a0] sm:$0xff] }
  0x2a   : > { %1200 = vmatprep.subr.bf16.mxu1 %v1368_v29  ;;  %v196_v29 = vld [vmem:[%s1595_s29 + $0x178] sm:$0xff]  ;;  %v298_v32 = vpack.c.bf16 %v194_v27, %v190_v26  ;;  %v206_v50 = vld [vmem:[%s1595_s29 + $0x1c8] sm:$0xff]  ;;  %v301_v54 = vpack.c.bf16 %v201_v47, %v197_v46 }
  0x2b   : > { %v300_v33 = vpack.c.bf16 %v196_v29, %v192_v28  ;;  %v210_v51 = vld [vmem:[%s1595_s29 + $0x1e8] sm:$0xff]  ;;  %v208_v52 = vld [vmem:[%s1595_s29 + $0x1d8] sm:$0xff] }
  0x2c   : > { %1089 = vmatpush3.bf16.msra.mxu0 %v1369_v30  ;;  %v293_v30 = vpack.c.bf16 %v185_v23, %v181_v22  ;;  %v212_v53 = vld [vmem:[%s1595_s29 + $0x1f8] sm:$0xff]  ;;  %v306_v56 = vpack.c.bf16 %v210_v51, %v206_v50  ;;  %v214_v62 = vld [vmem:[%s1595_s29 + $0x208] sm:$0xff] }
  0x2d   : > { %1201 = vmatpush3.bf16.msra.mxu1 %v1370_v31  ;;  %v295_v31 = vpack.c.bf16 %v187_v25, %v183_v24  ;;  %v308_v57 = vpack.c.bf16 %v212_v53, %v208_v52  ;;  %v218_v63 = vld [vmem:[%s1595_s29 + $0x228] sm:$0xff]  ;;  %v216_v0 = vld [vmem:[%s1595_s29 + $0x218] sm:$0xff] }
  0x2e   : > { %v220_v1 = vld [vmem:[%s1595_s29 + $0x238] sm:$0xff]  ;;  %v310_v4 = vpack.c.bf16 %v218_v63, %v214_v62  ;;  %v222_v10 = vld [vmem:[%s1595_s29 + $0x248] sm:$0xff] }
  0x2f   : > { %630 = vmatmul.mubr.bf16.vlgmr.msra.gmra.mrb[0].mxu0 %v277_v40  ;;  %v200_v40 = vld [vmem:[%s1595_s29 + $0x198] sm:$0xff]  ;;  %v312_v5 = vpack.c.bf16 %v220_v1, %v216_v0  ;;  %v226_v11 = vld [vmem:[%s1595_s29 + $0x268] sm:$0xff] }
  0x30   : > { %791 = vmatmul.mubr.bf16.vlgmr.msra.gmra.mrb[0].mxu1 %v279_v44  ;;  %637 = vmatprep.mubr.bf16.mxu0 %v282_v48  ;;  %v302_v44 = vpack.c.bf16 %v202_v39, %v198_v38  ;;  %v304_v45 = vpack.c.bf16 %v204_v41, %v200_v40  ;;  %v199_v48 = vld [vmem:[%s1595_s29 + $0x190] sm:$0xff]  ;;  %v224_v12 = vld [vmem:[%s1595_s29 + $0x258] sm:$0xff]  ;;  %v314_v16 = vpack.c.bf16 %v226_v11, %v222_v10  ;;  %v230_v22 = vld [vmem:[%s1595_s29 + $0x288] sm:$0xff] }
  0x31   : > { %798 = vmatprep.mubr.bf16.mxu1 %v284_v49  ;;  %v203_v49 = vld [vmem:[%s1595_s29 + $0x1b0] sm:$0xff]  ;;  %v228_v13 = vld [vmem:[%s1595_s29 + $0x278] sm:$0xff]  ;;  %v234_v23 = vld [vmem:[%s1595_s29 + $0x2a8] sm:$0xff] }
  0x32   : > { %v303_v55 = vpack.c.bf16 %v203_v49, %v199_v48  ;;  %v316_v17 = vpack.c.bf16 %v228_v13, %v224_v12  ;;  %v232_v24 = vld [vmem:[%s1595_s29 + $0x298] sm:$0xff]  ;;  %v318_v28 = vpack.c.bf16 %v234_v23, %v230_v22  ;;  %v238_v34 = vld [vmem:[%s1595_s29 + $0x2c8] sm:$0xff] }
  0x33   : > { %v236_v25 = vld [vmem:[%s1595_s29 + $0x2b8] sm:$0xff]  ;;  %v242_v35 = vld [vmem:[%s1595_s29 + $0x2e8] sm:$0xff] }
  0x34   : > { %v320_v29 = vpack.c.bf16 %v236_v25, %v232_v24  ;;  %v240_v36 = vld [vmem:[%s1595_s29 + $0x2d8] sm:$0xff]  ;;  %v322_v40 = vpack.c.bf16 %v242_v35, %v238_v34  ;;  %v246_v46 = vld [vmem:[%s1595_s29 + $0x308] sm:$0xff] }
  0x35   : > { %v244_v37 = vld [vmem:[%s1595_s29 + $0x2f8] sm:$0xff]  ;;  %v250_v47 = vld [vmem:[%s1595_s29 + $0x328] sm:$0xff] }
  0x36   : > { %v324_v41 = vpack.c.bf16 %v244_v37, %v240_v36  ;;  %v248_v48 = vld [vmem:[%s1595_s29 + $0x318] sm:$0xff]  ;;  %v326_v52 = vpack.c.bf16 %v250_v47, %v246_v46 }
  0x37   : > { %638 = vmatmul.mubr.bf16.gmra.mrb[4].mxu0 %v281_v58  ;;  %v205_v58 = vld [vmem:[%s1595_s29 + $0x1c0] sm:$0xff]  ;;  %v252_v49 = vld [vmem:[%s1595_s29 + $0x338] sm:$0xff] }
  0x38   : > { %799 = vmatmul.mubr.bf16.gmra.mrb[4].mxu1 %v283_v59  ;;  %645 = vmatprep.mubr.bf16.mxu0 %v286_v60  ;;  %v209_v59 = vld [vmem:[%s1595_s29 + $0x1e0] sm:$0xff]  ;;  %v207_v60 = vld [vmem:[%s1595_s29 + $0x1d0] sm:$0xff]  ;;  %v328_v53 = vpack.c.bf16 %v252_v49, %v248_v48 }
  0x39   : > { %806 = vmatprep.mubr.bf16.mxu1 %v288_v61  ;;  %v211_v61 = vld [vmem:[%s1595_s29 + $0x1f0] sm:$0xff]  ;;  %v305_v2 = vpack.c.bf16 %v209_v59, %v205_v58  ;;  %v254_v58 = vld [vmem:[%s1595_s29 + $0x348] sm:$0xff] }
  0x3a   : > { %v307_v3 = vpack.c.bf16 %v211_v61, %v207_v60  ;;  %v258_v59 = vld [vmem:[%s1595_s29 + $0x368] sm:$0xff]  ;;  %v256_v60 = vld [vmem:[%s1595_s29 + $0x358] sm:$0xff] }
  0x3b   : > { %v260_v61 = vld [vmem:[%s1595_s29 + $0x378] sm:$0xff]  ;;  %v330_v0 = vpack.c.bf16 %v258_v59, %v254_v58 }
  0x3c   : > { %v332_v1 = vpack.c.bf16 %v260_v61, %v256_v60 }
  0x3f   : > { %646 = vmatmul.mubr.bf16.gmra.mrb[8].mxu0 %v285_v6  ;;  %v213_v6 = vld [vmem:[%s1595_s29 + $0x200] sm:$0xff] }
  0x40   : > { %807 = vmatmul.mubr.bf16.gmra.mrb[8].mxu1 %v287_v7  ;;  %653 = vmatprep.mubr.bf16.mxu0 %v290_v8  ;;  %v217_v7 = vld [vmem:[%s1595_s29 + $0x220] sm:$0xff]  ;;  %v215_v8 = vld [vmem:[%s1595_s29 + $0x210] sm:$0xff] }
  0x41   : > { %814 = vmatprep.mubr.bf16.mxu1 %v292_v9  ;;  %v219_v9 = vld [vmem:[%s1595_s29 + $0x230] sm:$0xff]  ;;  %v309_v14 = vpack.c.bf16 %v217_v7, %v213_v6  ;;  %v262_v6 = vld [vmem:[%s1595_s29 + $0x388] sm:$0xff] }
  0x42   : > { %v311_v15 = vpack.c.bf16 %v219_v9, %v215_v8  ;;  %v266_v7 = vld [vmem:[%s1595_s29 + $0x3a8] sm:$0xff]  ;;  %v264_v8 = vld [vmem:[%s1595_s29 + $0x398] sm:$0xff] }
  0x43   : > { %v268_v9 = vld [vmem:[%s1595_s29 + $0x3b8] sm:$0xff]  ;;  %v334_v12 = vpack.c.bf16 %v266_v7, %v262_v6 }
  0x44   : > { %v336_v13 = vpack.c.bf16 %v268_v9, %v264_v8 }
  0x47   : > { %654 = vmatmul.mubr.bf16.gmra.mrb[12].mxu0 %v289_v18  ;;  %v221_v18 = vld [vmem:[%s1595_s29 + $0x240] sm:$0xff] }
  0x48   : > { %815 = vmatmul.mubr.bf16.gmra.mrb[12].mxu1 %v291_v19  ;;  %661 = vmatprep.mubr.bf16.mxu0 %v294_v20  ;;  %v225_v19 = vld [vmem:[%s1595_s29 + $0x260] sm:$0xff]  ;;  %v223_v20 = vld [vmem:[%s1595_s29 + $0x250] sm:$0xff] }
  0x49   : > { %822 = vmatprep.mubr.bf16.mxu1 %v296_v21  ;;  %v227_v21 = vld [vmem:[%s1595_s29 + $0x270] sm:$0xff]  ;;  %v313_v26 = vpack.c.bf16 %v225_v19, %v221_v18  ;;  %v270_v18 = vld [vmem:[%s1595_s29 + $0x3c8] sm:$0xff] }
  0x4a   : > { %v315_v27 = vpack.c.bf16 %v227_v21, %v223_v20  ;;  %v274_v19 = vld [vmem:[%s1595_s29 + $0x3e8] sm:$0xff]  ;;  %v272_v20 = vld [vmem:[%s1595_s29 + $0x3d8] sm:$0xff] }
  0x4b   : > { %v276_v21 = vld [vmem:[%s1595_s29 + $0x3f8] sm:$0xff]  ;;  %v338_v24 = vpack.c.bf16 %v274_v19, %v270_v18 }
  0x4c   : > { %v340_v25 = vpack.c.bf16 %v276_v21, %v272_v20 }
  0x4f   : > { %662 = vmatmul.mubr.bf16.gmra.mrb[16].mxu0 %v293_v30  ;;  %v229_v30 = vld [vmem:[%s1595_s29 + $0x280] sm:$0xff] }
  0x50   : > { %823 = vmatmul.mubr.bf16.gmra.mrb[16].mxu1 %v295_v31  ;;  %669 = vmatprep.mubr.bf16.mxu0 %v298_v32  ;;  %v233_v31 = vld [vmem:[%s1595_s29 + $0x2a0] sm:$0xff]  ;;  %v231_v32 = vld [vmem:[%s1595_s29 + $0x290] sm:$0xff] }
  0x51   : > { %830 = vmatprep.mubr.bf16.mxu1 %v300_v33  ;;  %v235_v33 = vld [vmem:[%s1595_s29 + $0x2b0] sm:$0xff]  ;;  %v317_v38 = vpack.c.bf16 %v233_v31, %v229_v30 }
  0x52   : > { %v319_v39 = vpack.c.bf16 %v235_v33, %v231_v32 }
  0x57   : > { %670 = vmatmul.mubr.bf16.gmra.mrb[20].mxu0 %v297_v42  ;;  %v237_v42 = vld [vmem:[%s1595_s29 + $0x2c0] sm:$0xff] }
  0x58   : > { %831 = vmatmul.mubr.bf16.gmra.mrb[20].mxu1 %v299_v43  ;;  %677 = vmatprep.mubr.bf16.mxu0 %v302_v44  ;;  %v241_v43 = vld [vmem:[%s1595_s29 + $0x2e0] sm:$0xff]  ;;  %v239_v44 = vld [vmem:[%s1595_s29 + $0x2d0] sm:$0xff] }
  0x59   : > { %838 = vmatprep.mubr.bf16.mxu1 %v304_v45  ;;  %v243_v45 = vld [vmem:[%s1595_s29 + $0x2f0] sm:$0xff]  ;;  %v321_v50 = vpack.c.bf16 %v241_v43, %v237_v42 }
  0x5a   : > { %v323_v51 = vpack.c.bf16 %v243_v45, %v239_v44 }
  0x5f   : > { %678 = vmatmul.mubr.bf16.gmra.mrb[24].mxu0 %v301_v54  ;;  %v245_v54 = vld [vmem:[%s1595_s29 + $0x300] sm:$0xff] }
  0x60   : > { %839 = vmatmul.mubr.bf16.gmra.mrb[24].mxu1 %v303_v55  ;;  %685 = vmatprep.mubr.bf16.mxu0 %v306_v56  ;;  %v249_v55 = vld [vmem:[%s1595_s29 + $0x320] sm:$0xff]  ;;  %v247_v56 = vld [vmem:[%s1595_s29 + $0x310] sm:$0xff] }
  0x61   : > { %846 = vmatprep.mubr.bf16.mxu1 %v308_v57  ;;  %v251_v57 = vld [vmem:[%s1595_s29 + $0x330] sm:$0xff]  ;;  %v325_v62 = vpack.c.bf16 %v249_v55, %v245_v54 }
  0x62   : > { %v327_v63 = vpack.c.bf16 %v251_v57, %v247_v56 }
  0x67   : > { %686 = vmatmul.mubr.bf16.gmra.mrb[28].mxu0 %v305_v2  ;;  %v253_v2 = vld [vmem:[%s1595_s29 + $0x340] sm:$0xff] }
  0x68   : > { %847 = vmatmul.mubr.bf16.gmra.mrb[28].mxu1 %v307_v3  ;;  %693 = vmatprep.mubr.bf16.mxu0 %v310_v4  ;;  %v257_v3 = vld [vmem:[%s1595_s29 + $0x360] sm:$0xff]  ;;  %v255_v4 = vld [vmem:[%s1595_s29 + $0x350] sm:$0xff] }
  0x69   : > { %854 = vmatprep.mubr.bf16.mxu1 %v312_v5  ;;  %v259_v5 = vld [vmem:[%s1595_s29 + $0x370] sm:$0xff]  ;;  %v329_v10 = vpack.c.bf16 %v257_v3, %v253_v2 }
  0x6a   : > { %v331_v11 = vpack.c.bf16 %v259_v5, %v255_v4 }
  0x6f   : > { %694 = vmatmul.mubr.bf16.gmra.mrb[32].mxu0 %v309_v14  ;;  %v261_v14 = vld [vmem:[%s1595_s29 + $0x380] sm:$0xff] }
  0x70   : > { %855 = vmatmul.mubr.bf16.gmra.mrb[32].mxu1 %v311_v15  ;;  %701 = vmatprep.mubr.bf16.mxu0 %v314_v16  ;;  %v265_v15 = vld [vmem:[%s1595_s29 + $0x3a0] sm:$0xff]  ;;  %v263_v16 = vld [vmem:[%s1595_s29 + $0x390] sm:$0xff] }
  0x71   : > { %862 = vmatprep.mubr.bf16.mxu1 %v316_v17  ;;  %v267_v17 = vld [vmem:[%s1595_s29 + $0x3b0] sm:$0xff]  ;;  %v333_v22 = vpack.c.bf16 %v265_v15, %v261_v14 }
  0x72   : > { %v335_v23 = vpack.c.bf16 %v267_v17, %v263_v16 }
  0x77   : > { %702 = vmatmul.mubr.bf16.gmra.mrb[36].mxu0 %v313_v26  ;;  %v269_v26 = vld [vmem:[%s1595_s29 + $0x3c0] sm:$0xff] }
  0x78   : > { %863 = vmatmul.mubr.bf16.gmra.mrb[36].mxu1 %v315_v27  ;;  %709 = vmatprep.mubr.bf16.mxu0 %v318_v28  ;;  %v273_v27 = vld [vmem:[%s1595_s29 + $0x3e0] sm:$0xff]  ;;  %v271_v28 = vld [vmem:[%s1595_s29 + $0x3d0] sm:$0xff] }
  0x79   : > { %870 = vmatprep.mubr.bf16.mxu1 %v320_v29  ;;  %v275_v29 = vld [vmem:[%s1595_s29 + $0x3f0] sm:$0xff]  ;;  %v337_v30 = vpack.c.bf16 %v273_v27, %v269_v26 }
  0x7a   : > { %v339_v31 = vpack.c.bf16 %v275_v29, %v271_v28 }
  0x7f   : > { %710 = vmatmul.mubr.bf16.gmra.mrb[40].mxu0 %v317_v38 }
  0x80   : > { %871 = vmatmul.mubr.bf16.gmra.mrb[40].mxu1 %v319_v39  ;;  %717 = vmatprep.mubr.bf16.mxu0 %v322_v40 }
  0x81   : > { %878 = vmatprep.mubr.bf16.mxu1 %v324_v41 }
  0x87   : > { %718 = vmatmul.mubr.bf16.gmra.mrb[44].mxu0 %v321_v50 }
  0x88   : > { %879 = vmatmul.mubr.bf16.gmra.mrb[44].mxu1 %v323_v51  ;;  %725 = vmatprep.mubr.bf16.mxu0 %v326_v52 }
  0x89   : > { %886 = vmatprep.mubr.bf16.mxu1 %v328_v53 }
  0x8f   : > { %726 = vmatmul.mubr.bf16.gmra.mrb[48].mxu0 %v325_v62 }
  0x90   : > { %887 = vmatmul.mubr.bf16.gmra.mrb[48].mxu1 %v327_v63  ;;  %733 = vmatprep.mubr.bf16.mxu0 %v330_v0 }
  0x91   : > { %894 = vmatprep.mubr.bf16.mxu1 %v332_v1 }
  0x97   : > { %734 = vmatmul.mubr.bf16.gmra.mrb[52].mxu0 %v329_v10 }
  0x98   : > { %895 = vmatmul.mubr.bf16.gmra.mrb[52].mxu1 %v331_v11  ;;  %741 = vmatprep.mubr.bf16.mxu0 %v334_v12 }
  0x99   : > { %902 = vmatprep.mubr.bf16.mxu1 %v336_v13 }
  0x9f   : > { %742 = vmatmul.mubr.bf16.gmra.mrb[56].mxu0 %v333_v22 }
  0xa0   : > { %903 = vmatmul.mubr.bf16.gmra.mrb[56].mxu1 %v335_v23  ;;  %749 = vmatprep.mubr.bf16.mxu0 %v338_v24 }
  0xa1   : > { %910 = vmatprep.mubr.bf16.mxu1 %v340_v25 }
  0xa7   : > { %750 = vmatmul.mubr.bf16.gmra.mrb[60].mxu0 %v337_v30 }
  0xa8   : > { %911 = vmatmul.mubr.bf16.gmra.mrb[60].mxu1 %v339_v31 }
 0x102   : > { %v1090_v32 = vpop.f32.mrb[0].mxu0 }
 0x103   : > { %v1202_v33 = vpop.f32.mrb[0].mxu1  ;;  %v1091_v34 = vpop.f32.mrb[1].mxu0 }
 0x104   : > { %v1092_v35 = vadd.f32 %v1091_v34, %v1090_v32  ;;  %v1203_v36 = vpop.f32.mrb[1].mxu1  ;;  %v1093_v37 = vpop.f32.mrb[2].mxu0 }
 0x105   : > { %v1204_v38 = vadd.f32 %v1203_v36, %v1202_v33  ;;  %v1205_v39 = vpop.f32.mrb[2].mxu1  ;;  %v1094_v40 = vpop.f32.mrb[3].mxu0 }
 0x106   : > { %v1095_v41 = vadd.f32 %v1094_v40, %v1093_v37  ;;  %v1206_v42 = vpop.f32.mrb[3].mxu1 }
 0x107   : > { %v793_v43 = vadd.f32 %v1204_v38, %v1092_v35  ;;  %v1207_v44 = vadd.f32 %v1206_v42, %v1205_v39 }
 0x109   : > { %919 = vst [vmem:[%s1734_s8] sm:$0xff] %v793_v43  ;;  %v796_v45 = vadd.f32 %v1207_v44, %v1095_v41 }
 0x10a   : > { %v1096_v46 = vpop.f32.mrb[4].mxu0 }
 0x10b   : > { %920 = vst [vmem:[%s1734_s8 + $0x8] sm:$0xff] %v796_v45  ;;  %v1208_v47 = vpop.f32.mrb[4].mxu1  ;;  %v1097_v48 = vpop.f32.mrb[5].mxu0 }
 0x10c   : > { %v1098_v49 = vadd.f32 %v1097_v48, %v1096_v46  ;;  %v1209_v50 = vpop.f32.mrb[5].mxu1  ;;  %v1099_v51 = vpop.f32.mrb[6].mxu0 }
 0x10d   : > { %v1210_v52 = vadd.f32 %v1209_v50, %v1208_v47  ;;  %v1211_v53 = vpop.f32.mrb[6].mxu1  ;;  %v1100_v54 = vpop.f32.mrb[7].mxu0 }
 0x10e   : > { %v1101_v55 = vadd.f32 %v1100_v54, %v1099_v51  ;;  %v1212_v56 = vpop.f32.mrb[7].mxu1 }
 0x10f   : > { %v801_v57 = vadd.f32 %v1210_v52, %v1098_v49  ;;  %v1213_v58 = vadd.f32 %v1212_v56, %v1211_v53 }
 0x111   : > { %921 = vst [vmem:[%s1734_s8 + $0x10] sm:$0xff] %v801_v57  ;;  %v804_v59 = vadd.f32 %v1213_v58, %v1101_v55 }
 0x112   : > { %v1102_v60 = vpop.f32.mrb[8].mxu0 }
 0x113   : > { %922 = vst [vmem:[%s1734_s8 + $0x18] sm:$0xff] %v804_v59  ;;  %v1214_v61 = vpop.f32.mrb[8].mxu1  ;;  %v1103_v62 = vpop.f32.mrb[9].mxu0 }
 0x114   : > { %v1104_v63 = vadd.f32 %v1103_v62, %v1102_v60  ;;  %v1215_v0 = vpop.f32.mrb[9].mxu1  ;;  %v1105_v1 = vpop.f32.mrb[10].mxu0 }
 0x115   : > { %v1216_v2 = vadd.f32 %v1215_v0, %v1214_v61  ;;  %v1217_v3 = vpop.f32.mrb[10].mxu1  ;;  %v1106_v4 = vpop.f32.mrb[11].mxu0 }
 0x116   : > { %v1107_v5 = vadd.f32 %v1106_v4, %v1105_v1  ;;  %v1218_v6 = vpop.f32.mrb[11].mxu1 }
 0x117   : > { %v809_v7 = vadd.f32 %v1216_v2, %v1104_v63  ;;  %v1219_v8 = vadd.f32 %v1218_v6, %v1217_v3 }
 0x119   : > { %923 = vst [vmem:[%s1734_s8 + $0x20] sm:$0xff] %v809_v7  ;;  %v812_v9 = vadd.f32 %v1219_v8, %v1107_v5 }
 0x11a   : > { %v1108_v10 = vpop.f32.mrb[12].mxu0 }
 0x11b   : > { %924 = vst [vmem:[%s1734_s8 + $0x28] sm:$0xff] %v812_v9  ;;  %v1220_v11 = vpop.f32.mrb[12].mxu1  ;;  %v1109_v12 = vpop.f32.mrb[13].mxu0 }
 0x11c   : > { %v1110_v13 = vadd.f32 %v1109_v12, %v1108_v10  ;;  %v1221_v14 = vpop.f32.mrb[13].mxu1  ;;  %v1111_v15 = vpop.f32.mrb[14].mxu0 }
 0x11d   : > { %v1222_v16 = vadd.f32 %v1221_v14, %v1220_v11  ;;  %v1223_v17 = vpop.f32.mrb[14].mxu1  ;;  %v1112_v18 = vpop.f32.mrb[15].mxu0 }
 0x11e   : > { %v1113_v19 = vadd.f32 %v1112_v18, %v1111_v15  ;;  %v1224_v20 = vpop.f32.mrb[15].mxu1 }
 0x11f   : > { %v817_v21 = vadd.f32 %v1222_v16, %v1110_v13  ;;  %v1225_v22 = vadd.f32 %v1224_v20, %v1223_v17 }
 0x121   : > { %925 = vst [vmem:[%s1734_s8 + $0x30] sm:$0xff] %v817_v21  ;;  %v820_v23 = vadd.f32 %v1225_v22, %v1113_v19 }
 0x122   : > { %v1114_v24 = vpop.f32.mrb[16].mxu0 }
 0x123   : > { %926 = vst [vmem:[%s1734_s8 + $0x38] sm:$0xff] %v820_v23  ;;  %v1226_v25 = vpop.f32.mrb[16].mxu1  ;;  %v1115_v26 = vpop.f32.mrb[17].mxu0 }
 0x124   : > { %v1116_v27 = vadd.f32 %v1115_v26, %v1114_v24  ;;  %v1227_v28 = vpop.f32.mrb[17].mxu1  ;;  %v1117_v29 = vpop.f32.mrb[18].mxu0 }
 0x125   : > { %v1228_v30 = vadd.f32 %v1227_v28, %v1226_v25  ;;  %v1229_v31 = vpop.f32.mrb[18].mxu1  ;;  %v1118_v32 = vpop.f32.mrb[19].mxu0 }
 0x126   : > { %v1119_v33 = vadd.f32 %v1118_v32, %v1117_v29  ;;  %v1230_v34 = vpop.f32.mrb[19].mxu1 }
 0x127   : > { %v825_v35 = vadd.f32 %v1228_v30, %v1116_v27  ;;  %v1231_v36 = vadd.f32 %v1230_v34, %v1229_v31 }
 0x129   : > { %927 = vst [vmem:[%s1734_s8 + $0x40] sm:$0xff] %v825_v35  ;;  %v828_v37 = vadd.f32 %v1231_v36, %v1119_v33 }
 0x12a   : > { %v1120_v38 = vpop.f32.mrb[20].mxu0 }
 0x12b   : > { %928 = vst [vmem:[%s1734_s8 + $0x48] sm:$0xff] %v828_v37  ;;  %v1232_v39 = vpop.f32.mrb[20].mxu1  ;;  %v1121_v40 = vpop.f32.mrb[21].mxu0 }
 0x12c   : > { %v1122_v41 = vadd.f32 %v1121_v40, %v1120_v38  ;;  %v1233_v42 = vpop.f32.mrb[21].mxu1  ;;  %v1123_v43 = vpop.f32.mrb[22].mxu0 }
 0x12d   : > { %v1234_v44 = vadd.f32 %v1233_v42, %v1232_v39  ;;  %v1235_v45 = vpop.f32.mrb[22].mxu1  ;;  %v1124_v46 = vpop.f32.mrb[23].mxu0 }
 0x12e   : > { %v1125_v47 = vadd.f32 %v1124_v46, %v1123_v43  ;;  %v1236_v48 = vpop.f32.mrb[23].mxu1 }
 0x12f   : > { %v833_v49 = vadd.f32 %v1234_v44, %v1122_v41  ;;  %v1237_v50 = vadd.f32 %v1236_v48, %v1235_v45 }
 0x131   : > { %929 = vst [vmem:[%s1734_s8 + $0x50] sm:$0xff] %v833_v49  ;;  %v836_v51 = vadd.f32 %v1237_v50, %v1125_v47 }
 0x132   : > { %v1126_v52 = vpop.f32.mrb[24].mxu0 }
 0x133   : > { %930 = vst [vmem:[%s1734_s8 + $0x58] sm:$0xff] %v836_v51  ;;  %v1238_v53 = vpop.f32.mrb[24].mxu1  ;;  %v1127_v54 = vpop.f32.mrb[25].mxu0 }
 0x134   : > { %v1128_v55 = vadd.f32 %v1127_v54, %v1126_v52  ;;  %v1239_v56 = vpop.f32.mrb[25].mxu1  ;;  %v1129_v57 = vpop.f32.mrb[26].mxu0 }
 0x135   : > { %v1240_v58 = vadd.f32 %v1239_v56, %v1238_v53  ;;  %v1241_v59 = vpop.f32.mrb[26].mxu1  ;;  %v1130_v60 = vpop.f32.mrb[27].mxu0 }
 0x136   : > { %v1131_v61 = vadd.f32 %v1130_v60, %v1129_v57  ;;  %v1242_v62 = vpop.f32.mrb[27].mxu1 }
 0x137   : > { %v841_v63 = vadd.f32 %v1240_v58, %v1128_v55  ;;  %v1243_v0 = vadd.f32 %v1242_v62, %v1241_v59 }
 0x139   : > { %931 = vst [vmem:[%s1734_s8 + $0x60] sm:$0xff] %v841_v63  ;;  %v844_v1 = vadd.f32 %v1243_v0, %v1131_v61 }
 0x13a   : > { %v1132_v2 = vpop.f32.mrb[28].mxu0 }
 0x13b   : > { %932 = vst [vmem:[%s1734_s8 + $0x68] sm:$0xff] %v844_v1  ;;  %v1244_v3 = vpop.f32.mrb[28].mxu1  ;;  %v1133_v4 = vpop.f32.mrb[29].mxu0 }
 0x13c   : > { %v1134_v5 = vadd.f32 %v1133_v4, %v1132_v2  ;;  %v1245_v6 = vpop.f32.mrb[29].mxu1  ;;  %v1135_v7 = vpop.f32.mrb[30].mxu0 }
 0x13d   : > { %v1246_v8 = vadd.f32 %v1245_v6, %v1244_v3  ;;  %v1247_v9 = vpop.f32.mrb[30].mxu1  ;;  %v1136_v10 = vpop.f32.mrb[31].mxu0 }
 0x13e   : > { %v1137_v11 = vadd.f32 %v1136_v10, %v1135_v7  ;;  %v1248_v12 = vpop.f32.mrb[31].mxu1 }
 0x13f   : > { %v849_v13 = vadd.f32 %v1246_v8, %v1134_v5  ;;  %v1249_v14 = vadd.f32 %v1248_v12, %v1247_v9 }
 0x141   : > { %933 = vst [vmem:[%s1734_s8 + $0x70] sm:$0xff] %v849_v13  ;;  %v852_v15 = vadd.f32 %v1249_v14, %v1137_v11 }
 0x142   : > { %v1138_v16 = vpop.f32.mrb[32].mxu0 }
 0x143   : > { %934 = vst [vmem:[%s1734_s8 + $0x78] sm:$0xff] %v852_v15  ;;  %v1250_v17 = vpop.f32.mrb[32].mxu1  ;;  %v1139_v18 = vpop.f32.mrb[33].mxu0 }
 0x144   : > { %v1140_v19 = vadd.f32 %v1139_v18, %v1138_v16  ;;  %v1251_v20 = vpop.f32.mrb[33].mxu1  ;;  %v1141_v21 = vpop.f32.mrb[34].mxu0 }
 0x145   : > { %v1252_v22 = vadd.f32 %v1251_v20, %v1250_v17  ;;  %v1253_v23 = vpop.f32.mrb[34].mxu1  ;;  %v1142_v24 = vpop.f32.mrb[35].mxu0 }
 0x146   : > { %v1143_v25 = vadd.f32 %v1142_v24, %v1141_v21  ;;  %v1254_v26 = vpop.f32.mrb[35].mxu1 }
 0x147   : > { %v857_v27 = vadd.f32 %v1252_v22, %v1140_v19  ;;  %v1255_v28 = vadd.f32 %v1254_v26, %v1253_v23 }
 0x149   : > { %935 = vst [vmem:[%s1734_s8 + $0x80] sm:$0xff] %v857_v27  ;;  %v860_v29 = vadd.f32 %v1255_v28, %v1143_v25 }
 0x14a   : > { %v1144_v30 = vpop.f32.mrb[36].mxu0 }
 0x14b   : > { %936 = vst [vmem:[%s1734_s8 + $0x88] sm:$0xff] %v860_v29  ;;  %v1256_v31 = vpop.f32.mrb[36].mxu1  ;;  %v1145_v32 = vpop.f32.mrb[37].mxu0 }
 0x14c   : > { %v1146_v33 = vadd.f32 %v1145_v32, %v1144_v30  ;;  %v1257_v34 = vpop.f32.mrb[37].mxu1  ;;  %v1147_v35 = vpop.f32.mrb[38].mxu0 }
 0x14d   : > { %v1258_v36 = vadd.f32 %v1257_v34, %v1256_v31  ;;  %v1259_v37 = vpop.f32.mrb[38].mxu1  ;;  %v1148_v38 = vpop.f32.mrb[39].mxu0 }
 0x14e   : > { %v1149_v39 = vadd.f32 %v1148_v38, %v1147_v35  ;;  %v1260_v40 = vpop.f32.mrb[39].mxu1 }
 0x14f   : > { %v865_v41 = vadd.f32 %v1258_v36, %v1146_v33  ;;  %v1261_v42 = vadd.f32 %v1260_v40, %v1259_v37 }
 0x151   : > { %937 = vst [vmem:[%s1734_s8 + $0x90] sm:$0xff] %v865_v41  ;;  %v868_v43 = vadd.f32 %v1261_v42, %v1149_v39 }
 0x152   : > { %v1150_v44 = vpop.f32.mrb[40].mxu0 }
 0x153   : > { %938 = vst [vmem:[%s1734_s8 + $0x98] sm:$0xff] %v868_v43  ;;  %v1262_v45 = vpop.f32.mrb[40].mxu1  ;;  %v1151_v46 = vpop.f32.mrb[41].mxu0 }
 0x154   : > { %v1152_v47 = vadd.f32 %v1151_v46, %v1150_v44  ;;  %v1263_v48 = vpop.f32.mrb[41].mxu1  ;;  %v1153_v49 = vpop.f32.mrb[42].mxu0 }
 0x155   : > { %v1264_v50 = vadd.f32 %v1263_v48, %v1262_v45  ;;  %v1265_v51 = vpop.f32.mrb[42].mxu1  ;;  %v1154_v52 = vpop.f32.mrb[43].mxu0 }
 0x156   : > { %v1155_v53 = vadd.f32 %v1154_v52, %v1153_v49  ;;  %v1266_v54 = vpop.f32.mrb[43].mxu1 }
 0x157   : > { %v873_v55 = vadd.f32 %v1264_v50, %v1152_v47  ;;  %v1267_v56 = vadd.f32 %v1266_v54, %v1265_v51 }
 0x159   : > { %939 = vst [vmem:[%s1734_s8 + $0xa0] sm:$0xff] %v873_v55  ;;  %v876_v57 = vadd.f32 %v1267_v56, %v1155_v53 }
 0x15a   : > { %v1156_v58 = vpop.f32.mrb[44].mxu0 }
 0x15b   : > { %940 = vst [vmem:[%s1734_s8 + $0xa8] sm:$0xff] %v876_v57  ;;  %v1268_v59 = vpop.f32.mrb[44].mxu1  ;;  %v1157_v60 = vpop.f32.mrb[45].mxu0 }
 0x15c   : > { %v1158_v61 = vadd.f32 %v1157_v60, %v1156_v58  ;;  %v1269_v62 = vpop.f32.mrb[45].mxu1  ;;  %v1159_v63 = vpop.f32.mrb[46].mxu0 }
 0x15d   : > { %v1270_v0 = vadd.f32 %v1269_v62, %v1268_v59  ;;  %v1271_v1 = vpop.f32.mrb[46].mxu1  ;;  %v1160_v2 = vpop.f32.mrb[47].mxu0 }
 0x15e   : > { %v1161_v3 = vadd.f32 %v1160_v2, %v1159_v63  ;;  %v1272_v4 = vpop.f32.mrb[47].mxu1 }
 0x15f   : > { %v881_v5 = vadd.f32 %v1270_v0, %v1158_v61  ;;  %v1273_v6 = vadd.f32 %v1272_v4, %v1271_v1 }
 0x161   : > { %941 = vst [vmem:[%s1734_s8 + $0xb0] sm:$0xff] %v881_v5  ;;  %v884_v7 = vadd.f32 %v1273_v6, %v1161_v3 }
 0x162   : > { %v1162_v8 = vpop.f32.mrb[48].mxu0 }
 0x163   : > { %942 = vst [vmem:[%s1734_s8 + $0xb8] sm:$0xff] %v884_v7  ;;  %v1274_v9 = vpop.f32.mrb[48].mxu1  ;;  %v1163_v10 = vpop.f32.mrb[49].mxu0 }
 0x164   : > { %v1164_v11 = vadd.f32 %v1163_v10, %v1162_v8  ;;  %v1275_v12 = vpop.f32.mrb[49].mxu1  ;;  %v1165_v13 = vpop.f32.mrb[50].mxu0 }
 0x165   : > { %v1276_v14 = vadd.f32 %v1275_v12, %v1274_v9  ;;  %v1277_v15 = vpop.f32.mrb[50].mxu1  ;;  %v1166_v16 = vpop.f32.mrb[51].mxu0 }
 0x166   : > { %v1167_v17 = vadd.f32 %v1166_v16, %v1165_v13  ;;  %v1278_v18 = vpop.f32.mrb[51].mxu1 }
 0x167   : > { %v889_v19 = vadd.f32 %v1276_v14, %v1164_v11  ;;  %v1279_v20 = vadd.f32 %v1278_v18, %v1277_v15 }
 0x169   : > { %943 = vst [vmem:[%s1734_s8 + $0xc0] sm:$0xff] %v889_v19  ;;  %v892_v21 = vadd.f32 %v1279_v20, %v1167_v17 }
 0x16a   : > { %v1168_v22 = vpop.f32.mrb[52].mxu0 }
 0x16b   : > { %944 = vst [vmem:[%s1734_s8 + $0xc8] sm:$0xff] %v892_v21  ;;  %v1280_v23 = vpop.f32.mrb[52].mxu1  ;;  %v1169_v24 = vpop.f32.mrb[53].mxu0 }
 0x16c   : > { %v1170_v25 = vadd.f32 %v1169_v24, %v1168_v22  ;;  %v1281_v26 = vpop.f32.mrb[53].mxu1  ;;  %v1171_v27 = vpop.f32.mrb[54].mxu0 }
 0x16d   : > { %v1282_v28 = vadd.f32 %v1281_v26, %v1280_v23  ;;  %v1283_v29 = vpop.f32.mrb[54].mxu1  ;;  %v1172_v30 = vpop.f32.mrb[55].mxu0 }
 0x16e   : > { %v1173_v31 = vadd.f32 %v1172_v30, %v1171_v27  ;;  %v1284_v32 = vpop.f32.mrb[55].mxu1 }
 0x16f   : > { %v897_v33 = vadd.f32 %v1282_v28, %v1170_v25  ;;  %v1285_v34 = vadd.f32 %v1284_v32, %v1283_v29 }
 0x171   : > { %945 = vst [vmem:[%s1734_s8 + $0xd0] sm:$0xff] %v897_v33  ;;  %v900_v35 = vadd.f32 %v1285_v34, %v1173_v31 }
 0x172   : > { %v1174_v36 = vpop.f32.mrb[56].mxu0 }
 0x173   : > { %946 = vst [vmem:[%s1734_s8 + $0xd8] sm:$0xff] %v900_v35  ;;  %v1286_v37 = vpop.f32.mrb[56].mxu1  ;;  %v1175_v38 = vpop.f32.mrb[57].mxu0 }
 0x174   : > { %v1176_v39 = vadd.f32 %v1175_v38, %v1174_v36  ;;  %v1287_v40 = vpop.f32.mrb[57].mxu1  ;;  %v1177_v41 = vpop.f32.mrb[58].mxu0 }
 0x175   : > { %v1288_v42 = vadd.f32 %v1287_v40, %v1286_v37  ;;  %v1289_v43 = vpop.f32.mrb[58].mxu1  ;;  %v1178_v44 = vpop.f32.mrb[59].mxu0 }
 0x176   : > { %v1179_v45 = vadd.f32 %v1178_v44, %v1177_v41  ;;  %v1290_v46 = vpop.f32.mrb[59].mxu1 }
 0x177   : > { %v905_v47 = vadd.f32 %v1288_v42, %v1176_v39  ;;  %v1291_v48 = vadd.f32 %v1290_v46, %v1289_v43 }
 0x179   : > { %947 = vst [vmem:[%s1734_s8 + $0xe0] sm:$0xff] %v905_v47  ;;  %v908_v49 = vadd.f32 %v1291_v48, %v1179_v45 }
 0x17a   : > { %v1180_v50 = vpop.f32.mrb[60].mxu0 }
 0x17b   : > { %948 = vst [vmem:[%s1734_s8 + $0xe8] sm:$0xff] %v908_v49  ;;  %v1292_v51 = vpop.f32.mrb[60].mxu1  ;;  %v1181_v52 = vpop.f32.mrb[61].mxu0 }
 0x17c   : > { %v1182_v53 = vadd.f32 %v1181_v52, %v1180_v50  ;;  %v1293_v54 = vpop.f32.mrb[61].mxu1  ;;  %v1183_v55 = vpop.f32.mrb[62].mxu0 }
 0x17d   : > { %v1294_v56 = vadd.f32 %v1293_v54, %v1292_v51  ;;  %v1295_v57 = vpop.f32.mrb[62].mxu1  ;;  %v1184_v58 = vpop.f32.mrb[63].mxu0 }
 0x17e   : > { %v1185_v59 = vadd.f32 %v1184_v58, %v1183_v55  ;;  %v1296_v60 = vpop.f32.mrb[63].mxu1 }
 0x17f   : > { %v913_v61 = vadd.f32 %v1294_v56, %v1182_v53  ;;  %v1297_v62 = vadd.f32 %v1296_v60, %v1295_v57 }
 0x181   : > { %949 = vst [vmem:[%s1734_s8 + $0xf0] sm:$0xff] %v913_v61  ;;  %v916_v63 = vadd.f32 %v1297_v62, %v1185_v59 }
 0x183   : > { %950 = vst [vmem:[%s1734_s8 + $0xf8] sm:$0xff] %v916_v63 }
 0x184   : > { %1384 = shalt.err (!%p1381_p3)
}
 0x185   : > { %s1385_s27 = scalar_lea.hbm %s1771_s22, 4096  ;;  %s1389_s6 = scalar_lea.hbm %s1822_s2, 8192 }
 0x186   : > { %p1386_p4 = scmp.ne.s32.totalorder %s1771_s22, %s1385_s27  ;;  %p1390_p9 = scmp.lt.u32.totalorder %s1771_s22, %s1822_s2 }
 0x187   : > { %p1391_p10 = scmp.lt.u32.totalorder %s1389_s6, %s1385_s27  ;;  %p1393_p12 = scmp.lt.u32.totalorder %s1385_s27, %s1771_s22 }
 0x188   : > { %p1387_p7 = pnand %p1386_p4, %p1491_p5 }
 0x189   : > { %p1392_p11 = por %p1391_p10, %p1390_p9 }
 0x18a   : > { %p1388_p8 = pneg %p1387_p7 }
 0x18b   : > { %p1394_p13 = por %p1393_p12, %p1392_p11 }
 0x18d   : > { %p1395_p0 = pnand %p1394_p13, %p1388_p8 }
 0x18f   : > { %1398 = shalt.err (!%p1395_p0)
}
 0x190   : > { %s1436_s4 = smov 128   ;;  %s1437_s5 = smov 8  }
 0x191   : > { %1298 = dma.vmem_to_hbm [thread:$0]  (%p1491_p5), %s1773_s16, 4096, %s1771_s22, %s1779_s13, %s1436_s4, %s1436_s4, %s1437_s5  }
 0x192 PF: > { %p1304_p1 = scmp.ge.s32.totalorder %s1433_s12, 2  ;;  %s980_s7 = sand.u32 1, %s1421_s9  }
 0x193   : > { %s981_s8 = scalar_lea.sflag [#allocation3], %s980_s7 }
 0x194   : > { %p1301_p2 = pnand %p1304_p1, %p1495_p6 }
 0x196   : > { %1416 = dma.done.wait (!%p1301_p2), %s981_s8, 4096  }
 0x197   : > { %1418 = vsyncadd (!%p1301_p2), %s981_s8, 4294963200  ;;  %p12_p3 = scmp.ge.s32.totalorder %s1478_s15, 4   ;;  %s1825_s9 = smov %s1425_s10 }
 0x198   : > { %s1826_s10 = smov %s1429_s11  ;;  %s1827_s11 = smov %s1489_s18 }
 0x199   : > { %s1828_s12 = smov %s1478_s15  ;;  %14 = sbr.rel (!%p12_p3) target bundleno = 3 (0x3), region = 63 }
 0x1a0   :  { %986 = vsyncpa [#allocation3], 1 }
 0x1a1   :  { %988 = vsyncpa [#allocation3 + $0x1], 1 }

// kernel: ngcn_forward.4
= control target key start
LH: loop header
LB: loop body
LE: loop exit
PB: predicated region body
PF: predicated region fallthrough
CT: control target
= control target key end

     0   :  { %9 = vsyncpa [#allocation3], 0  ;;  %s3180_s0 = inlined_call_operand.hbm [shape: f32[512,512], index: 0, kind: input, shape index: {}]   ;;  %s3181_s1 = inlined_call_operand.vmem [shape: bf16[512,128], index: 1, kind: input, shape index: {}]   ;;  %s3182_s2 = inlined_call_operand.hbm [shape: f32[128,128], index: 2, kind: input, shape index: {}]   ;;  %s3183_s3 = inlined_call_operand.hbm [shape: f32[1,128], index: 3, kind: input, shape index: {}]   ;;  %s3184_s4 = inlined_call_operand.vmem [shape: bf16[512,128], index: 4, kind: output, shape index: {}]  }
   0x1   :  { %11 = vsyncpa [#allocation3 + $0x1], 0 }
   0x2   :  { %12 = vsyncpa [#allocation5], 0  ;;  %s2539_s15 = smov 0   ;;  %s2541_s16 = smov 0  }
   0x3   :  { %s2543_s17 = smov 0   ;;  %s2545_s18 = smov 0  }
   0x4 LB: > { %s1697_s19 = sadd.s32 4294967295, %s2505_s18   ;;  %p38_p0 = scmp.ne.s32.totalorder %s2497_s16, %s2493_s15  ;;  %s2505_s18 = sphi %s2545_s18, %s3200_s18   ;;  %s2501_s17 = sphi %s2543_s17, %s3199_s17   ;;  %s2497_s16 = sphi %s2541_s16, %s3198_s16   ;;  %s2493_s15 = sphi %s2539_s15, %s3197_s15  }
   0x5   : > { %p2561_p1 = scmp.eq.s32.totalorder %s1697_s19, 0  ;;  %p1699_p2 = scmp.ge.s32.totalorder %s2505_s18, 1 }
   0x6   : > { %p138_p3 = scmp.lt.s32.totalorder %s2505_s18, 3  ;;  %s2507_s23 = smov [#allocation4]  }
   0x7   : > { %s3189_s20 = scalar_select %p2561_p1, 1, 0 }
   0x8   : > { %p2569_p4 = por %p2561_p1, %p38_p0  ;;  %p2573_p5 = pnand %p1699_p2, %p138_p3 }
   0x9   : > { %s153_s24 = sshll.u32 %s2507_s23, 4  ;;  %s2508_s26 = smov [#allocation6]   ;;  %s154_s24 = int_to_ptr.vmem [resolvable:$true] %s153_s24 }
   0xa   : > { %s3190_s21 = scalar_select %p2569_p4, 1, 0 }
   0xb   : > { %s3191_s22 = scalar_select %p2573_p5, 1, 0 }
   0xc   : > { %p2231_p6 = pneg %p2573_p5  ;;  %s167_s27 = sshll.u32 %s2508_s26, 4  ;;  %s2585_s27 = int_to_ptr.vmem [resolvable:$true] %s167_s27 }
   0xd   : > { %s2381_s30 = scalar_lea.hbm %s3182_s2, 2048 }
   0xe   : > { %p2581_p7 = pnand %p2231_p6, %p2561_p1  ;;  %p2382_p8 = scmp.ne.s32.totalorder %s3182_s2, %s2381_s30 }
   0xf   : > { %p2388_p12 = scmp.lt.u32.totalorder %s2381_s30, %s3182_s2 }
  0x10   : > { %p2383_p9 = pneg %p2581_p7 }
  0x12   : > { %p2384_p10 = pnand %p2383_p9, %p2382_p8 }
  0x14   : > { %p2385_p11 = pneg %p2384_p10 }
  0x16   : > { %p2390_p13 = pnand %p2388_p12, %p2385_p11 }
  0x18   : > { %2393 = shalt.err (!%p2390_p13)
}
  0x19   : > { %s2394_s9 = scalar_lea.vmem %s154_s24, 2048  ;;  %p2402_p6 = scmp.lt.s32.totalorder %s154_s24, %s154_s24 }
  0x1a   : > { %p2395_p0 = scmp.ne.s32.totalorder %s154_s24, %s2394_s9  ;;  %p2403_p1 = scmp.lt.s32.totalorder %s2394_s9, %s2394_s9 }
  0x1c   : > { %p2397_p2 = pnand %p2395_p0, %p2383_p9  ;;  %p2404_p4 = por %p2403_p1, %p2402_p6 }
  0x1e   : > { %p2398_p3 = pneg %p2397_p2 }
  0x20   : > { %p2405_p5 = pnand %p2404_p4, %p2398_p3 }
  0x22   : > { %2408 = shalt.err (!%p2405_p5)
}
  0x23   : > { %s2509_s10 = smov 128   ;;  %s2510_s11 = smov 8  }
  0x24   : > { %2234 = dma.hbm_to_vmem [thread:$0]  (!%p2581_p7), %s3182_s2, 2048, %s154_s24, [#allocation5], %s2509_s10, %s2509_s10, %s2510_s11  }
  0x25   : > { %s2409_s23 = scalar_lea.hbm %s3183_s3, 16 }
  0x26   : > { %p2410_p8 = scmp.ne.s32.totalorder %s3183_s3, %s2409_s23  ;;  %p2416_p5 = scmp.lt.u32.totalorder %s2409_s23, %s3183_s3 }
  0x28   : > { %p2412_p1 = pnand %p2410_p8, %p2383_p9 }
  0x2a   : > { %p2413_p4 = pneg %p2412_p1 }
  0x2c   : > { %p2418_p10 = pnand %p2416_p5, %p2413_p4 }
  0x2e   : > { %2421 = shalt.err (!%p2418_p10)
}
  0x2f   : > { %s2422_s24 = scalar_lea.vmem %s2585_s27, 16  ;;  %s2429_s5 = scalar_lea.vmem %s2585_s27, 32 }
  0x30   : > { %p2423_p11 = scmp.ne.s32.totalorder %s2585_s27, %s2422_s24  ;;  %p2430_p0 = scmp.lt.s32.totalorder %s2585_s27, %s2585_s27 }
  0x31   : > { %p2431_p2 = scmp.lt.s32.totalorder %s2429_s5, %s2422_s24 }
  0x32   : > { %p2425_p12 = pnand %p2423_p11, %p2383_p9 }
  0x33   : > { %p2432_p3 = por %p2431_p2, %p2430_p0 }
  0x34   : > { %p2426_p13 = pneg %p2425_p12 }
  0x36   : > { %p2433_p6 = pnand %p2432_p3, %p2426_p13 }
  0x38   : > { %2436 = shalt.err (!%p2433_p6)
}
  0x39   : > { %2237 = dma.hbm_to_vmem [thread:$0]  (!%p2581_p7), %s3183_s3, 16, %s2585_s27, [#allocation5]  }
  0x3a   : > { %s2636_s8 = sadd.s32 1, %s2505_s18   ;;  %s25_s9 = sadd.s32 1, %s2501_s17 }
  0x3b   : > { %s22_s25 = ssub.s32 %s2505_s18, %s2636_s8  ;;  %p32_p9 = scmp.ne.s32.totalorder %s2501_s17, %s2497_s16 }
  0x3c   : > { %p23_p8 = scmp.eq.s32.totalorder %s22_s25, 0  ;;  %p33_p1 = scmp.eq.s32.totalorder %s2505_s18, 0 }
  0x3d   : > { %p2244_p4 = scmp.lt.s32.totalorder %s2505_s18, 2  ;;  %s178_s10 = sand.u32 1, %s2501_s17  }
  0x3e   : > { %s2647_s11 = scalar_select %p23_p8, %s2501_s17, %s25_s9  }
  0x3f   : > { %p34_p5 = por %p33_p1, %p32_p9  ;;  %s1703_s12 = sshll.u32 %s178_s10, 10 }
  0x40   : > { %s1781_s13 = sshll.u32 %s2505_s18, 14  ;;  %s182_s27 = scalar_lea.vmem [#allocation2], %s1703_s12 }
  0x41   : > { %s2653_s23 = scalar_lea.hbm %s3180_s0, %s1781_s13  ;;  %s190_s26 = sshll.u32 %s182_s27, 4  ;;  %s2659_s26 = int_to_ptr.vmem [resolvable:$true] %s190_s26 }
  0x42   : > { %p2655_p7 = pnand %p2244_p4, %p34_p5  ;;  %s2661_s29 = scalar_lea.sflag [#allocation3], %s178_s10 }
  0x43   : > { %s2437_s30 = scalar_lea.hbm %s2653_s23, 16384  ;;  %s2442_s6 = scalar_lea.hbm %s3180_s0, 32768 }
  0x44   : > { %p2438_p10 = scmp.ne.s32.totalorder %s2653_s23, %s2437_s30  ;;  %p2439_p11 = pneg %p2655_p7 }
  0x45   : > { %p2443_p0 = scmp.lt.u32.totalorder %s2653_s23, %s3180_s0  ;;  %p2444_p2 = scmp.lt.u32.totalorder %s2442_s6, %s2437_s30 }
  0x46   : > { %p2440_p12 = pnand %p2439_p11, %p2438_p10  ;;  %p2446_p6 = scmp.lt.u32.totalorder %s2437_s30, %s2653_s23 }
  0x47   : > { %p2445_p3 = por %p2444_p2, %p2443_p0 }
  0x48   : > { %p2441_p13 = pneg %p2440_p12 }
  0x49   : > { %p2447_p9 = por %p2446_p6, %p2445_p3 }
  0x4b   : > { %p2448_p8 = pnand %p2447_p9, %p2441_p13 }
  0x4d   : > { %2451 = shalt.err (!%p2448_p8)
}
  0x4e   : > { %s2452_s25 = scalar_lea.vmem %s2659_s26, 16384  ;;  %s2511_s10 = smov [#allocation2]  }
  0x4f   : > { %p2453_p1 = scmp.ne.s32.totalorder %s2659_s26, %s2452_s25  ;;  %s2457_s12 = sshll.u32 %s2511_s10, 4  ;;  %s2458_s12 = int_to_ptr.vmem [resolvable:$false] %s2457_s12 }
  0x50   : > { %s2459_s13 = scalar_lea.vmem %s2458_s12, 32768  ;;  %p2460_p10 = scmp.lt.s32.totalorder %s2659_s26, %s2458_s12 }
  0x51   : > { %p2455_p4 = pnand %p2453_p1, %p2439_p11  ;;  %p2461_p12 = scmp.lt.s32.totalorder %s2459_s13, %s2452_s25 }
  0x53   : > { %p2456_p5 = pneg %p2455_p4  ;;  %p2462_p0 = por %p2461_p12, %p2460_p10 }
  0x55   : > { %p2463_p2 = pnand %p2462_p0, %p2456_p5 }
  0x57   : > { %2466 = shalt.err (!%p2463_p2)
}
  0x58   : > { %s2512_s14 = smov 512   ;;  %s2513_s15 = smov 32  }
  0x59   : > { %2241 = dma.hbm_to_vmem [thread:$0]  (!%p2655_p7), %s2653_s23, 16384, %s2659_s26, %s2661_s29, %s2512_s14, %s2512_s14, %s2513_s15  }
  0x5a   : > { %p3194_p11 = scmp.ne.s32.totalorder %s3191_s22, 0 }
  0x5b   : > { %s204_s27 = sand.u32 (!%p3194_p11), 1, %s2497_s16   ;;  %p3195_p13 = scmp.ne.s32.totalorder (!%p3194_p11), %s3190_s21, 0 }
  0x5c   : > { %202 = sbr.rel (%p3194_p11) target bundleno = 894 (0x37e), region = 36  ;;  %s1708_s30 = sshll.u32 (!%p3194_p11), %s204_s27, 10 }
  0x5d   : > { %s205_s24 = scalar_lea.sflag (!%p3194_p11), [#allocation3], %s204_s27  ;;  %s2692_s5 = scalar_lea.vmem (!%p3194_p11), [#allocation2], %s1708_s30 }
  0x63   : > { %2484 = dma.done.wait (%p3195_p13), %s205_s24, 16384  }
  0x64   : > { %2486 = vsyncadd (%p3195_p13), %s205_s24, 4294950912  ;;  %p3196_p3 = scmp.ne.s32.totalorder %s3189_s20, 0 }
  0x66   : > { %2488 = dma.done.wait (%p3196_p3), [#allocation5], 2064  }
  0x67   : > { %2490 = vsyncadd (%p3196_p3), [#allocation5], 4294965232  ;;  %v2285_v0 = vld [vmem:[%s3181_s1 + $0x40] sm:$0xff]   ;;  %v2287_v2 = vld [vmem:[%s3181_s1 + $0x48] sm:$0xff]  }
  0x68   : > { %v2286_v1 = vld [vmem:[%s3181_s1] sm:$0xff]   ;;  %2205 = vmatprep.subr.bf16.mxu1 %v2285_v0  ;;  %1909 = vmatprep.subr.bf16.mxu0 %v2285_v0  ;;  %v2288_v3 = vld [vmem:[%s3181_s1 + $0x8] sm:$0xff]   ;;  %v2289_v4 = vld [vmem:[%s3181_s1 + $0x50] sm:$0xff]  }
  0x69   : > { %2213 = vmatpush3.bf16.msra.mxu1 %v2286_v1  ;;  %1910 = vmatpush3.bf16.msra.mxu0 %v2286_v1  ;;  %v2290_v5 = vld [vmem:[%s3181_s1 + $0x10] sm:$0xff]   ;;  %v2291_v6 = vld [vmem:[%s3181_s1 + $0x58] sm:$0xff]   ;;  %v2293_v8 = vld [vmem:[%s3181_s1 + $0x60] sm:$0xff]  }
  0x6a   : > { %2206 = vmatprep.subr.bf16.mxu1 %v2287_v2  ;;  %1911 = vmatprep.subr.bf16.mxu0 %v2287_v2  ;;  %v2292_v7 = vld [vmem:[%s3181_s1 + $0x18] sm:$0xff]   ;;  %v2294_v9 = vld [vmem:[%s3181_s1 + $0x20] sm:$0xff]   ;;  %v2295_v10 = vld [vmem:[%s3181_s1 + $0x68] sm:$0xff]  }
  0x6b   : > { %v346_v11 = vld [vmem:[%s2692_s5 + $0x308] sm:$0xff]  ;;  %v2297_v15 = vld [vmem:[%s3181_s1 + $0x70] sm:$0xff]   ;;  %v2299_v17 = vld [vmem:[%s3181_s1 + $0x78] sm:$0xff]  }
  0x6c   : > { %v350_v12 = vld [vmem:[%s2692_s5 + $0x328] sm:$0xff]  ;;  %v2298_v16 = vld [vmem:[%s3181_s1 + $0x30] sm:$0xff]   ;;  %v2300_v18 = vld [vmem:[%s3181_s1 + $0x38] sm:$0xff]  }
  0x6d   : > { %2214 = vmatpush3.bf16.msra.mxu1 %v2288_v3  ;;  %1912 = vmatpush3.bf16.msra.mxu0 %v2288_v3  ;;  %v426_v13 = vpack.c.bf16 %v350_v12, %v346_v11  ;;  %v2296_v14 = vld [vmem:[%s3181_s1 + $0x28] sm:$0xff]   ;;  %v345_v19 = vld [vmem:[%s2692_s5 + $0x300] sm:$0xff]  ;;  %v2305_v31 = vld [vmem:[%s3181_s1 + $0xd0] sm:$0xff]  }
  0x6e   : > { %2207 = vmatprep.subr.bf16.mxu1 %v2289_v4  ;;  %1913 = vmatprep.subr.bf16.mxu0 %v2289_v4  ;;  %v349_v20 = vld [vmem:[%s2692_s5 + $0x320] sm:$0xff]  ;;  %v354_v22 = vld [vmem:[%s2692_s5 + $0x348] sm:$0xff]  ;;  %v2306_v39 = vld [vmem:[%s3181_s1 + $0x90] sm:$0xff]  }
  0x6f   : > { %825 = vmatprep.mubr.bf16.mxu1 %v426_v13  ;;  %v2301_v21 = vld [vmem:[%s3181_s1 + $0xc0] sm:$0xff]   ;;  %v358_v23 = vld [vmem:[%s2692_s5 + $0x368] sm:$0xff]  ;;  %v425_v24 = vpack.c.bf16 %v349_v20, %v345_v19  ;;  %v2307_v42 = vld [vmem:[%s3181_s1 + $0xd8] sm:$0xff]  }
  0x70   : > { %v2302_v25 = vld [vmem:[%s3181_s1 + $0x80] sm:$0xff]   ;;  %v430_v26 = vpack.c.bf16 %v358_v23, %v354_v22  ;;  %v2303_v27 = vld [vmem:[%s3181_s1 + $0xc8] sm:$0xff]   ;;  %v2308_v47 = vld [vmem:[%s3181_s1 + $0x98] sm:$0xff]  }
  0x71   : > { %2215 = vmatpush3.bf16.msra.mxu1 %v2290_v5  ;;  %1914 = vmatpush3.bf16.msra.mxu0 %v2290_v5  ;;  %v2304_v28 = vld [vmem:[%s3181_s1 + $0x88] sm:$0xff]   ;;  %v353_v29 = vld [vmem:[%s2692_s5 + $0x340] sm:$0xff]  ;;  %v2313_v4 = vld [vmem:[%s3181_s1 + $0xf0] sm:$0xff]  }
  0x72   : > { %2208 = vmatprep.subr.bf16.mxu1 %v2291_v6  ;;  %1915 = vmatprep.subr.bf16.mxu0 %v2291_v6  ;;  %v357_v30 = vld [vmem:[%s2692_s5 + $0x360] sm:$0xff]  ;;  %v362_v32 = vld [vmem:[%s2692_s5 + $0x388] sm:$0xff]  ;;  %v252_v5 = vld [vmem:[%s2692_s5 + $0x18] sm:$0xff] }
  0x73   : > { %v366_v33 = vld [vmem:[%s2692_s5 + $0x3a8] sm:$0xff]  ;;  %v429_v36 = vpack.c.bf16 %v357_v30, %v353_v29  ;;  %v249_v38 = vld [vmem:[%s2692_s5] sm:$0xff]  ;;  %v256_v6 = vld [vmem:[%s2692_s5 + $0x38] sm:$0xff] }
  0x74   : > { %v250_v34 = vld [vmem:[%s2692_s5 + $0x8] sm:$0xff]  ;;  %v434_v40 = vpack.c.bf16 %v366_v33, %v362_v32  ;;  %v253_v41 = vld [vmem:[%s2692_s5 + $0x20] sm:$0xff]  ;;  %v2314_v11 = vld [vmem:[%s3181_s1 + $0xb0] sm:$0xff]   ;;  %v380_v12 = vpack.c.bf16 %v256_v6, %v252_v5 }
  0x75   : > { %2216 = vmatpush3.bf16.msra.mxu1 %v2292_v7  ;;  %1916 = vmatpush3.bf16.msra.mxu0 %v2292_v7  ;;  %v254_v35 = vld [vmem:[%s2692_s5 + $0x28] sm:$0xff]  ;;  %v377_v43 = vpack.c.bf16 %v253_v41, %v249_v38  ;;  %v361_v48 = vld [vmem:[%s2692_s5 + $0x380] sm:$0xff]  ;;  %v2315_v13 = vld [vmem:[%s3181_s1 + $0xf8] sm:$0xff]  }
  0x76   : > { %2209 = vmatprep.subr.bf16.mxu1 %v2293_v8  ;;  %1917 = vmatprep.subr.bf16.mxu0 %v2293_v8  ;;  %v378_v37 = vpack.c.bf16 %v254_v35, %v250_v34  ;;  %v258_v44 = vld [vmem:[%s2692_s5 + $0x48] sm:$0xff]  ;;  %v365_v49 = vld [vmem:[%s2692_s5 + $0x3a0] sm:$0xff]  ;;  %v263_v29 = vld [vmem:[%s2692_s5 + $0x70] sm:$0xff] }
  0x77   : > { %v262_v45 = vld [vmem:[%s2692_s5 + $0x68] sm:$0xff]  ;;  %v257_v50 = vld [vmem:[%s2692_s5 + $0x40] sm:$0xff]  ;;  %v433_v57 = vpack.c.bf16 %v365_v49, %v361_v48  ;;  %v268_v30 = vld [vmem:[%s2692_s5 + $0x98] sm:$0xff] }
  0x78   : > { %729 = vmatprep.mubr.bf16.mxu0 %v378_v37  ;;  %v382_v46 = vpack.c.bf16 %v262_v45, %v258_v44  ;;  %v261_v51 = vld [vmem:[%s2692_s5 + $0x60] sm:$0xff]  ;;  %v370_v53 = vld [vmem:[%s2692_s5 + $0x3c8] sm:$0xff]  ;;  %v272_v33 = vld [vmem:[%s2692_s5 + $0xb8] sm:$0xff] }
  0x79   : > { %2217 = vmatpush3.bf16.msra.mxu1 %v2294_v9  ;;  %1918 = vmatpush3.bf16.msra.mxu0 %v2294_v9  ;;  %v2309_v52 = vld [vmem:[%s3181_s1 + $0xe0] sm:$0xff]   ;;  %v374_v54 = vld [vmem:[%s2692_s5 + $0x3e8] sm:$0xff]  ;;  %v381_v58 = vpack.c.bf16 %v261_v51, %v257_v50  ;;  %v388_v38 = vpack.c.bf16 %v272_v33, %v268_v30  ;;  %v271_v41 = vld [vmem:[%s2692_s5 + $0xb0] sm:$0xff] }
  0x7a   : > { %2210 = vmatprep.subr.bf16.mxu1 %v2295_v10  ;;  %1919 = vmatprep.subr.bf16.mxu0 %v2295_v10  ;;  %v266_v55 = vld [vmem:[%s2692_s5 + $0x88] sm:$0xff]  ;;  %v2310_v59 = vld [vmem:[%s3181_s1 + $0xa0] sm:$0xff]   ;;  %v438_v60 = vpack.c.bf16 %v374_v54, %v370_v53  ;;  %v280_v45 = vld [vmem:[%s2692_s5 + $0xf8] sm:$0xff] }
  0x7b   : > { %v270_v56 = vld [vmem:[%s2692_s5 + $0xa8] sm:$0xff]  ;;  %v369_v0 = vld [vmem:[%s2692_s5 + $0x3c0] sm:$0xff]  ;;  %v279_v53 = vld [vmem:[%s2692_s5 + $0xf0] sm:$0xff] }
  0x7c   : > { %v2311_v61 = vld [vmem:[%s3181_s1 + $0xe8] sm:$0xff]   ;;  %v386_v62 = vpack.c.bf16 %v270_v56, %v266_v55  ;;  %v373_v1 = vld [vmem:[%s2692_s5 + $0x3e0] sm:$0xff]  ;;  %v284_v54 = vld [vmem:[%s2692_s5 + $0x118] sm:$0xff] }
  0x7d   : > { %2218 = vmatpush3.bf16.msra.mxu1 %v2296_v14  ;;  %1920 = vmatpush3.bf16.msra.mxu0 %v2296_v14  ;;  %v2312_v63 = vld [vmem:[%s3181_s1 + $0xa8] sm:$0xff]   ;;  %v265_v2 = vld [vmem:[%s2692_s5 + $0x80] sm:$0xff]  ;;  %v437_v9 = vpack.c.bf16 %v373_v1, %v369_v0  ;;  %v283_v0 = vld [vmem:[%s2692_s5 + $0x110] sm:$0xff] }
  0x7e   : > { %2211 = vmatprep.subr.bf16.mxu1 %v2297_v15  ;;  %1921 = vmatprep.subr.bf16.mxu0 %v2297_v15  ;;  %v269_v3 = vld [vmem:[%s2692_s5 + $0xa0] sm:$0xff]  ;;  %v274_v7 = vld [vmem:[%s2692_s5 + $0xc8] sm:$0xff]  ;;  %v2316_v15 = vld [vmem:[%s3181_s1 + $0xb8] sm:$0xff]  }
  0x7f   : > { %v278_v8 = vld [vmem:[%s2692_s5 + $0xe8] sm:$0xff]  ;;  %v385_v10 = vpack.c.bf16 %v269_v3, %v265_v2  ;;  %v273_v19 = vld [vmem:[%s2692_s5 + $0xc0] sm:$0xff]  ;;  %v287_v1 = vld [vmem:[%s2692_s5 + $0x130] sm:$0xff] }
  0x80   : > { %v390_v14 = vpack.c.bf16 %v278_v8, %v274_v7  ;;  %v277_v20 = vld [vmem:[%s2692_s5 + $0xe0] sm:$0xff]  ;;  %v282_v22 = vld [vmem:[%s2692_s5 + $0x108] sm:$0xff]  ;;  %v292_v2 = vld [vmem:[%s2692_s5 + $0x158] sm:$0xff]  ;;  %v395_v8 = vpack.c.bf16 %v287_v1, %v283_v0 }
  0x81   : > { %2219 = vmatpush3.bf16.msra.mxu1 %v2298_v16  ;;  %1922 = vmatpush3.bf16.msra.mxu0 %v2298_v16  ;;  %v251_v16 = vld [vmem:[%s2692_s5 + $0x10] sm:$0xff]  ;;  %v286_v23 = vld [vmem:[%s2692_s5 + $0x128] sm:$0xff]  ;;  %v285_v32 = vld [vmem:[%s2692_s5 + $0x120] sm:$0xff] }
  0x82   : > { %2212 = vmatprep.subr.bf16.mxu1 %v2299_v17  ;;  %1923 = vmatprep.subr.bf16.mxu0 %v2299_v17  ;;  %v255_v17 = vld [vmem:[%s2692_s5 + $0x30] sm:$0xff]  ;;  %v290_v34 = vld [vmem:[%s2692_s5 + $0x148] sm:$0xff]  ;;  %v293_v44 = vld [vmem:[%s2692_s5 + $0x160] sm:$0xff] }
  0x83   : > { %v294_v35 = vld [vmem:[%s2692_s5 + $0x168] sm:$0xff]  ;;  %v297_v55 = vld [vmem:[%s2692_s5 + $0x180] sm:$0xff]  ;;  %v296_v5 = vld [vmem:[%s2692_s5 + $0x178] sm:$0xff] }
  0x84   : > { %v301_v56 = vld [vmem:[%s2692_s5 + $0x1a0] sm:$0xff]  ;;  %v314_v6 = vld [vmem:[%s2692_s5 + $0x208] sm:$0xff] }
  0x85   : > { %2220 = vmatpush3.bf16.msra.mxu1 %v2300_v18  ;;  %1924 = vmatpush3.bf16.msra.mxu0 %v2300_v18  ;;  %v260_v18 = vld [vmem:[%s2692_s5 + $0x58] sm:$0xff]  ;;  %v305_v3 = vld [vmem:[%s2692_s5 + $0x1c0] sm:$0xff]  ;;  %v318_v7 = vld [vmem:[%s2692_s5 + $0x228] sm:$0xff] }
  0x86   : > { %2021 = vmatprep.subr.bf16.mxu1 %v2301_v21  ;;  %v264_v21 = vld [vmem:[%s2692_s5 + $0x78] sm:$0xff]  ;;  %v330_v30 = vld [vmem:[%s2692_s5 + $0x288] sm:$0xff] }
  0x88   : > { %826 = vmatmul.mubr.bf16.vlgmr.msra.gmra.mrb[0].mxu1 %v425_v24  ;;  %730 = vmatmul.mubr.bf16.vlgmr.msra.gmra.mrb[0].mxu0 %v377_v43  ;;  %v379_v24 = vpack.c.bf16 %v255_v17, %v251_v16  ;;  %v289_v43 = vld [vmem:[%s2692_s5 + $0x140] sm:$0xff]  ;;  %v304_v17 = vld [vmem:[%s2692_s5 + $0x1b8] sm:$0xff] }
  0x89   : > { %2022 = vmatpush3.bf16.msra.mxu1 %v2302_v25  ;;  %833 = vmatprep.mubr.bf16.mxu1 %v430_v26  ;;  %v389_v25 = vpack.c.bf16 %v277_v20, %v273_v19  ;;  %v384_v26 = vpack.c.bf16 %v264_v21, %v260_v18  ;;  %v397_v49 = vpack.c.bf16 %v293_v44, %v289_v43  ;;  %v317_v16 = vld [vmem:[%s2692_s5 + $0x220] sm:$0xff]  ;;  %v322_v18 = vld [vmem:[%s2692_s5 + $0x248] sm:$0xff] }
  0x8a   : > { %2023 = vmatprep.subr.bf16.mxu1 %v2303_v27  ;;  %737 = vmatprep.mubr.bf16.mxu0 %v382_v46  ;;  %v394_v27 = vpack.c.bf16 %v286_v23, %v282_v22  ;;  %v298_v46 = vld [vmem:[%s2692_s5 + $0x188] sm:$0xff] }
  0x8b   : > { %v326_v19 = vld [vmem:[%s2692_s5 + $0x268] sm:$0xff] }
  0x8c   : > { %v414_v23 = vpack.c.bf16 %v326_v19, %v322_v18  ;;  %v342_v43 = vld [vmem:[%s2692_s5 + $0x2e8] sm:$0xff]  ;;  %v343_v18 = vld [vmem:[%s2692_s5 + $0x2f0] sm:$0xff]  ;;  %v348_v19 = vld [vmem:[%s2692_s5 + $0x318] sm:$0xff] }
  0x8d   : > { %2024 = vmatpush3.bf16.msra.mxu1 %v2304_v28  ;;  %v259_v28 = vld [vmem:[%s2692_s5 + $0x50] sm:$0xff] }
  0x8e   : > { %2025 = vmatprep.subr.bf16.mxu1 %v2305_v31  ;;  %v281_v31 = vld [vmem:[%s2692_s5 + $0x100] sm:$0xff] }
  0x8f   : > { %v393_v37 = vpack.c.bf16 %v285_v32, %v281_v31  ;;  %v334_v31 = vld [vmem:[%s2692_s5 + $0x2a8] sm:$0xff] }
  0x90   : > { %834 = vmatmul.mubr.bf16.gmra.mrb[4].mxu1 %v429_v36  ;;  %738 = vmatmul.mubr.bf16.gmra.mrb[4].mxu0 %v381_v58  ;;  %v383_v36 = vpack.c.bf16 %v263_v29, %v259_v28  ;;  %v306_v58 = vld [vmem:[%s2692_s5 + $0x1c8] sm:$0xff]  ;;  %v325_v28 = vld [vmem:[%s2692_s5 + $0x260] sm:$0xff]  ;;  %v312_v29 = vld [vmem:[%s2692_s5 + $0x1f8] sm:$0xff] }
  0x91   : > { %2026 = vmatpush3.bf16.msra.mxu1 %v2306_v39  ;;  %841 = vmatprep.mubr.bf16.mxu1 %v434_v40  ;;  %v398_v39 = vpack.c.bf16 %v294_v35, %v290_v34  ;;  %v267_v40 = vld [vmem:[%s2692_s5 + $0x90] sm:$0xff]  ;;  %v418_v35 = vpack.c.bf16 %v334_v31, %v330_v30  ;;  %v356_v31 = vld [vmem:[%s2692_s5 + $0x358] sm:$0xff] }
  0x92   : > { %2027 = vmatprep.subr.bf16.mxu1 %v2307_v42  ;;  %745 = vmatprep.mubr.bf16.mxu0 %v386_v62  ;;  %v276_v42 = vld [vmem:[%s2692_s5 + $0xd8] sm:$0xff]  ;;  %v387_v48 = vpack.c.bf16 %v271_v41, %v267_v40  ;;  %v333_v40 = vld [vmem:[%s2692_s5 + $0x2a0] sm:$0xff]  ;;  %v351_v30 = vld [vmem:[%s2692_s5 + $0x330] sm:$0xff] }
  0x93   : > { %v392_v50 = vpack.c.bf16 %v280_v45, %v276_v42  ;;  %v320_v41 = vld [vmem:[%s2692_s5 + $0x238] sm:$0xff]  ;;  %v338_v42 = vld [vmem:[%s2692_s5 + $0x2c8] sm:$0xff] }
  0x95   : > { %2028 = vmatpush3.bf16.msra.mxu1 %v2308_v47  ;;  %v302_v47 = vld [vmem:[%s2692_s5 + $0x1a8] sm:$0xff] }
  0x96   : > { %2029 = vmatprep.subr.bf16.mxu1 %v2309_v52  ;;  %v402_v51 = vpack.c.bf16 %v302_v47, %v298_v46  ;;  %v275_v52 = vld [vmem:[%s2692_s5 + $0xd0] sm:$0xff]  ;;  %v422_v47 = vpack.c.bf16 %v342_v43, %v338_v42  ;;  %v364_v43 = vld [vmem:[%s2692_s5 + $0x398] sm:$0xff] }
  0x97   : > { %v359_v42 = vld [vmem:[%s2692_s5 + $0x370] sm:$0xff] }
  0x98   : > { %842 = vmatmul.mubr.bf16.gmra.mrb[8].mxu1 %v433_v57  ;;  %746 = vmatmul.mubr.bf16.gmra.mrb[8].mxu0 %v385_v10  ;;  %v288_v57 = vld [vmem:[%s2692_s5 + $0x138] sm:$0xff]  ;;  %v400_v10 = vpack.c.bf16 %v296_v5, %v292_v2  ;;  %v1037_v2 = vld [vmem:[#allocation4 + $0x10] sm:$0xff] }
  0x99   : > { %2030 = vmatpush3.bf16.msra.mxu1 %v2310_v59  ;;  %849 = vmatprep.mubr.bf16.mxu1 %v438_v60  ;;  %v310_v59 = vld [vmem:[%s2692_s5 + $0x1e8] sm:$0xff]  ;;  %v391_v60 = vpack.c.bf16 %v279_v53, %v275_v52  ;;  %v396_v62 = vpack.c.bf16 %v288_v57, %v284_v54  ;;  %v324_v52 = vld [vmem:[%s2692_s5 + $0x258] sm:$0xff]  ;;  %v1035_v57 = vld [vmem:[#allocation4] sm:$0xff] }
  0x9a   : > { %2031 = vmatprep.subr.bf16.mxu1 %v2311_v61  ;;  %753 = vmatprep.mubr.bf16.mxu0 %v390_v14  ;;  %v401_v61 = vpack.c.bf16 %v301_v56, %v297_v55  ;;  %v300_v14 = vld [vmem:[%s2692_s5 + $0x198] sm:$0xff]  ;;  %v331_v5 = vld [vmem:[%s2692_s5 + $0x290] sm:$0xff] }
  0x9b   : > { %v404_v22 = vpack.c.bf16 %v304_v17, %v300_v14  ;;  %v328_v53 = vld [vmem:[%s2692_s5 + $0x278] sm:$0xff]  ;;  %v1041_v14 = vld [vmem:[#allocation4 + $0x30] sm:$0xff] }
  0x9c   : > { %v416_v56 = vpack.c.bf16 %v328_v53, %v324_v52  ;;  %v339_v17 = vld [vmem:[%s2692_s5 + $0x2d0] sm:$0xff] }
  0x9d   : > { %2032 = vmatpush3.bf16.msra.mxu1 %v2312_v63  ;;  %v406_v63 = vpack.c.bf16 %v310_v59, %v306_v58  ;;  %v1036_v58 = vld [vmem:[#allocation4 + $0x8] sm:$0xff]  ;;  %v371_v53 = vld [vmem:[%s2692_s5 + $0x3d0] sm:$0xff] }
  0x9e   : > { %2033 = vmatprep.subr.bf16.mxu1 %v2313_v4  ;;  %v309_v4 = vld [vmem:[%s2692_s5 + $0x1e0] sm:$0xff]  ;;  %v1051_v59 = vpack.c.bf16 %v1036_v58, %v1035_v57 }
  0xa0   : > { %850 = vmatmul.mubr.bf16.gmra.mrb[12].mxu1 %v437_v9  ;;  %754 = vmatmul.mubr.bf16.gmra.mrb[12].mxu0 %v389_v25  ;;  %v405_v9 = vpack.c.bf16 %v309_v4, %v305_v3  ;;  %v303_v25 = vld [vmem:[%s2692_s5 + $0x1b0] sm:$0xff]  ;;  %v1038_v3 = vld [vmem:[#allocation4 + $0x18] sm:$0xff] }
  0xa1   : > { %2034 = vmatpush3.bf16.msra.mxu1 %v2314_v11  ;;  %890 = vmatprep.mubr.bf16.mxu1 %v380_v12  ;;  %v410_v11 = vpack.c.bf16 %v318_v7, %v314_v6  ;;  %v291_v12 = vld [vmem:[%s2692_s5 + $0x150] sm:$0xff]  ;;  %v1052_v4 = vpack.c.bf16 %v1038_v3, %v1037_v2  ;;  %v340_v7 = vld [vmem:[%s2692_s5 + $0x2d8] sm:$0xff] }
  0xa2   : > { %2035 = vmatprep.subr.bf16.mxu1 %v2315_v13  ;;  %761 = vmatprep.mubr.bf16.mxu0 %v394_v27  ;;  %v295_v13 = vld [vmem:[%s2692_s5 + $0x170] sm:$0xff]  ;;  %v321_v27 = vld [vmem:[%s2692_s5 + $0x240] sm:$0xff] }
  0xa3   : > { %v399_v20 = vpack.c.bf16 %v295_v13, %v291_v12  ;;  %v413_v33 = vpack.c.bf16 %v325_v28, %v321_v27  ;;  %2157 = vmatprep.subr.bf16.mxu0 %v1051_v59  ;;  %v335_v6 = vld [vmem:[%s2692_s5 + $0x2b0] sm:$0xff]  ;;  %v1046_v27 = vld [vmem:[#allocation4 + $0x58] sm:$0xff] }
  0xa4   : > { %2158 = vmatpush3.bf16.msra.mxu0 %v1051_v59  ;;  %v419_v12 = vpack.c.bf16 %v335_v6, %v331_v5 }
  0xa5   : > { %2036 = vmatpush3.bf16.msra.mxu1 %v2316_v15  ;;  %v313_v15 = vld [vmem:[%s2692_s5 + $0x200] sm:$0xff]  ;;  %2159 = vmatprep.subr.bf16.mxu0 %v1052_v4 }
  0xa6   : > { %v409_v21 = vpack.c.bf16 %v317_v16, %v313_v15  ;;  %v1042_v15 = vld [vmem:[#allocation4 + $0x38] sm:$0xff] }
  0xa7   : > { %v1054_v16 = vpack.c.bf16 %v1042_v15, %v1041_v14 }
  0xa8   : > { %891 = vmatmul.mubr.bf16.vlgmr.msra.gmra.mrb[16].mxu1 %v379_v24  ;;  %762 = vmatmul.mubr.bf16.gmra.mrb[16].mxu0 %v393_v37  ;;  %v299_v24 = vld [vmem:[%s2692_s5 + $0x190] sm:$0xff] }
  0xa9   : > { %898 = vmatprep.mubr.bf16.mxu1 %v384_v26  ;;  %769 = vmatprep.mubr.bf16.mxu0 %v398_v39  ;;  %v308_v26 = vld [vmem:[%s2692_s5 + $0x1d8] sm:$0xff]  ;;  %v403_v32 = vpack.c.bf16 %v303_v25, %v299_v24  ;;  %v311_v37 = vld [vmem:[%s2692_s5 + $0x1f0] sm:$0xff]  ;;  %v329_v39 = vld [vmem:[%s2692_s5 + $0x280] sm:$0xff]  ;;  %v423_v24 = vpack.c.bf16 %v343_v18, %v339_v17 }
  0xaa   : > { %v408_v34 = vpack.c.bf16 %v312_v29, %v308_v26  ;;  %v417_v45 = vpack.c.bf16 %v333_v40, %v329_v39  ;;  %2160 = vmatpush3.bf16.msra.mxu0 %v1052_v4  ;;  %v1045_v26 = vld [vmem:[#allocation4 + $0x50] sm:$0xff]  ;;  %v1050_v39 = vld [vmem:[#allocation4 + $0x78] sm:$0xff] }
  0xab   : > { %v1056_v28 = vpack.c.bf16 %v1046_v27, %v1045_v26  ;;  %v347_v29 = vld [vmem:[%s2692_s5 + $0x310] sm:$0xff] }
  0xb0   : > { %899 = vmatmul.mubr.bf16.gmra.mrb[20].mxu1 %v383_v36  ;;  %770 = vmatmul.mubr.bf16.gmra.mrb[20].mxu0 %v397_v49  ;;  %v307_v36 = vld [vmem:[%s2692_s5 + $0x1d0] sm:$0xff] }
  0xb1   : > { %906 = vmatprep.mubr.bf16.mxu1 %v388_v38  ;;  %777 = vmatprep.mubr.bf16.mxu0 %v402_v51  ;;  %v316_v38 = vld [vmem:[%s2692_s5 + $0x218] sm:$0xff]  ;;  %v407_v44 = vpack.c.bf16 %v311_v37, %v307_v36  ;;  %v319_v49 = vld [vmem:[%s2692_s5 + $0x230] sm:$0xff]  ;;  %v341_v51 = vld [vmem:[%s2692_s5 + $0x2e0] sm:$0xff]  ;;  %v427_v36 = vpack.c.bf16 %v351_v30, %v347_v29 }
  0xb2   : > { %v412_v46 = vpack.c.bf16 %v320_v41, %v316_v38  ;;  %v1049_v38 = vld [vmem:[#allocation4 + $0x70] sm:$0xff] }
  0xb3   : > { %v1058_v40 = vpack.c.bf16 %v1050_v39, %v1049_v38  ;;  %v355_v41 = vld [vmem:[%s2692_s5 + $0x350] sm:$0xff] }
  0xb8   : > { %907 = vmatmul.mubr.bf16.gmra.mrb[24].mxu1 %v387_v48  ;;  %778 = vmatmul.mubr.bf16.gmra.mrb[24].mxu0 %v401_v61  ;;  %v315_v48 = vld [vmem:[%s2692_s5 + $0x210] sm:$0xff] }
  0xb9   : > { %914 = vmatprep.mubr.bf16.mxu1 %v392_v50  ;;  %785 = vmatprep.mubr.bf16.mxu0 %v406_v63  ;;  %v337_v50 = vld [vmem:[%s2692_s5 + $0x2c0] sm:$0xff]  ;;  %v411_v54 = vpack.c.bf16 %v319_v49, %v315_v48  ;;  %v327_v61 = vld [vmem:[%s2692_s5 + $0x270] sm:$0xff]  ;;  %v336_v63 = vld [vmem:[%s2692_s5 + $0x2b8] sm:$0xff] }
  0xba   : > { %v421_v55 = vpack.c.bf16 %v341_v51, %v337_v50  ;;  %v367_v48 = vld [vmem:[%s2692_s5 + $0x3b0] sm:$0xff]  ;;  %v372_v49 = vld [vmem:[%s2692_s5 + $0x3d8] sm:$0xff] }
  0xbb   : > { %v376_v50 = vld [vmem:[%s2692_s5 + $0x3f8] sm:$0xff] }
  0xbc   : > { %v440_v52 = vpack.c.bf16 %v376_v50, %v372_v49 }
  0xc0   : > { %915 = vmatmul.mubr.bf16.gmra.mrb[28].mxu1 %v391_v60  ;;  %786 = vmatmul.mubr.bf16.gmra.mrb[28].mxu0 %v405_v9  ;;  %v323_v60 = vld [vmem:[%s2692_s5 + $0x250] sm:$0xff]  ;;  %v1039_v9 = vld [vmem:[#allocation4 + $0x20] sm:$0xff] }
  0xc1   : > { %922 = vmatprep.mubr.bf16.mxu1 %v396_v62  ;;  %793 = vmatprep.mubr.bf16.mxu0 %v410_v11  ;;  %v332_v62 = vld [vmem:[%s2692_s5 + $0x298] sm:$0xff]  ;;  %v415_v0 = vpack.c.bf16 %v327_v61, %v323_v60 }
  0xc2   : > { %v420_v1 = vpack.c.bf16 %v336_v63, %v332_v62 }
  0xc8   : > { %923 = vmatmul.mubr.bf16.gmra.mrb[32].mxu1 %v395_v8  ;;  %794 = vmatmul.mubr.bf16.gmra.mrb[32].mxu0 %v409_v21  ;;  %v344_v8 = vld [vmem:[%s2692_s5 + $0x2f8] sm:$0xff]  ;;  %v1043_v21 = vld [vmem:[#allocation4 + $0x40] sm:$0xff] }
  0xc9   : > { %930 = vmatprep.mubr.bf16.mxu1 %v400_v10  ;;  %801 = vmatprep.mubr.bf16.mxu0 %v414_v23  ;;  %v1040_v10 = vld [vmem:[#allocation4 + $0x28] sm:$0xff]  ;;  %v424_v13 = vpack.c.bf16 %v344_v8, %v340_v7 }
  0xca   : > { %v1053_v11 = vpack.c.bf16 %v1040_v10, %v1039_v9 }
  0xcc   : > { %2161 = vmatprep.subr.bf16.mxu0 %v1053_v11 }
  0xcd   : > { %2162 = vmatpush3.bf16.msra.mxu0 %v1053_v11 }
  0xce   : > { %2163 = vmatprep.subr.bf16.mxu0 %v1054_v16 }
  0xd0   : > { %931 = vmatmul.mubr.bf16.gmra.mrb[36].mxu1 %v399_v20  ;;  %802 = vmatmul.mubr.bf16.gmra.mrb[36].mxu0 %v413_v33  ;;  %v352_v20 = vld [vmem:[%s2692_s5 + $0x338] sm:$0xff]  ;;  %v1047_v33 = vld [vmem:[#allocation4 + $0x60] sm:$0xff] }
  0xd1   : > { %938 = vmatprep.mubr.bf16.mxu1 %v404_v22  ;;  %809 = vmatprep.mubr.bf16.mxu0 %v418_v35  ;;  %v1044_v22 = vld [vmem:[#allocation4 + $0x48] sm:$0xff]  ;;  %v428_v25 = vpack.c.bf16 %v352_v20, %v348_v19 }
  0xd2   : > { %2164 = vmatpush3.bf16.msra.mxu0 %v1054_v16  ;;  %v1055_v23 = vpack.c.bf16 %v1044_v22, %v1043_v21 }
  0xd4   : > { %2165 = vmatprep.subr.bf16.mxu0 %v1055_v23 }
  0xd6   : > { %2166 = vmatpush3.bf16.msra.mxu0 %v1055_v23 }
  0xd7   : > { %2167 = vmatprep.subr.bf16.mxu0 %v1056_v28 }
  0xd8   : > { %939 = vmatmul.mubr.bf16.gmra.mrb[40].mxu1 %v403_v32  ;;  %810 = vmatmul.mubr.bf16.gmra.mrb[40].mxu0 %v417_v45  ;;  %v360_v32 = vld [vmem:[%s2692_s5 + $0x378] sm:$0xff]  ;;  %v431_v45 = vpack.c.bf16 %v359_v42, %v355_v41 }
  0xd9   : > { %946 = vmatprep.mubr.bf16.mxu1 %v408_v34  ;;  %817 = vmatprep.mubr.bf16.mxu0 %v422_v47  ;;  %v1048_v34 = vld [vmem:[#allocation4 + $0x68] sm:$0xff]  ;;  %v432_v37 = vpack.c.bf16 %v360_v32, %v356_v31  ;;  %v363_v47 = vld [vmem:[%s2692_s5 + $0x390] sm:$0xff] }
  0xda   : > { %2168 = vmatpush3.bf16.msra.mxu0 %v1056_v28  ;;  %v1057_v35 = vpack.c.bf16 %v1048_v34, %v1047_v33  ;;  %v435_v51 = vpack.c.bf16 %v367_v48, %v363_v47 }
  0xdc   : > { %2169 = vmatprep.subr.bf16.mxu0 %v1057_v35 }
  0xde   : > { %2170 = vmatpush3.bf16.msra.mxu0 %v1057_v35 }
  0xdf   : > { %2171 = vmatprep.subr.bf16.mxu0 %v1058_v40 }
  0xe0   : > { %947 = vmatmul.mubr.bf16.gmra.mrb[44].mxu1 %v407_v44  ;;  %818 = vmatmul.mubr.bf16.gmra.mrb[44].mxu0 %v421_v55  ;;  %v368_v44 = vld [vmem:[%s2692_s5 + $0x3b8] sm:$0xff] }
  0xe1   : > { %954 = vmatprep.mubr.bf16.mxu1 %v412_v46  ;;  %v436_v46 = vpack.c.bf16 %v368_v44, %v364_v43 }
  0xe2   : > { %2172 = vmatpush3.bf16.msra.mxu0 %v1058_v40 }
  0xe8   : > { %955 = vmatmul.mubr.bf16.gmra.mrb[48].mxu1 %v411_v54  ;;  %v375_v54 = vld [vmem:[%s2692_s5 + $0x3f0] sm:$0xff]  ;;  %s1711_s5 = sshll.u32 %s1697_s19, 5 }
  0xe9   : > { %962 = vmatprep.mubr.bf16.mxu1 %v416_v56  ;;  %v439_v55 = vpack.c.bf16 %v375_v54, %v371_v53  ;;  %p243_p7 = scmp.lt.s32.totalorder %s1711_s5, 63 }
  0xeb   : > { %s3202_s5 = smov (!%p243_p7, %s1711_s5), 63 }
  0xec   : > { %s1712_s7 = sshll.u32 %s3202_s5, 2 }
  0xed   : > { %s3120_s20 = scalar_lea.vmem %s3184_s4, %s1712_s7 }
  0xf0   : > { %963 = vmatmul.mubr.bf16.gmra.mrb[52].mxu1 %v415_v0 }
  0xf1   : > { %970 = vmatprep.mubr.bf16.mxu1 %v420_v1 }
  0xf8   : > { %971 = vmatmul.mubr.bf16.gmra.mrb[56].mxu1 %v419_v12 }
  0xf9   : > { %978 = vmatprep.mubr.bf16.mxu1 %v424_v13 }
 0x100   : > { %979 = vmatmul.mubr.bf16.gmra.mrb[60].mxu1 %v423_v24 }
 0x101   : > { %986 = vmatprep.mubr.bf16.mxu1 %v428_v25 }
 0x108   : > { %987 = vmatmul.mubr.bf16.gmra.mrb[64].mxu1 %v427_v36 }
 0x109   : > { %994 = vmatprep.mubr.bf16.mxu1 %v432_v37 }
 0x110   : > { %995 = vmatmul.mubr.bf16.gmra.mrb[68].mxu1 %v431_v45 }
 0x111   : > { %1002 = vmatprep.mubr.bf16.mxu1 %v436_v46 }
 0x118   : > { %1003 = vmatmul.mubr.bf16.gmra.mrb[72].mxu1 %v435_v51 }
 0x119   : > { %1010 = vmatprep.mubr.bf16.mxu1 %v440_v52 }
 0x120   : > { %1011 = vmatmul.mubr.bf16.gmra.mrb[76].mxu1 %v439_v55 }
 0x15b   : > { %v1997_v56 = vpop.f32.mrb[0].mxu1  ;;  %v1925_v63 = vpop.f32.mrb[0].mxu0 }
 0x15c   : > { %v1998_v57 = vpop.f32.mrb[1].mxu1  ;;  %v1926_v1 = vpop.f32.mrb[1].mxu0 }
 0x15d   : > { %v2926_v58 = vadd.f32 %v1998_v57, %v1997_v56  ;;  %v2000_v59 = vpop.f32.mrb[2].mxu1  ;;  %v1927_v4 = vadd.f32 %v1926_v1, %v1925_v63  ;;  %v1928_v5 = vpop.f32.mrb[2].mxu0 }
 0x15e   : > { %v2001_v60 = vpop.f32.mrb[3].mxu1  ;;  %v1929_v7 = vpop.f32.mrb[3].mxu0 }
 0x15f   : > { %v2928_v61 = vadd.f32 %v2001_v60, %v2000_v59  ;;  %v1930_v9 = vadd.f32 %v1929_v7, %v1928_v5 }
 0x163   : > { %v2003_v62 = vpop.f32.mrb[4].mxu1  ;;  %v1931_v11 = vpop.f32.mrb[4].mxu0 }
 0x164   : > { %v2004_v0 = vpop.f32.mrb[5].mxu1  ;;  %v1932_v13 = vpop.f32.mrb[5].mxu0 }
 0x165   : > { %v2930_v2 = vadd.f32 %v2004_v0, %v2003_v62  ;;  %v2006_v3 = vpop.f32.mrb[6].mxu1  ;;  %v1933_v16 = vadd.f32 %v1932_v13, %v1931_v11  ;;  %v1934_v17 = vpop.f32.mrb[6].mxu0 }
 0x166   : > { %v2007_v6 = vpop.f32.mrb[7].mxu1  ;;  %v1935_v19 = vpop.f32.mrb[7].mxu0 }
 0x167   : > { %v2932_v8 = vadd.f32 %v2007_v6, %v2006_v3  ;;  %v1936_v21 = vadd.f32 %v1935_v19, %v1934_v17 }
 0x16b   : > { %v2009_v10 = vpop.f32.mrb[8].mxu1  ;;  %v1937_v23 = vpop.f32.mrb[8].mxu0 }
 0x16c   : > { %v2010_v12 = vpop.f32.mrb[9].mxu1  ;;  %v1938_v25 = vpop.f32.mrb[9].mxu0 }
 0x16d   : > { %v2934_v14 = vadd.f32 %v2010_v12, %v2009_v10  ;;  %v2012_v15 = vpop.f32.mrb[10].mxu1  ;;  %v1939_v28 = vadd.f32 %v1938_v25, %v1937_v23  ;;  %v1940_v29 = vpop.f32.mrb[10].mxu0 }
 0x16e   : > { %v2013_v18 = vpop.f32.mrb[11].mxu1  ;;  %v1941_v31 = vpop.f32.mrb[11].mxu0 }
 0x16f   : > { %v2936_v20 = vadd.f32 %v2013_v18, %v2012_v15  ;;  %v1942_v33 = vadd.f32 %v1941_v31, %v1940_v29 }
 0x173   : > { %v2015_v22 = vpop.f32.mrb[12].mxu1  ;;  %v1943_v35 = vpop.f32.mrb[12].mxu0 }
 0x174   : > { %v2016_v24 = vpop.f32.mrb[13].mxu1  ;;  %v1944_v37 = vpop.f32.mrb[13].mxu0 }
 0x175   : > { %v2938_v26 = vadd.f32 %v2016_v24, %v2015_v22  ;;  %v2018_v27 = vpop.f32.mrb[14].mxu1  ;;  %v1945_v40 = vadd.f32 %v1944_v37, %v1943_v35  ;;  %v1946_v41 = vpop.f32.mrb[14].mxu0 }
 0x176   : > { %v2019_v30 = vpop.f32.mrb[15].mxu1  ;;  %v1947_v43 = vpop.f32.mrb[15].mxu0 }
 0x177   : > { %v2940_v32 = vadd.f32 %v2019_v30, %v2018_v27  ;;  %v1948_v46 = vadd.f32 %v1947_v43, %v1946_v41 }
 0x17b   : > { %v2037_v34 = vpop.f32.mrb[16].mxu1  ;;  %v1949_v50 = vpop.f32.mrb[16].mxu0 }
 0x17c   : > { %v2038_v36 = vpop.f32.mrb[17].mxu1  ;;  %v1950_v52 = vpop.f32.mrb[17].mxu0 }
 0x17d   : > { %v2039_v38 = vadd.f32 %v2038_v36, %v2037_v34  ;;  %v2040_v39 = vpop.f32.mrb[18].mxu1  ;;  %v1951_v55 = vadd.f32 %v1950_v52, %v1949_v50  ;;  %v1952_v56 = vpop.f32.mrb[18].mxu0 }
 0x17e   : > { %v2041_v42 = vpop.f32.mrb[19].mxu1  ;;  %v1953_v59 = vpop.f32.mrb[19].mxu0 }
 0x17f   : > { %v893_v44 = vadd.f32 %v2039_v38, %v1927_v4  ;;  %v2042_v45 = vadd.f32 %v2041_v42, %v2040_v39  ;;  %v1954_v63 = vadd.f32 %v1953_v59, %v1952_v56 }
 0x181   : > { %v896_v47 = vadd.f32 %v2042_v45, %v1930_v9 }
 0x183   : > { %v2043_v48 = vpop.f32.mrb[20].mxu1  ;;  %v1019_v49 = vpack.c.bf16 %v896_v47, %v893_v44  ;;  %v1955_v4 = vpop.f32.mrb[20].mxu0 }
 0x184   : > { %v2044_v51 = vpop.f32.mrb[21].mxu1  ;;  %v1956_v6 = vpop.f32.mrb[21].mxu0 }
 0x185   : > { %v2045_v53 = vadd.f32 %v2044_v51, %v2043_v48  ;;  %v2046_v54 = vpop.f32.mrb[22].mxu1  ;;  %2173 = vmatprep.mubr.bf16.mxu0 %v1019_v49  ;;  %v1957_v10 = vadd.f32 %v1956_v6, %v1955_v4  ;;  %v1958_v11 = vpop.f32.mrb[22].mxu0 }
 0x186   : > { %v2047_v57 = vpop.f32.mrb[23].mxu1  ;;  %v1959_v13 = vpop.f32.mrb[23].mxu0 }
 0x187   : > { %v901_v60 = vadd.f32 %v2045_v53, %v1933_v16  ;;  %v2048_v62 = vadd.f32 %v2047_v57, %v2046_v54  ;;  %v1960_v18 = vadd.f32 %v1959_v13, %v1958_v11 }
 0x189   : > { %v904_v0 = vadd.f32 %v2048_v62, %v1936_v21 }
 0x18b   : > { %v1020_v1 = vpack.c.bf16 %v904_v0, %v901_v60  ;;  %v2049_v3 = vpop.f32.mrb[24].mxu1  ;;  %v1961_v23 = vpop.f32.mrb[24].mxu0 }
 0x18c   : > { %v2050_v5 = vpop.f32.mrb[25].mxu1  ;;  %v1962_v24 = vpop.f32.mrb[25].mxu0 }
 0x18d   : > { %v2051_v7 = vadd.f32 %v2050_v5, %v2049_v3  ;;  %v2052_v9 = vpop.f32.mrb[26].mxu1  ;;  %2174 = vmatmul.mubr.bf16.vlgmr.msra.gmra.mrb[48].mxu0 %v1020_v1  ;;  %v1963_v29 = vadd.f32 %v1962_v24, %v1961_v23  ;;  %v1964_v30 = vpop.f32.mrb[26].mxu0 }
 0x18e   : > { %v2053_v12 = vpop.f32.mrb[27].mxu1  ;;  %v1965_v34 = vpop.f32.mrb[27].mxu0 }
 0x18f   : > { %v909_v15 = vadd.f32 %v2051_v7, %v1939_v28  ;;  %v2054_v17 = vadd.f32 %v2053_v12, %v2052_v9  ;;  %v1966_v37 = vadd.f32 %v1965_v34, %v1964_v30 }
 0x191   : > { %v912_v19 = vadd.f32 %v2054_v17, %v1942_v33 }
 0x193   : > { %v2055_v16 = vpop.f32.mrb[28].mxu1  ;;  %v1021_v22 = vpack.c.bf16 %v912_v19, %v909_v15  ;;  %v1967_v41 = vpop.f32.mrb[28].mxu0 }
 0x194   : > { %v2056_v21 = vpop.f32.mrb[29].mxu1  ;;  %v1968_v42 = vpop.f32.mrb[29].mxu0 }
 0x195   : > { %v2057_v25 = vadd.f32 %v2056_v21, %v2055_v16  ;;  %v2058_v27 = vpop.f32.mrb[30].mxu1  ;;  %2177 = vmatprep.mubr.bf16.mxu0 %v1021_v22  ;;  %v1969_v45 = vadd.f32 %v1968_v42, %v1967_v41  ;;  %v1970_v47 = vpop.f32.mrb[30].mxu0 }
 0x196   : > { %v2059_v31 = vpop.f32.mrb[31].mxu1  ;;  %v1971_v49 = vpop.f32.mrb[31].mxu0 }
 0x197   : > { %v917_v35 = vadd.f32 %v2057_v25, %v1945_v40  ;;  %v2060_v36 = vadd.f32 %v2059_v31, %v2058_v27  ;;  %v1972_v52 = vadd.f32 %v1971_v49, %v1970_v47 }
 0x199   : > { %v920_v38 = vadd.f32 %v2060_v36, %v1948_v46 }
 0x19b   : > { %v2061_v28 = vpop.f32.mrb[32].mxu1  ;;  %v1022_v39 = vpack.c.bf16 %v920_v38, %v917_v35  ;;  %v1973_v56 = vpop.f32.mrb[32].mxu0 }
 0x19c   : > { %v2062_v33 = vpop.f32.mrb[33].mxu1  ;;  %v1974_v57 = vpop.f32.mrb[33].mxu0 }
 0x19d   : > { %v2063_v43 = vadd.f32 %v2062_v33, %v2061_v28  ;;  %v2064_v44 = vpop.f32.mrb[34].mxu1  ;;  %2178 = vmatmul.mubr.bf16.gmra.mrb[52].mxu0 %v1022_v39  ;;  %v1975_v62 = vadd.f32 %v1974_v57, %v1973_v56  ;;  %v1976_v0 = vpop.f32.mrb[34].mxu0 }
 0x19e   : > { %v2065_v48 = vpop.f32.mrb[35].mxu1  ;;  %v1977_v3 = vpop.f32.mrb[35].mxu0 }
 0x19f   : > { %v925_v50 = vadd.f32 %v2063_v43, %v1951_v55  ;;  %v2066_v51 = vadd.f32 %v2065_v48, %v2064_v44  ;;  %v1978_v6 = vadd.f32 %v1977_v3, %v1976_v0 }
 0x1a1   : > { %v928_v53 = vadd.f32 %v2066_v51, %v1954_v63 }
 0x1a3   : > { %v2067_v40 = vpop.f32.mrb[36].mxu1  ;;  %v1023_v54 = vpack.c.bf16 %v928_v53, %v925_v50  ;;  %v1979_v11 = vpop.f32.mrb[36].mxu0 }
 0x1a4   : > { %v2068_v46 = vpop.f32.mrb[37].mxu1  ;;  %v1980_v12 = vpop.f32.mrb[37].mxu0 }
 0x1a5   : > { %v2069_v59 = vadd.f32 %v2068_v46, %v2067_v40  ;;  %v2070_v60 = vpop.f32.mrb[38].mxu1  ;;  %2181 = vmatprep.mubr.bf16.mxu0 %v1023_v54  ;;  %v1981_v17 = vadd.f32 %v1980_v12, %v1979_v11  ;;  %v1982_v19 = vpop.f32.mrb[38].mxu0 }
 0x1a6   : > { %v2071_v1 = vpop.f32.mrb[39].mxu1  ;;  %v1983_v22 = vpop.f32.mrb[39].mxu0 }
 0x1a7   : > { %v933_v4 = vadd.f32 %v2069_v59, %v1957_v10  ;;  %v2072_v5 = vadd.f32 %v2071_v1, %v2070_v60  ;;  %v1984_v24 = vadd.f32 %v1983_v22, %v1982_v19 }
 0x1a9   : > { %v936_v7 = vadd.f32 %v2072_v5, %v1960_v18 }
 0x1ab   : > { %v2073_v55 = vpop.f32.mrb[40].mxu1  ;;  %v1024_v9 = vpack.c.bf16 %v936_v7, %v933_v4  ;;  %v1985_v30 = vpop.f32.mrb[40].mxu0 }
 0x1ac   : > { %v2074_v63 = vpop.f32.mrb[41].mxu1  ;;  %v1986_v31 = vpop.f32.mrb[41].mxu0 }
 0x1ad   : > { %v2075_v13 = vadd.f32 %v2074_v63, %v2073_v55  ;;  %v2076_v15 = vpop.f32.mrb[42].mxu1  ;;  %2182 = vmatmul.mubr.bf16.gmra.mrb[56].mxu0 %v1024_v9  ;;  %v1987_v36 = vadd.f32 %v1986_v31, %v1985_v30  ;;  %v1988_v38 = vpop.f32.mrb[42].mxu0 }
 0x1ae   : > { %v2077_v16 = vpop.f32.mrb[43].mxu1  ;;  %v1989_v39 = vpop.f32.mrb[43].mxu0 }
 0x1af   : > { %v941_v23 = vadd.f32 %v2075_v13, %v1963_v29  ;;  %v2078_v21 = vadd.f32 %v2077_v16, %v2076_v15  ;;  %v1990_v42 = vadd.f32 %v1989_v39, %v1988_v38 }
 0x1b1   : > { %v944_v25 = vadd.f32 %v2078_v21, %v1966_v37 }
 0x1b3   : > { %v2079_v10 = vpop.f32.mrb[44].mxu1  ;;  %v1025_v27 = vpack.c.bf16 %v944_v25, %v941_v23  ;;  %v1991_v47 = vpop.f32.mrb[44].mxu0 }
 0x1b4   : > { %v2080_v18 = vpop.f32.mrb[45].mxu1  ;;  %v1992_v48 = vpop.f32.mrb[45].mxu0 }
 0x1b5   : > { %v2081_v34 = vadd.f32 %v2080_v18, %v2079_v10  ;;  %v2082_v35 = vpop.f32.mrb[46].mxu1  ;;  %2185 = vmatprep.mubr.bf16.mxu0 %v1025_v27  ;;  %v1993_v51 = vadd.f32 %v1992_v48, %v1991_v47  ;;  %v1994_v53 = vpop.f32.mrb[46].mxu0 }
 0x1b6   : > { %v2083_v28 = vpop.f32.mrb[47].mxu1  ;;  %v1995_v54 = vpop.f32.mrb[47].mxu0 }
 0x1b7   : > { %v949_v41 = vadd.f32 %v2081_v34, %v1969_v45  ;;  %v2084_v33 = vadd.f32 %v2083_v28, %v2082_v35  ;;  %v1996_v57 = vadd.f32 %v1995_v54, %v1994_v53 }
 0x1b9   : > { %v952_v43 = vadd.f32 %v2084_v33, %v1972_v52 }
 0x1bb   : > { %v2085_v29 = vpop.f32.mrb[48].mxu1  ;;  %v1026_v44 = vpack.c.bf16 %v952_v43, %v949_v41 }
 0x1bc   : > { %v2086_v37 = vpop.f32.mrb[49].mxu1 }
 0x1bd   : > { %v2087_v49 = vadd.f32 %v2086_v37, %v2085_v29  ;;  %v2088_v50 = vpop.f32.mrb[50].mxu1  ;;  %2186 = vmatmul.mubr.bf16.gmra.mrb[60].mxu0 %v1026_v44 }
 0x1be   : > { %v2089_v40 = vpop.f32.mrb[51].mxu1 }
 0x1bf   : > { %v957_v56 = vadd.f32 %v2087_v49, %v1975_v62  ;;  %v2090_v46 = vadd.f32 %v2089_v40, %v2088_v50 }
 0x1c1   : > { %v960_v59 = vadd.f32 %v2090_v46, %v1978_v6 }
 0x1c3   : > { %v2091_v45 = vpop.f32.mrb[52].mxu1  ;;  %v1027_v60 = vpack.c.bf16 %v960_v59, %v957_v56 }
 0x1c4   : > { %v2092_v0 = vpop.f32.mrb[53].mxu1 }
 0x1c5   : > { %v2093_v52 = vadd.f32 %v2092_v0, %v2091_v45  ;;  %v2094_v1 = vpop.f32.mrb[54].mxu1  ;;  %2189 = vmatprep.mubr.bf16.mxu0 %v1027_v60 }
 0x1c6   : > { %v2095_v3 = vpop.f32.mrb[55].mxu1 }
 0x1c7   : > { %v965_v4 = vadd.f32 %v2093_v52, %v1981_v17  ;;  %v2096_v5 = vadd.f32 %v2095_v3, %v2094_v1  ;;  %v2950_v1 = vld [vmem:[#allocation6] ss:$0 sm:$0xff] }
 0x1c9   : > { %v968_v7 = vadd.f32 %v2096_v5, %v1984_v24 }
 0x1cb   : > { %v2097_v55 = vpop.f32.mrb[56].mxu1  ;;  %v1028_v9 = vpack.c.bf16 %v968_v7, %v965_v4 }
 0x1cc   : > { %v2098_v11 = vpop.f32.mrb[57].mxu1 }
 0x1cd   : > { %v2099_v63 = vadd.f32 %v2098_v11, %v2097_v55  ;;  %v2100_v12 = vpop.f32.mrb[58].mxu1  ;;  %2190 = vmatmul.mubr.bf16.gmra.mrb[64].mxu0 %v1028_v9 }
 0x1ce   : > { %v2101_v62 = vpop.f32.mrb[59].mxu1 }
 0x1cf   : > { %v973_v13 = vadd.f32 %v2099_v63, %v1987_v36  ;;  %v2102_v15 = vadd.f32 %v2101_v62, %v2100_v12 }
 0x1d1   : > { %v976_v6 = vadd.f32 %v2102_v15, %v1990_v42 }
 0x1d3   : > { %v2103_v19 = vpop.f32.mrb[60].mxu1  ;;  %v1029_v16 = vpack.c.bf16 %v976_v6, %v973_v13 }
 0x1d4   : > { %v2104_v22 = vpop.f32.mrb[61].mxu1 }
 0x1d5   : > { %v2105_v23 = vadd.f32 %v2104_v22, %v2103_v19  ;;  %v2106_v21 = vpop.f32.mrb[62].mxu1  ;;  %2193 = vmatprep.mubr.bf16.mxu0 %v1029_v16 }
 0x1d6   : > { %v2107_v25 = vpop.f32.mrb[63].mxu1 }
 0x1d7   : > { %v981_v17 = vadd.f32 %v2105_v23, %v1993_v51  ;;  %v2108_v10 = vadd.f32 %v2107_v25, %v2106_v21 }
 0x1d9   : > { %v984_v24 = vadd.f32 %v2108_v10, %v1996_v57 }
 0x1db   : > { %v2109_v27 = vpop.f32.mrb[64].mxu1  ;;  %v1030_v30 = vpack.c.bf16 %v984_v24, %v981_v17 }
 0x1dc   : > { %v2110_v18 = vpop.f32.mrb[65].mxu1 }
 0x1dd   : > { %v2111_v31 = vadd.f32 %v2110_v18, %v2109_v27  ;;  %v2112_v34 = vpop.f32.mrb[66].mxu1  ;;  %2194 = vmatmul.mubr.bf16.gmra.mrb[68].mxu0 %v1030_v30 }
 0x1de   : > { %v2113_v35 = vpop.f32.mrb[67].mxu1 }
 0x1df   : > { %v989_v36 = vadd.f32 %v2111_v31, %v2926_v58  ;;  %v2114_v38 = vadd.f32 %v2113_v35, %v2112_v34 }
 0x1e1   : > { %v992_v28 = vadd.f32 %v2114_v38, %v2928_v61 }
 0x1e3   : > { %v2115_v39 = vpop.f32.mrb[68].mxu1  ;;  %v1031_v41 = vpack.c.bf16 %v992_v28, %v989_v36 }
 0x1e4   : > { %v2116_v33 = vpop.f32.mrb[69].mxu1 }
 0x1e5   : > { %v2117_v42 = vadd.f32 %v2116_v33, %v2115_v39  ;;  %v2118_v43 = vpop.f32.mrb[70].mxu1  ;;  %2197 = vmatprep.mubr.bf16.mxu0 %v1031_v41 }
 0x1e6   : > { %v2119_v29 = vpop.f32.mrb[71].mxu1 }
 0x1e7   : > { %v997_v44 = vadd.f32 %v2117_v42, %v2930_v2  ;;  %v2120_v47 = vadd.f32 %v2119_v29, %v2118_v43 }
 0x1e9   : > { %v1000_v37 = vadd.f32 %v2120_v47, %v2932_v8 }
 0x1eb   : > { %v2121_v48 = vpop.f32.mrb[72].mxu1  ;;  %v1032_v49 = vpack.c.bf16 %v1000_v37, %v997_v44 }
 0x1ec   : > { %v2122_v50 = vpop.f32.mrb[73].mxu1 }
 0x1ed   : > { %v2123_v51 = vadd.f32 %v2122_v50, %v2121_v48  ;;  %v2124_v58 = vpop.f32.mrb[74].mxu1  ;;  %2198 = vmatmul.mubr.bf16.gmra.mrb[72].mxu0 %v1032_v49 }
 0x1ee   : > { %v2125_v53 = vpop.f32.mrb[75].mxu1 }
 0x1ef   : > { %v1005_v61 = vadd.f32 %v2123_v51, %v2934_v14  ;;  %v2126_v40 = vadd.f32 %v2125_v53, %v2124_v58 }
 0x1f1   : > { %v1008_v54 = vadd.f32 %v2126_v40, %v2936_v20 }
 0x1f3   : > { %v2127_v56 = vpop.f32.mrb[76].mxu1  ;;  %v1033_v46 = vpack.c.bf16 %v1008_v54, %v1005_v61 }
 0x1f4   : > { %v2128_v57 = vpop.f32.mrb[77].mxu1 }
 0x1f5   : > { %v2129_v59 = vadd.f32 %v2128_v57, %v2127_v56  ;;  %v2130_v2 = vpop.f32.mrb[78].mxu1  ;;  %2201 = vmatprep.mubr.bf16.mxu0 %v1033_v46 }
 0x1f6   : > { %v2131_v45 = vpop.f32.mrb[79].mxu1 }
 0x1f7   : > { %v1013_v8 = vadd.f32 %v2129_v59, %v2938_v26  ;;  %v2132_v60 = vadd.f32 %v2131_v45, %v2130_v2 }
 0x1f9   : > { %v1016_v0 = vadd.f32 %v2132_v60, %v2940_v32 }
 0x1fb   : > { %v1034_v52 = vpack.c.bf16 %v1016_v0, %v1013_v8 }
 0x1fd   : > { %2202 = vmatmul.mubr.bf16.gmra.mrb[76].mxu0 %v1034_v52 }
 0x260   : > { %v2175_v14 = vpop.f32.mrb[48].mxu0 }
 0x261   : > { %v2953_v3 = vadd.f32 %v2175_v14, %v2950_v1  ;;  %v1100_v20 = vpop.f32.mrb[49].mxu0 }
 0x262   : > { %v2956_v4 = vadd.f32 %v2950_v1, %v1100_v20  ;;  %v2176_v5 = vpop.f32.mrb[50].mxu0 }
 0x263   : > { %v2959_v7 = vadd.f32 %v2176_v5, %v2950_v1  ;;  %v1103_v26 = vpop.f32.mrb[51].mxu0  ;;  %v1229_v32 = vmul.f32 %v2953_v3, %v2953_v3 }
 0x264   : > { %v2964_v55 = vadd.f32 %v2950_v1, %v1103_v26  ;;  %v1227_v9 = vmul.f32 %v2956_v4, %v2956_v4 }
 0x265   : > { %1263 = vadd.xlane.f32.xlu1 %v1229_v32  ;;  %v1230_v11 = vmul.f32 %v2959_v7, %v2959_v7 }
 0x266   : > { %1259 = vadd.xlane.f32.xlu0 %v1227_v9  ;;  %v1228_v63 = vmul.f32 %v2964_v55, %v2964_v55 }
 0x269   : > { %1265 = vadd.xlane.f32.xlu1 %v1230_v11 }
 0x26a   : > { %1261 = vadd.xlane.f32.xlu0 %v1228_v63 }
 0x270   : > { %v2179_v12 = vpop.f32.mrb[52].mxu0 }
 0x271   : > { %v2973_v62 = vadd.f32 %v2179_v12, %v2950_v1  ;;  %v1116_v13 = vpop.f32.mrb[53].mxu0 }
 0x272   : > { %v2180_v15 = vpop.f32.mrb[54].mxu0  ;;  %v2976_v6 = vadd.f32 %v2950_v1, %v1116_v13 }
 0x273   : > { %v2979_v19 = vadd.f32 %v2180_v15, %v2950_v1  ;;  %v1119_v16 = vpop.f32.mrb[55].mxu0  ;;  %v1233_v22 = vmul.f32 %v2973_v62, %v2973_v62 }
 0x274   : > { %v2984_v23 = vadd.f32 %v2950_v1, %v1119_v16  ;;  %v1231_v25 = vmul.f32 %v2976_v6, %v2976_v6 }
 0x275   : > { %1271 = vadd.xlane.f32.xlu0 %v1233_v22  ;;  %v1234_v21 = vmul.f32 %v2979_v19, %v2979_v19 }
 0x276   : > { %v1232_v17 = vmul.f32 %v2984_v23, %v2984_v23 }
 0x277   : > { %1273 = vadd.xlane.f32.xlu1 %v1234_v21 }
 0x279   : > { %1267 = vadd.xlane.f32.xlu0 %v1231_v25 }
 0x27b   : > { %1269 = vadd.xlane.f32.xlu1 %v1232_v17 }
 0x280   : > { %v2183_v10 = vpop.f32.mrb[56].mxu0 }
 0x281   : > { %v2993_v24 = vadd.f32 %v2183_v10, %v2950_v1  ;;  %v1132_v27 = vpop.f32.mrb[57].mxu0 }
 0x282   : > { %v2184_v30 = vpop.f32.mrb[58].mxu0  ;;  %v2996_v18 = vadd.f32 %v2950_v1, %v1132_v27 }
 0x283   : > { %v2999_v31 = vadd.f32 %v2184_v30, %v2950_v1  ;;  %v1135_v34 = vpop.f32.mrb[59].mxu0  ;;  %v1237_v35 = vmul.f32 %v2993_v24, %v2993_v24 }
 0x284   : > { %v3004_v36 = vadd.f32 %v2950_v1, %v1135_v34  ;;  %v1235_v28 = vmul.f32 %v2996_v18, %v2996_v18 }
 0x285   : > { %1279 = vadd.xlane.f32.xlu0 %v1237_v35  ;;  %v1238_v38 = vmul.f32 %v2999_v31, %v2999_v31 }
 0x286   : > { %v1236_v39 = vmul.f32 %v3004_v36, %v3004_v36 }
 0x287   : > { %1281 = vadd.xlane.f32.xlu1 %v1238_v38 }
 0x289   : > { %1275 = vadd.xlane.f32.xlu0 %v1235_v28 }
 0x28b   : > { %1277 = vadd.xlane.f32.xlu1 %v1236_v39 }
 0x290   : > { %v2187_v41 = vpop.f32.mrb[60].mxu0 }
 0x291   : > { %v3013_v33 = vadd.f32 %v2187_v41, %v2950_v1  ;;  %v1148_v42 = vpop.f32.mrb[61].mxu0 }
 0x292   : > { %v2188_v43 = vpop.f32.mrb[62].mxu0  ;;  %v3016_v29 = vadd.f32 %v2950_v1, %v1148_v42 }
 0x293   : > { %v3019_v44 = vadd.f32 %v2188_v43, %v2950_v1  ;;  %v1151_v47 = vpop.f32.mrb[63].mxu0  ;;  %v1241_v37 = vmul.f32 %v3013_v33, %v3013_v33 }
 0x294   : > { %v3024_v48 = vadd.f32 %v2950_v1, %v1151_v47  ;;  %v1239_v50 = vmul.f32 %v3016_v29, %v3016_v29 }
 0x295   : > { %1287 = vadd.xlane.f32.xlu0 %v1241_v37  ;;  %v1242_v49 = vmul.f32 %v3019_v44, %v3019_v44 }
 0x296   : > { %v1240_v51 = vmul.f32 %v3024_v48, %v3024_v48 }
 0x297   : > { %1289 = vadd.xlane.f32.xlu1 %v1242_v49 }
 0x299   : > { %1283 = vadd.xlane.f32.xlu0 %v1239_v50 }
 0x29b   : > { %1285 = vadd.xlane.f32.xlu1 %v1240_v51 }
 0x2a0   : > { %v2191_v58 = vpop.f32.mrb[64].mxu0 }
 0x2a1   : > { %v3033_v53 = vadd.f32 %v2191_v58, %v2950_v1  ;;  %v1164_v61 = vpop.f32.mrb[65].mxu0 }
 0x2a2   : > { %v2192_v40 = vpop.f32.mrb[66].mxu0  ;;  %v3036_v54 = vadd.f32 %v2950_v1, %v1164_v61 }
 0x2a3   : > { %v3039_v56 = vadd.f32 %v2192_v40, %v2950_v1  ;;  %v1167_v46 = vpop.f32.mrb[67].mxu0  ;;  %v1245_v57 = vmul.f32 %v3033_v53, %v3033_v53 }
 0x2a4   : > { %v3044_v59 = vadd.f32 %v2950_v1, %v1167_v46  ;;  %v1243_v45 = vmul.f32 %v3036_v54, %v3036_v54 }
 0x2a5   : > { %1295 = vadd.xlane.f32.xlu0 %v1245_v57  ;;  %v1246_v2 = vmul.f32 %v3039_v56, %v3039_v56 }
 0x2a6   : > { %v1244_v8 = vmul.f32 %v3044_v59, %v3044_v59 }
 0x2a7   : > { %1297 = vadd.xlane.f32.xlu1 %v1246_v2 }
 0x2a9   : > { %1291 = vadd.xlane.f32.xlu0 %v1243_v45 }
 0x2ab   : > { %1293 = vadd.xlane.f32.xlu1 %v1244_v8 }
 0x2b0   : > { %v2195_v60 = vpop.f32.mrb[68].mxu0 }
 0x2b1   : > { %v3053_v0 = vadd.f32 %v2195_v60, %v2950_v1  ;;  %v1180_v52 = vpop.f32.mrb[69].mxu0 }
 0x2b2   : > { %v2196_v14 = vpop.f32.mrb[70].mxu0  ;;  %v3056_v20 = vadd.f32 %v2950_v1, %v1180_v52 }
 0x2b3   : > { %v3059_v5 = vadd.f32 %v2196_v14, %v2950_v1  ;;  %v1183_v26 = vpop.f32.mrb[71].mxu0  ;;  %v1249_v32 = vmul.f32 %v3053_v0, %v3053_v0 }
 0x2b4   : > { %v3064_v9 = vadd.f32 %v2950_v1, %v1183_v26  ;;  %v1247_v63 = vmul.f32 %v3056_v20, %v3056_v20 }
 0x2b5   : > { %1303 = vadd.xlane.f32.xlu0 %v1249_v32  ;;  %v1250_v11 = vmul.f32 %v3059_v5, %v3059_v5 }
 0x2b6   : > { %v1248_v12 = vmul.f32 %v3064_v9, %v3064_v9 }
 0x2b7   : > { %1305 = vadd.xlane.f32.xlu1 %v1250_v11 }
 0x2b9   : > { %1299 = vadd.xlane.f32.xlu0 %v1247_v63 }
 0x2bb   : > { %1301 = vadd.xlane.f32.xlu1 %v1248_v12 }
 0x2c0   : > { %v2199_v13 = vpop.f32.mrb[72].mxu0 }
 0x2c1   : > { %v3073_v15 = vadd.f32 %v2199_v13, %v2950_v1  ;;  %v1196_v16 = vpop.f32.mrb[73].mxu0 }
 0x2c2   : > { %v2200_v22 = vpop.f32.mrb[74].mxu0  ;;  %v3076_v21 = vadd.f32 %v2950_v1, %v1196_v16 }
 0x2c3   : > { %v3079_v25 = vadd.f32 %v2200_v22, %v2950_v1  ;;  %v1199_v17 = vpop.f32.mrb[75].mxu0  ;;  %v1253_v10 = vmul.f32 %v3073_v15, %v3073_v15 }
 0x2c4   : > { %v3084_v27 = vadd.f32 %v2950_v1, %v1199_v17  ;;  %v1251_v34 = vmul.f32 %v3076_v21, %v3076_v21 }
 0x2c5   : > { %1311 = vadd.xlane.f32.xlu0 %v1253_v10  ;;  %v1254_v30 = vmul.f32 %v3079_v25, %v3079_v25 }
 0x2c6   : > { %v1252_v35 = vmul.f32 %v3084_v27, %v3084_v27 }
 0x2c7   : > { %1313 = vadd.xlane.f32.xlu1 %v1254_v30 }
 0x2c9   : > { %1307 = vadd.xlane.f32.xlu0 %v1251_v34 }
 0x2cb   : > { %1309 = vadd.xlane.f32.xlu1 %v1252_v35 }
 0x2d0   : > { %v2203_v38 = vpop.f32.mrb[76].mxu0 }
 0x2d1   : > { %v1212_v28 = vpop.f32.mrb[77].mxu0  ;;  %v3096_v43 = vadd.f32 %v2203_v38, %v2950_v1 }
 0x2d2   : > { %v3093_v39 = vadd.f32 %v2950_v1, %v1212_v28  ;;  %v2204_v41 = vpop.f32.mrb[78].mxu0 }
 0x2d3   : > { %v1215_v42 = vpop.f32.mrb[79].mxu0  ;;  %v3104_v49 = vadd.f32 %v2204_v41, %v2950_v1  ;;  %v1257_v51 = vmul.f32 %v3096_v43, %v3096_v43 }
 0x2d4   : > { %v3099_v47 = vadd.f32 %v2950_v1, %v1215_v42  ;;  %v1255_v37 = vmul.f32 %v3093_v39, %v3093_v39 }
 0x2d5   : > { %v1258_v58 = vmul.f32 %v3104_v49, %v3104_v49 }
 0x2d6   : > { %1315 = vadd.xlane.f32.xlu0 %v1255_v37  ;;  %v1256_v50 = vmul.f32 %v3099_v47, %v3099_v47 }
 0x2d8   : > { %1317 = vadd.xlane.f32.xlu1 %v1256_v50 }
 0x2da   : > { %1319 = vadd.xlane.f32.xlu0 %v1257_v51 }
 0x2dc   : > { %1321 = vadd.xlane.f32.xlu1 %v1258_v58 }
 0x2f2   : > { %v1264_v61 = vpop.xlane.xlu1 %1263 }
 0x2f3   : > { %v1325_v40 = vmax.f32 %v1264_v61, 1e-24  ;;  %v1260_v46 = vpop.xlane.xlu0 %1259 }
 0x2f4   : > { %v1323_v57 = vmax.f32 %v1260_v46, 1e-24 }
 0x2f5   : > { %2317 = vrsqrt.f32 %v1325_v40 }
 0x2f6   : > { %2319 = vrsqrt.f32 %v1323_v57  ;;  %v1266_v1 = vpop.xlane.xlu1 %1265 }
 0x2f7   : > { %v1326_v2 = vmax.f32 %v1266_v1, 1e-24  ;;  %v1262_v45 = vpop.xlane.xlu0 %1261 }
 0x2f8   : > { %v1324_v8 = vmax.f32 %v1262_v45, 1e-24 }
 0x2f9   : > { %2321 = vrsqrt.f32 %v1326_v2 }
 0x2fa   : > { %2323 = vrsqrt.f32 %v1324_v8 }
 0x2ff   : > { %v2318_v60 = vpop.eup %2317 }
 0x300   : > { %v2320_v52 = vpop.eup %2319  ;;  %v1389_v14 = vmul.f32 1.8, %v2318_v60 }
 0x301   : > { %v1387_v11 = vmul.f32 1.8, %v2320_v52 }
 0x302   : > { %v1272_v26 = vpop.xlane.xlu0 %1271  ;;  %v1421_v10 = vmul.f32 %v1389_v14, %v2953_v3 }
 0x303   : > { %v2322_v32 = vpop.eup %2321  ;;  %v1329_v63 = vmax.f32 %v1272_v26, 1e-24  ;;  %v1419_v35 = vmul.f32 %v1387_v11, %v2956_v4 }
 0x304   : > { %v2324_v12 = vpop.eup %2323  ;;  %v1390_v13 = vmul.f32 1.8, %v2322_v32  ;;  %v1274_v16 = vpop.xlane.xlu1 %1273 }
 0x305   : > { %v1388_v22 = vmul.f32 1.8, %v2324_v12  ;;  %2325 = vrsqrt.f32 %v1329_v63  ;;  %v1330_v17 = vmax.f32 %v1274_v16, 1e-24 }
 0x306   : > { %v1422_v30 = vmul.f32 %v1390_v13, %v2959_v7  ;;  %v1268_v34 = vpop.xlane.xlu0 %1267 }
 0x307   : > { %v1420_v38 = vmul.f32 %v1388_v22, %v2964_v55  ;;  %2327 = vrsqrt.f32 %v1330_v17  ;;  %v1327_v28 = vmax.f32 %v1268_v34, 1e-24 }
 0x308   : > { %v1822_v41 = vpack.c.bf16 %v1422_v30, %v1421_v10  ;;  %v1270_v42 = vpop.xlane.xlu1 %1269 }
 0x309   : > { %v1817_v37 = vpack.c.bf16 %v1420_v38, %v1419_v35  ;;  %2329 = vrsqrt.f32 %v1327_v28  ;;  %v1328_v3 = vmax.f32 %v1270_v42, 1e-24 }
 0x30a   : > { %1894 = vst [vmem:[%s3120_s20 + $0x8] sm:$0xff] %v1822_v41  }
 0x30b   : > { %1818 = vst [vmem:[%s3120_s20] sm:$0xff] %v1817_v37   ;;  %2331 = vrsqrt.f32 %v1328_v3 }
 0x30f   : > { %v2326_v4 = vpop.eup %2325 }
 0x310   : > { %v1393_v7 = vmul.f32 1.8, %v2326_v4 }
 0x311   : > { %v2328_v50 = vpop.eup %2327 }
 0x312   : > { %v1394_v51 = vmul.f32 1.8, %v2328_v50  ;;  %v1280_v58 = vpop.xlane.xlu0 %1279  ;;  %v1425_v55 = vmul.f32 %v1393_v7, %v2973_v62 }
 0x313   : > { %v2330_v61 = vpop.eup %2329  ;;  %v1333_v40 = vmax.f32 %v1280_v58, 1e-24 }
 0x314   : > { %v1426_v46 = vmul.f32 %v1394_v51, %v2979_v19  ;;  %v1391_v57 = vmul.f32 1.8, %v2330_v61  ;;  %v1282_v1 = vpop.xlane.xlu1 %1281 }
 0x315   : > { %v2332_v2 = vpop.eup %2331  ;;  %2333 = vrsqrt.f32 %v1333_v40  ;;  %v1334_v45 = vmax.f32 %v1282_v1, 1e-24 }
 0x316   : > { %v1832_v8 = vpack.c.bf16 %v1426_v46, %v1425_v55  ;;  %v1392_v60 = vmul.f32 1.8, %v2332_v2  ;;  %v1276_v52 = vpop.xlane.xlu0 %1275  ;;  %v1423_v26 = vmul.f32 %v1391_v57, %v2976_v6 }
 0x317   : > { %2335 = vrsqrt.f32 %v1334_v45  ;;  %v1331_v14 = vmax.f32 %v1276_v52, 1e-24 }
 0x318   : > { %1896 = vst [vmem:[%s3120_s20 + $0x18] sm:$0xff] %v1832_v8   ;;  %v1424_v32 = vmul.f32 %v1392_v60, %v2984_v23  ;;  %v1278_v11 = vpop.xlane.xlu1 %1277 }
 0x319   : > { %2337 = vrsqrt.f32 %v1331_v14  ;;  %v1332_v62 = vmax.f32 %v1278_v11, 1e-24 }
 0x31a   : > { %v1827_v19 = vpack.c.bf16 %v1424_v32, %v1423_v26 }
 0x31b   : > { %2339 = vrsqrt.f32 %v1332_v62 }
 0x31c   : > { %1895 = vst [vmem:[%s3120_s20 + $0x10] sm:$0xff] %v1827_v19  }
 0x31f   : > { %v2334_v63 = vpop.eup %2333 }
 0x320   : > { %v1397_v12 = vmul.f32 1.8, %v2334_v63 }
 0x321   : > { %v2336_v13 = vpop.eup %2335 }
 0x322   : > { %v1398_v16 = vmul.f32 1.8, %v2336_v13  ;;  %v1288_v22 = vpop.xlane.xlu0 %1287  ;;  %v1429_v30 = vmul.f32 %v1397_v12, %v2993_v24 }
 0x323   : > { %v2338_v17 = vpop.eup %2337  ;;  %v1337_v10 = vmax.f32 %v1288_v22, 1e-24 }
 0x324   : > { %v1430_v6 = vmul.f32 %v1398_v16, %v2999_v31  ;;  %v1395_v34 = vmul.f32 1.8, %v2338_v17  ;;  %v1290_v23 = vpop.xlane.xlu1 %1289 }
 0x325   : > { %v2340_v35 = vpop.eup %2339  ;;  %2341 = vrsqrt.f32 %v1337_v10  ;;  %v1338_v38 = vmax.f32 %v1290_v23, 1e-24 }
 0x326   : > { %v1842_v28 = vpack.c.bf16 %v1430_v6, %v1429_v30  ;;  %v1396_v41 = vmul.f32 1.8, %v2340_v35  ;;  %v1284_v42 = vpop.xlane.xlu0 %1283  ;;  %v1427_v3 = vmul.f32 %v1395_v34, %v2996_v18 }
 0x327   : > { %2343 = vrsqrt.f32 %v1338_v38  ;;  %v1335_v37 = vmax.f32 %v1284_v42, 1e-24 }
 0x328   : > { %1898 = vst [vmem:[%s3120_s20 + $0x28] sm:$0xff] %v1842_v28   ;;  %v1428_v4 = vmul.f32 %v1396_v41, %v3004_v36  ;;  %v1286_v7 = vpop.xlane.xlu1 %1285 }
 0x329   : > { %2345 = vrsqrt.f32 %v1335_v37  ;;  %v1336_v24 = vmax.f32 %v1286_v7, 1e-24 }
 0x32a   : > { %v1837_v31 = vpack.c.bf16 %v1428_v4, %v1427_v3 }
 0x32b   : > { %2347 = vrsqrt.f32 %v1336_v24 }
 0x32c   : > { %1897 = vst [vmem:[%s3120_s20 + $0x20] sm:$0xff] %v1837_v31  }
 0x32f   : > { %v2342_v50 = vpop.eup %2341 }
 0x330   : > { %v1401_v51 = vmul.f32 1.8, %v2342_v50 }
 0x331   : > { %v2344_v58 = vpop.eup %2343 }
 0x332   : > { %v1402_v61 = vmul.f32 1.8, %v2344_v58  ;;  %v1296_v40 = vpop.xlane.xlu0 %1295  ;;  %v1433_v57 = vmul.f32 %v1401_v51, %v3013_v33 }
 0x333   : > { %v2346_v55 = vpop.eup %2345  ;;  %v1341_v46 = vmax.f32 %v1296_v40, 1e-24 }
 0x334   : > { %v1434_v18 = vmul.f32 %v1402_v61, %v3019_v44  ;;  %v1399_v1 = vmul.f32 1.8, %v2346_v55  ;;  %v1298_v36 = vpop.xlane.xlu1 %1297 }
 0x335   : > { %v2348_v2 = vpop.eup %2347  ;;  %2349 = vrsqrt.f32 %v1341_v46  ;;  %v1342_v45 = vmax.f32 %v1298_v36, 1e-24 }
 0x336   : > { %v1852_v8 = vpack.c.bf16 %v1434_v18, %v1433_v57  ;;  %v1400_v60 = vmul.f32 1.8, %v2348_v2  ;;  %v1292_v52 = vpop.xlane.xlu0 %1291  ;;  %v1431_v26 = vmul.f32 %v1399_v1, %v3016_v29 }
 0x337   : > { %2351 = vrsqrt.f32 %v1342_v45  ;;  %v1339_v14 = vmax.f32 %v1292_v52, 1e-24 }
 0x338   : > { %1900 = vst [vmem:[%s3120_s20 + $0x38] sm:$0xff] %v1852_v8   ;;  %v1432_v32 = vmul.f32 %v1400_v60, %v3024_v48  ;;  %v1294_v11 = vpop.xlane.xlu1 %1293 }
 0x339   : > { %2353 = vrsqrt.f32 %v1339_v14  ;;  %v1340_v33 = vmax.f32 %v1294_v11, 1e-24 }
 0x33a   : > { %v1847_v44 = vpack.c.bf16 %v1432_v32, %v1431_v26 }
 0x33b   : > { %2355 = vrsqrt.f32 %v1340_v33 }
 0x33c   : > { %1899 = vst [vmem:[%s3120_s20 + $0x30] sm:$0xff] %v1847_v44  }
 0x33f   : > { %v2350_v62 = vpop.eup %2349 }
 0x340   : > { %v1405_v19 = vmul.f32 1.8, %v2350_v62 }
 0x341   : > { %v2352_v63 = vpop.eup %2351 }
 0x342   : > { %v1406_v12 = vmul.f32 1.8, %v2352_v63  ;;  %v1304_v13 = vpop.xlane.xlu0 %1303  ;;  %v1437_v17 = vmul.f32 %v1405_v19, %v3033_v53 }
 0x343   : > { %v2354_v16 = vpop.eup %2353  ;;  %v1345_v22 = vmax.f32 %v1304_v13, 1e-24 }
 0x344   : > { %v1438_v29 = vmul.f32 %v1406_v12, %v3039_v56  ;;  %v1403_v10 = vmul.f32 1.8, %v2354_v16  ;;  %v1306_v48 = vpop.xlane.xlu1 %1305 }
 0x345   : > { %v2356_v30 = vpop.eup %2355  ;;  %2357 = vrsqrt.f32 %v1345_v22  ;;  %v1346_v6 = vmax.f32 %v1306_v48, 1e-24 }
 0x346   : > { %v1862_v34 = vpack.c.bf16 %v1438_v29, %v1437_v17  ;;  %v1404_v23 = vmul.f32 1.8, %v2356_v30  ;;  %v1300_v35 = vpop.xlane.xlu0 %1299  ;;  %v1435_v28 = vmul.f32 %v1403_v10, %v3036_v54 }
 0x347   : > { %2359 = vrsqrt.f32 %v1346_v6  ;;  %v1343_v38 = vmax.f32 %v1300_v35, 1e-24 }
 0x348   : > { %1902 = vst [vmem:[%s3120_s20 + $0x48] sm:$0xff] %v1862_v34   ;;  %v1436_v41 = vmul.f32 %v1404_v23, %v3044_v59  ;;  %v1302_v42 = vpop.xlane.xlu1 %1301 }
 0x349   : > { %2361 = vrsqrt.f32 %v1343_v38  ;;  %v1344_v53 = vmax.f32 %v1302_v42, 1e-24 }
 0x34a   : > { %v1857_v56 = vpack.c.bf16 %v1436_v41, %v1435_v28 }
 0x34b   : > { %2363 = vrsqrt.f32 %v1344_v53 }
 0x34c   : > { %1901 = vst [vmem:[%s3120_s20 + $0x40] sm:$0xff] %v1857_v56  }
 0x34f   : > { %v2358_v37 = vpop.eup %2357 }
 0x350   : > { %v1409_v3 = vmul.f32 1.8, %v2358_v37 }
 0x351   : > { %v2360_v4 = vpop.eup %2359 }
 0x352   : > { %v1410_v7 = vmul.f32 1.8, %v2360_v4  ;;  %v1312_v24 = vpop.xlane.xlu0 %1311  ;;  %v1441_v51 = vmul.f32 %v1409_v3, %v3053_v0 }
 0x353   : > { %v2362_v31 = vpop.eup %2361  ;;  %v1349_v50 = vmax.f32 %v1312_v24, 1e-24 }
 0x354   : > { %v1442_v54 = vmul.f32 %v1410_v7, %v3059_v5  ;;  %v1407_v58 = vmul.f32 1.8, %v2362_v31  ;;  %v1314_v59 = vpop.xlane.xlu1 %1313 }
 0x355   : > { %v2364_v61 = vpop.eup %2363  ;;  %2365 = vrsqrt.f32 %v1349_v50  ;;  %v1350_v40 = vmax.f32 %v1314_v59, 1e-24 }
 0x356   : > { %v1872_v55 = vpack.c.bf16 %v1442_v54, %v1441_v51  ;;  %v1408_v46 = vmul.f32 1.8, %v2364_v61  ;;  %v1308_v57 = vpop.xlane.xlu0 %1307  ;;  %v1439_v1 = vmul.f32 %v1407_v58, %v3056_v20 }
 0x357   : > { %2367 = vrsqrt.f32 %v1350_v40  ;;  %v1347_v18 = vmax.f32 %v1308_v57, 1e-24 }
 0x358   : > { %1904 = vst [vmem:[%s3120_s20 + $0x58] sm:$0xff] %v1872_v55   ;;  %v1440_v36 = vmul.f32 %v1408_v46, %v3064_v9  ;;  %v1310_v2 = vpop.xlane.xlu1 %1309 }
 0x359   : > { %2369 = vrsqrt.f32 %v1347_v18  ;;  %v1348_v0 = vmax.f32 %v1310_v2, 1e-24 }
 0x35a   : > { %v1867_v5 = vpack.c.bf16 %v1440_v36, %v1439_v1 }
 0x35b   : > { %2371 = vrsqrt.f32 %v1348_v0 }
 0x35c   : > { %1903 = vst [vmem:[%s3120_s20 + $0x50] sm:$0xff] %v1867_v5  }
 0x35f   : > { %v2366_v45 = vpop.eup %2365 }
 0x360   : > { %v1413_v8 = vmul.f32 1.8, %v2366_v45 }
 0x361   : > { %v2368_v60 = vpop.eup %2367 }
 0x362   : > { %v1414_v52 = vmul.f32 1.8, %v2368_v60  ;;  %v1445_v32 = vmul.f32 %v1413_v8, %v3073_v15 }
 0x363   : > { %v2370_v14 = vpop.eup %2369  ;;  %v1316_v26 = vpop.xlane.xlu0 %1315 }
 0x364   : > { %v1446_v11 = vmul.f32 %v1414_v52, %v3079_v25  ;;  %v1411_v20 = vmul.f32 1.8, %v2370_v14  ;;  %v1351_v33 = vmax.f32 %v1316_v26, 1e-24 }
 0x365   : > { %v2372_v9 = vpop.eup %2371  ;;  %v1318_v44 = vpop.xlane.xlu1 %1317 }
 0x366   : > { %v1882_v62 = vpack.c.bf16 %v1446_v11, %v1445_v32  ;;  %v1412_v19 = vmul.f32 1.8, %v2372_v9  ;;  %2373 = vrsqrt.f32 %v1351_v33  ;;  %v1352_v63 = vmax.f32 %v1318_v44, 1e-24 }
 0x367   : > { %v1320_v12 = vpop.xlane.xlu0 %1319  ;;  %v1443_v13 = vmul.f32 %v1411_v20, %v3076_v21 }
 0x368   : > { %1906 = vst [vmem:[%s3120_s20 + $0x68] sm:$0xff] %v1882_v62   ;;  %v1444_v16 = vmul.f32 %v1412_v19, %v3084_v27  ;;  %v1353_v22 = vmax.f32 %v1320_v12, 1e-24  ;;  %2375 = vrsqrt.f32 %v1352_v63 }
 0x369   : > { %v1322_v15 = vpop.xlane.xlu1 %1321 }
 0x36a   : > { %v1877_v17 = vpack.c.bf16 %v1444_v16, %v1443_v13  ;;  %2377 = vrsqrt.f32 %v1353_v22  ;;  %v1354_v25 = vmax.f32 %v1322_v15, 1e-24 }
 0x36c   : > { %1905 = vst [vmem:[%s3120_s20 + $0x60] sm:$0xff] %v1877_v17   ;;  %2379 = vrsqrt.f32 %v1354_v25 }
 0x370   : > { %v2374_v29 = vpop.eup %2373 }
 0x371   : > { %v1415_v10 = vmul.f32 1.8, %v2374_v29 }
 0x372   : > { %v2376_v48 = vpop.eup %2375 }
 0x373   : > { %v1416_v6 = vmul.f32 1.8, %v2376_v48  ;;  %v1447_v21 = vmul.f32 %v1415_v10, %v3093_v39 }
 0x374   : > { %v2378_v30 = vpop.eup %2377 }
 0x375   : > { %v1417_v34 = vmul.f32 1.8, %v2378_v30  ;;  %v1448_v27 = vmul.f32 %v1416_v6, %v3099_v47 }
 0x376   : > { %v2380_v23 = vpop.eup %2379 }
 0x377   : > { %v1418_v35 = vmul.f32 1.8, %v2380_v23  ;;  %v1887_v38 = vpack.c.bf16 %v1448_v27, %v1447_v21  ;;  %v1449_v28 = vmul.f32 %v1417_v34, %v3096_v43 }
 0x379   : > { %v1450_v41 = vmul.f32 %v1418_v35, %v3104_v49  ;;  %1907 = vst [vmem:[%s3120_s20 + $0x70] sm:$0xff] %v1887_v38  }
 0x37b   : > { %v1892_v42 = vpack.c.bf16 %v1450_v41, %v1449_v28 }
 0x37d   : > { %1908 = vst [vmem:[%s3120_s20 + $0x78] sm:$0xff] %v1892_v42  }
 0x37e PF: > { %p15_p6 = scmp.ge.s32.totalorder %s2636_s8, 4   ;;  %s3197_s15 = smov %s2497_s16 }
 0x37f   : > { %s3198_s16 = smov %s2501_s17  ;;  %s3199_s17 = smov %s2647_s11 }
 0x380   : > { %s3200_s18 = smov %s2636_s8  ;;  %17 = sbr.rel (!%p15_p6) target bundleno = 4 (0x4), region = 84 }
 0x387   :  { %1633 = vsyncpa [#allocation3], 1 }
 0x388   :  { %1635 = vsyncpa [#allocation3 + $0x1], 1 }
 0x389   :  { %1636 = vsyncpa [#allocation5], 1 }

</bundles_post_ra>
